<compile_context>
chip_gen: v5e
topology: v5e:2x2
jax: 0.10.0
libtpu: 0.0.40
codegen_flags: <defaults>
</compile_context>

<pallas_src>
import functools

import jax
import jax.numpy as jnp
import numpy as np
from jax.experimental import pallas as pl
from jax.experimental.pallas import tpu as pltpu

# ------------------- small synthetic config (LlamaDeepSeekConfig fields) -------------------
BATCH = 2
SEQ = 8
HIDDEN = 128            # lane-dense (multiple of 128)
INTERMEDIATE = 256
NUM_EXPERTS = 8
TOP_K = 2               # num_experts_per_tok


# ---------------------------------------- kernel ----------------------------------------
def _moe_kernel(x_ref, wr_ref, wgu_ref, wd_ref, o_ref):
    """router (f32) -> top-k softmax -> fused gate/up bf16 matmul -> fused weighted down."""
    tm = x_ref.shape[0]
    n_exp = wr_ref.shape[1]
    inter = wd_ref.shape[0] // n_exp

    x32 = x_ref[...]                                   # (TM, H) f32
    xb = x32.astype(jnp.bfloat16)                      # MXU operand

    # ---- router kept in f32: top-k expert selection is quantization-sensitive ----
    logits = jnp.dot(x32, wr_ref[...], preferred_element_type=jnp.float32)   # (TM, E)
    e_ids = jax.lax.broadcasted_iota(jnp.int32, (tm, n_exp), 1)

    # ---- top-k routing (unrolled over static k; first-occurrence tie-break) ----
    masks, vals = [], []
    work = logits
    for _ in range(TOP_K):
        mk = jnp.max(work, axis=-1, keepdims=True)                           # (TM, 1)
        ik = jnp.min(jnp.where(work == mk, e_ids, n_exp), axis=-1, keepdims=True)
        sel = e_ids == ik                                                    # (TM, E)
        masks.append(sel)
        vals.append(mk)
        work = jnp.where(sel, -jnp.inf, work)

    # softmax over the k selected logits (vals[0] is the row max -> stable); EUP recip
    exps = [jnp.exp(v - vals[0]) for v in vals]
    inv_denom = pl.reciprocal(functools.reduce(lambda a, b: a + b, exps), approx=True)
    dense_w = functools.reduce(
        lambda a, b: a + b,
        [jnp.where(m, ex * inv_denom, 0.0) for m, ex in zip(masks, exps)])   # (TM, E) f32

    # ---- ONE fused gate/up matmul across all experts (bf16 operands, f32 accum) ----
    gu = jnp.dot(xb, wgu_ref[...], preferred_element_type=jnp.float32)       # (TM, 2*E*I)
    g_all = gu[:, : n_exp * inter]                                           # (TM, E*I)
    u_all = gu[:, n_exp * inter:]                                            # (TM, E*I)

    # SiLU(g) * u in f32; the divide goes to the EUP via approx reciprocal
    h_all = g_all * pl.reciprocal(1.0 + jnp.exp(-g_all), approx=True) * u_all

    # broadcast each expert's routing weight across its I columns (static column slices)
    w_cols = jnp.concatenate(
        [jnp.broadcast_to(dense_w[:, e:e + 1], (tm, inter)) for e in range(n_exp)],
        axis=-1)                                                             # (TM, E*I)
    h_scaled = (h_all * w_cols).astype(jnp.bfloat16)

    # ---- ONE fused down projection == routing-weighted sum over experts ----
    #   concat_e(w_e*h_e) @ stack_e(Wd_e)  ==  sum_e w_e * (h_e @ Wd_e)
    out = jnp.dot(h_scaled, wd_ref[...], preferred_element_type=jnp.float32)  # (TM, H)
    o_ref[...] = out.astype(o_ref.dtype)
    # NOTE: dense formulation computes every expert and masks with weight 0 (same math as
    # the PyTorch gather/index_add_ dispatch for finite activations).


# ------------------------------------ forward wrapper ------------------------------------
def moe_forward(x, p):
    B, S, H = x.shape
    T = B * S
    E, _, I = p["wg"].shape
    xf = x.reshape(T, H)                        # lane-dense token slab (T, H)

    # pack weights once: [gate_all | up_all] -> (H, 2*E*I) bf16, stacked down -> (E*I, H) bf16
    wgu = jnp.concatenate(
        [jnp.transpose(p["wg"], (1, 0, 2)).reshape(H, E * I),
         jnp.transpose(p["wu"], (1, 0, 2)).reshape(H, E * I)],
        axis=1).astype(jnp.bfloat16)
    wd = p["wd"].reshape(E * I, H).astype(jnp.bfloat16)
    wr = p["wr"]                                # router stays f32

    tm = T                                      # single grid step for this small config
    assert T % tm == 0 and H % 128 == 0 and I % 128 == 0

    # advisory cost estimate
    flops = 2 * T * H * E + 2 * T * H * (2 * E * I) + 2 * T * (E * I) * H
    transcendentals = T * E * I + T * TOP_K
    bytes_accessed = 4 * 2 * T * H + 4 * H * E + 2 * (2 * E * H * I) + 2 * (E * I * H)

    out = pl.pallas_call(
        _moe_kernel,
        out_shape=jax.ShapeDtypeStruct((T, H), jnp.float32),
        grid_spec=pltpu.PrefetchScalarGridSpec(
            num_scalar_prefetch=0,
            grid=(T // tm,),
            in_specs=[
                pl.BlockSpec((tm, H), lambda t: (t, 0)),          # tokens (f32)
                pl.BlockSpec((H, E), lambda t: (0, 0)),           # router weight (f32)
                pl.BlockSpec((H, 2 * E * I), lambda t: (0, 0)),   # [gate_all | up_all] bf16
                pl.BlockSpec((E * I, H), lambda t: (0, 0)),       # stacked down_proj bf16
            ],
            out_specs=pl.BlockSpec((tm, H), lambda t: (t, 0)),
        ),
        compiler_params=pltpu.CompilerParams(
            # "arbitrary": don't duplicate the (weight-DMA-bound) weight stream per core.
            dimension_semantics=("arbitrary",),
            vmem_limit_bytes=32 * 1024 * 1024),
        cost_estimate=pl.CostEstimate(flops=flops,
                                      transcendentals=transcendentals,
                                      bytes_accessed=bytes_accessed),
    )(xf, wr, wgu, wd)
    return out.reshape(B, S, H)


# ------------------------------------ pure-JAX reference ------------------------------------
def ref_forward(x, p):
    B, S, H = x.shape
    hi = jax.lax.Precision.HIGHEST
    xf = x.reshape(B * S, H)
    logits = jnp.dot(xf, p["wr"], precision=hi)
    vals, idxs = jax.lax.top_k(logits, TOP_K)
    w = jax.nn.softmax(vals, axis=-1)
    out = jnp.zeros_like(xf)
    for e in range(NUM_EXPERTS):
        w_e = jnp.sum(jnp.where(idxs == e, w, 0.0), axis=-1)      # 0 if not routed to e
        g = jnp.dot(xf, p["wg"][e], precision=hi)
        u = jnp.dot(xf, p["wu"][e], precision=hi)
        h = jax.nn.silu(g) * u
        y = jnp.dot(h, p["wd"][e], precision=hi)
        out = out + w_e[:, None] * y
    return out.reshape(B, S, H)


# -------------------------------------------- main --------------------------------------------
if __name__ == "__main__":
    key = jax.random.PRNGKey(0)
    ks = jax.random.split(key, 5)
    std = 0.05
    params = {
        "wr": jax.random.normal(ks[0], (HIDDEN, NUM_EXPERTS), jnp.float32) * std,
        "wg": jax.random.normal(ks[1], (NUM_EXPERTS, HIDDEN, INTERMEDIATE), jnp.float32) * std,
        "wu": jax.random.normal(ks[2], (NUM_EXPERTS, HIDDEN, INTERMEDIATE), jnp.float32) * std,
        "wd": jax.random.normal(ks[3], (NUM_EXPERTS, INTERMEDIATE, HIDDEN), jnp.float32) * std,
    }
    x = jax.random.normal(ks[4], (BATCH, SEQ, HIDDEN), jnp.float32)

    out = jax.block_until_ready(moe_forward(x, params))
    ref = ref_forward(x, params)
    # bf16 matmul operands inside the kernel -> a few-percent relative tolerance
    np.testing.assert_allclose(np.asarray(out), np.asarray(ref), rtol=5e-2, atol=8e-3)
    assert out.shape == (BATCH, SEQ, HIDDEN)
    print("KERNEL_OK")
</pallas_src>

<mosaic_0001>
module attributes {stable_mosaic.version = 11 : i64} {
  func.func @_moe_kernel(%arg0: i32, %arg1: memref<16x128xf32, #tpu.memory_space<vmem>>, %arg2: memref<128x8xf32, #tpu.memory_space<vmem>>, %arg3: memref<128x4096xbf16, #tpu.memory_space<vmem>>, %arg4: memref<2048x128xbf16, #tpu.memory_space<vmem>>, %arg5: memref<16x128xf32, #tpu.memory_space<vmem>>) attributes {dimension_semantics = [#tpu.dimension_semantics<arbitrary>], iteration_bounds = array<i64: 1>, scalar_prefetch = 0 : i64, scratch_operands = 0 : i64, tpu.core_type = #tpu.core_type<tc>, window_params = [{transform_indices = @transform_0, window_bounds = array<i64: 16, 128>}, {pipeline_mode = #tpu.pipeline_mode<synchronous>, transform_indices = @transform_1, window_bounds = array<i64: 128, 8>}, {pipeline_mode = #tpu.pipeline_mode<synchronous>, transform_indices = @transform_2, window_bounds = array<i64: 128, 4096>}, {pipeline_mode = #tpu.pipeline_mode<synchronous>, transform_indices = @transform_3, window_bounds = array<i64: 2048, 128>}, {transform_indices = @transform_4, window_bounds = array<i64: 16, 128>}]} {
    %c0 = arith.constant 0 : index
    %c0_0 = arith.constant 0 : index
    %0 = vector.load %arg1[%c0, %c0_0] : memref<16x128xf32, #tpu.memory_space<vmem>>, vector<16x128xf32>
    %1 = arith.truncf %0 : vector<16x128xf32> to vector<16x128xbf16>
    %c0_1 = arith.constant 0 : index
    %c0_2 = arith.constant 0 : index
    %2 = vector.load %arg2[%c0_1, %c0_2] : memref<128x8xf32, #tpu.memory_space<vmem>>, vector<128x8xf32>
    %cst = arith.constant dense<0.000000e+00> : vector<16x8xf32>
    %3 = tpu.matmul %0, %2, %cst {dimension_numbers = #tpu.dot_dimension_numbers<[1], [0], [0], [1], [0, 0, 1, 1], [], []>} : vector<16x128xf32>, vector<128x8xf32>, vector<16x8xf32> -> vector<16x8xf32>
    %4 = tpu.iota {dimensions = array<i32: 1>} : vector<16x8xi32>
    %cst_3 = arith.constant dense<0xFF800000> : vector<16xf32>
    %5 = vector.multi_reduction <maximumf>, %3, %cst_3 [1] : vector<16x8xf32> to vector<16xf32>
    %6 = vector.shape_cast %5 : vector<16xf32> to vector<16x1xf32>
    %7 = vector.broadcast %6 : vector<16x1xf32> to vector<16x8xf32>
    %8 = arith.cmpf oeq, %3, %7 : vector<16x8xf32>
    %c8_i32 = arith.constant 8 : i32
    %9 = vector.broadcast %c8_i32 : i32 to vector<16x8xi32>
    %10 = arith.select %8, %4, %9 : vector<16x8xi1>, vector<16x8xi32>
    %cst_4 = arith.constant dense<2147483647> : vector<16xi32>
    %11 = vector.multi_reduction <minsi>, %10, %cst_4 [1] : vector<16x8xi32> to vector<16xi32>
    %12 = vector.shape_cast %11 : vector<16xi32> to vector<16x1xi32>
    %13 = vector.broadcast %12 : vector<16x1xi32> to vector<16x8xi32>
    %14 = arith.cmpi eq, %4, %13 : vector<16x8xi32>
    %cst_5 = arith.constant 0xFF800000 : f32
    %15 = vector.broadcast %cst_5 : f32 to vector<16x8xf32>
    %16 = arith.select %14, %15, %3 : vector<16x8xi1>, vector<16x8xf32>
    %cst_6 = arith.constant dense<0xFF800000> : vector<16xf32>
    %17 = vector.multi_reduction <maximumf>, %16, %cst_6 [1] : vector<16x8xf32> to vector<16xf32>
    %18 = vector.shape_cast %17 : vector<16xf32> to vector<16x1xf32>
    %19 = vector.broadcast %18 : vector<16x1xf32> to vector<16x8xf32>
    %20 = arith.cmpf oeq, %16, %19 : vector<16x8xf32>
    %c8_i32_7 = arith.constant 8 : i32
    %21 = vector.broadcast %c8_i32_7 : i32 to vector<16x8xi32>
    %22 = arith.select %20, %4, %21 : vector<16x8xi1>, vector<16x8xi32>
    %cst_8 = arith.constant dense<2147483647> : vector<16xi32>
    %23 = vector.multi_reduction <minsi>, %22, %cst_8 [1] : vector<16x8xi32> to vector<16xi32>
    %24 = vector.shape_cast %23 : vector<16xi32> to vector<16x1xi32>
    %25 = vector.broadcast %24 : vector<16x1xi32> to vector<16x8xi32>
    %26 = arith.cmpi eq, %4, %25 : vector<16x8xi32>
    %27 = arith.subf %6, %6 : vector<16x1xf32>
    %28 = math.exp %27 : vector<16x1xf32>
    %29 = arith.subf %18, %6 : vector<16x1xf32>
    %30 = math.exp %29 : vector<16x1xf32>
    %31 = arith.addf %28, %30 : vector<16x1xf32>
    %32 = tpu.reciprocal %31 {approx = true} : vector<16x1xf32> -> vector<16x1xf32>
    %33 = arith.mulf %28, %32 : vector<16x1xf32>
    %cst_9 = arith.constant 0.000000e+00 : f32
    %34 = vector.shape_cast %33 : vector<16x1xf32> to vector<16x1xf32>
    %35 = vector.broadcast %34 : vector<16x1xf32> to vector<16x8xf32>
    %36 = vector.broadcast %cst_9 : f32 to vector<16x8xf32>
    %37 = arith.select %14, %35, %36 : vector<16x8xi1>, vector<16x8xf32>
    %38 = arith.mulf %30, %32 : vector<16x1xf32>
    %cst_10 = arith.constant 0.000000e+00 : f32
    %39 = vector.shape_cast %38 : vector<16x1xf32> to vector<16x1xf32>
    %40 = vector.broadcast %39 : vector<16x1xf32> to vector<16x8xf32>
    %41 = vector.broadcast %cst_10 : f32 to vector<16x8xf32>
    %42 = arith.select %26, %40, %41 : vector<16x8xi1>, vector<16x8xf32>
    %43 = arith.addf %37, %42 : vector<16x8xf32>
    %c0_11 = arith.constant 0 : index
    %c0_12 = arith.constant 0 : index
    %44 = vector.load %arg3[%c0_11, %c0_12] : memref<128x4096xbf16, #tpu.memory_space<vmem>>, vector<128x4096xbf16>
    %cst_13 = arith.constant dense<0.000000e+00> : vector<16x4096xf32>
    %45 = tpu.matmul %1, %44, %cst_13 {dimension_numbers = #tpu.dot_dimension_numbers<[1], [0], [0], [1], [0, 0, 1, 1], [], []>} : vector<16x128xbf16>, vector<128x4096xbf16>, vector<16x4096xf32> -> vector<16x4096xf32>
    %46 = vector.extract_strided_slice %45 {offsets = [0, 0], sizes = [16, 2048], strides = [1, 1]} : vector<16x4096xf32> to vector<16x2048xf32>
    %47 = vector.extract_strided_slice %45 {offsets = [0, 2048], sizes = [16, 2048], strides = [1, 1]} : vector<16x4096xf32> to vector<16x2048xf32>
    %cst_14 = arith.constant 0.000000e+00 : f32
    %48 = vector.broadcast %cst_14 : f32 to vector<16x2048xf32>
    %49 = arith.subf %48, %46 : vector<16x2048xf32>
    %50 = math.exp %49 : vector<16x2048xf32>
    %cst_15 = arith.constant 1.000000e+00 : f32
    %51 = vector.broadcast %cst_15 : f32 to vector<16x2048xf32>
    %52 = arith.addf %51, %50 : vector<16x2048xf32>
    %53 = tpu.reciprocal %52 {approx = true} : vector<16x2048xf32> -> vector<16x2048xf32>
    %54 = arith.mulf %46, %53 : vector<16x2048xf32>
    %55 = arith.mulf %54, %47 : vector<16x2048xf32>
    %56 = vector.extract_strided_slice %43 {offsets = [0, 0], sizes = [16, 1], strides = [1, 1]} : vector<16x8xf32> to vector<16x1xf32>
    %57 = vector.shape_cast %56 : vector<16x1xf32> to vector<16x1xf32>
    %58 = vector.broadcast %57 : vector<16x1xf32> to vector<16x256xf32>
    %59 = vector.extract_strided_slice %43 {offsets = [0, 1], sizes = [16, 1], strides = [1, 1]} : vector<16x8xf32> to vector<16x1xf32>
    %60 = vector.shape_cast %59 : vector<16x1xf32> to vector<16x1xf32>
    %61 = vector.broadcast %60 : vector<16x1xf32> to vector<16x256xf32>
    %62 = vector.extract_strided_slice %43 {offsets = [0, 2], sizes = [16, 1], strides = [1, 1]} : vector<16x8xf32> to vector<16x1xf32>
    %63 = vector.shape_cast %62 : vector<16x1xf32> to vector<16x1xf32>
    %64 = vector.broadcast %63 : vector<16x1xf32> to vector<16x256xf32>
    %65 = vector.extract_strided_slice %43 {offsets = [0, 3], sizes = [16, 1], strides = [1, 1]} : vector<16x8xf32> to vector<16x1xf32>
    %66 = vector.shape_cast %65 : vector<16x1xf32> to vector<16x1xf32>
    %67 = vector.broadcast %66 : vector<16x1xf32> to vector<16x256xf32>
    %68 = vector.extract_strided_slice %43 {offsets = [0, 4], sizes = [16, 1], strides = [1, 1]} : vector<16x8xf32> to vector<16x1xf32>
    %69 = vector.shape_cast %68 : vector<16x1xf32> to vector<16x1xf32>
    %70 = vector.broadcast %69 : vector<16x1xf32> to vector<16x256xf32>
    %71 = vector.extract_strided_slice %43 {offsets = [0, 5], sizes = [16, 1], strides = [1, 1]} : vector<16x8xf32> to vector<16x1xf32>
    %72 = vector.shape_cast %71 : vector<16x1xf32> to vector<16x1xf32>
    %73 = vector.broadcast %72 : vector<16x1xf32> to vector<16x256xf32>
    %74 = vector.extract_strided_slice %43 {offsets = [0, 6], sizes = [16, 1], strides = [1, 1]} : vector<16x8xf32> to vector<16x1xf32>
    %75 = vector.shape_cast %74 : vector<16x1xf32> to vector<16x1xf32>
    %76 = vector.broadcast %75 : vector<16x1xf32> to vector<16x256xf32>
    %77 = vector.extract_strided_slice %43 {offsets = [0, 7], sizes = [16, 1], strides = [1, 1]} : vector<16x8xf32> to vector<16x1xf32>
    %78 = vector.shape_cast %77 : vector<16x1xf32> to vector<16x1xf32>
    %79 = vector.broadcast %78 : vector<16x1xf32> to vector<16x256xf32>
    %80 = tpu.concatenate %58, %61, %64, %67, %70, %73, %76, %79 in 1 : vector<16x256xf32>, vector<16x256xf32>, vector<16x256xf32>, vector<16x256xf32>, vector<16x256xf32>, vector<16x256xf32>, vector<16x256xf32>, vector<16x256xf32> -> vector<16x2048xf32>
    %81 = arith.mulf %55, %80 : vector<16x2048xf32>
    %82 = arith.truncf %81 : vector<16x2048xf32> to vector<16x2048xbf16>
    %c0_16 = arith.constant 0 : index
    %c0_17 = arith.constant 0 : index
    %83 = vector.load %arg4[%c0_16, %c0_17] : memref<2048x128xbf16, #tpu.memory_space<vmem>>, vector<2048x128xbf16>
    %cst_18 = arith.constant dense<0.000000e+00> : vector<16x128xf32>
    %84 = tpu.matmul %82, %83, %cst_18 {dimension_numbers = #tpu.dot_dimension_numbers<[1], [0], [0], [1], [0, 0, 1, 1], [], []>} : vector<16x2048xbf16>, vector<2048x128xbf16>, vector<16x128xf32> -> vector<16x128xf32>
    %c0_19 = arith.constant 0 : index
    %c0_20 = arith.constant 0 : index
    %85 = vector.load %arg5[%c0_19, %c0_20] : memref<16x128xf32, #tpu.memory_space<vmem>>, vector<16x128xf32>
    tpu.vector_store %arg5[%c0_19, %c0_20], %84 {strides = array<i32>} : memref<16x128xf32, #tpu.memory_space<vmem>>, vector<16x128xf32>,
    return
  }
  func.func @transform_0(%arg0: i32) -> (i32, i32) {
    %c0_i32 = arith.constant 0 : i32
    %c0_i32_0 = arith.constant 0 : i32
    return %arg0, %c0_i32 : i32, i32
  }
  func.func @transform_1(%arg0: i32) -> (i32, i32) {
    %c0_i32 = arith.constant 0 : i32
    %c0_i32_0 = arith.constant 0 : i32
    %c0_i32_1 = arith.constant 0 : i32
    return %c0_i32, %c0_i32_0 : i32, i32
  }
  func.func @transform_2(%arg0: i32) -> (i32, i32) {
    %c0_i32 = arith.constant 0 : i32
    %c0_i32_0 = arith.constant 0 : i32
    %c0_i32_1 = arith.constant 0 : i32
    return %c0_i32, %c0_i32_0 : i32, i32
  }
  func.func @transform_3(%arg0: i32) -> (i32, i32) {
    %c0_i32 = arith.constant 0 : i32
    %c0_i32_0 = arith.constant 0 : i32
    %c0_i32_1 = arith.constant 0 : i32
    return %c0_i32, %c0_i32_0 : i32, i32
  }
  func.func @transform_4(%arg0: i32) -> (i32, i32) {
    %c0_i32 = arith.constant 0 : i32
    %c0_i32_0 = arith.constant 0 : i32
    return %arg0, %c0_i32 : i32, i32
  }
}

</mosaic_0001>

<bundles_post_ra>
// kernel: tpu_custom_call.1
= control target key start
LH: loop header
LB: loop body
LE: loop exit
PB: predicated region body
PF: predicated region fallthrough
CT: control target
= control target key end

     0   :  { %9 = vsyncpa [#allocation3], 0  ;;  %s6523_s0 = inlined_call_operand.vmem [shape: f32[16,128], index: 0, kind: input, shape index: {}]   ;;  %s6524_s1 = inlined_call_operand.vmem [shape: f32[128,8], index: 1, kind: input, shape index: {}]   ;;  %s6525_s2 = inlined_call_operand.hbm [shape: bf16[128,4096], index: 2, kind: input, shape index: {}]   ;;  %s6526_s3 = inlined_call_operand.hbm [shape: bf16[2048,128], index: 3, kind: input, shape index: {}]   ;;  %s6527_s4 = inlined_call_operand.hbm [shape: f32[16,128], index: 4, kind: output, shape index: {}]  }
   0x1   :  { %10 = vsyncpa [#allocation6], 0 }
   0x2   :  { %11 = vsyncpa [#allocation4], 0  ;;  %s20_s17 = sshll.u32 %s6525_s2, 4  ;;  %s5969_s18 = smov [#allocation2]   ;;  %s21_s17 = int_to_ptr.hbm [resolvable:$true] %s20_s17 }
   0x3   :  { %s22_s19 = sshll.u32 %s5969_s18, 4  ;;  %s33_s22 = sshll.u32 %s6526_s3, 4  ;;  %s23_s19 = int_to_ptr.vmem [resolvable:$true] %s22_s19  ;;  %s34_s22 = int_to_ptr.hbm [resolvable:$true] %s33_s22 }
   0x4   :  { %s5970_s23 = smov 2048   ;;  %s5971_s24 = smov 128  }
   0x5   :  { %28 = dma.hbm_to_vmem [thread:$0]  %s21_s17, 32768, %s23_s19, [#allocation3], %s5970_s23, %s5970_s23, %s5971_s24  }
   0x6   :  { %s5972_s25 = smov [#allocation5]   ;;  %s5973_s27 = smov 64  }
   0x7   :  { %s35_s26 = sshll.u32 %s5972_s25, 4  ;;  %s5974_s28 = smov 4   ;;  %s36_s26 = int_to_ptr.vmem [resolvable:$true] %s35_s26 }
   0x8   :  { %41 = dma.hbm_to_vmem [thread:$0]  %s34_s22, 16384, %s36_s26, [#allocation6], %s5973_s27, %s5973_s27, %s5974_s28  }
   0x9   :  { %5963 = dma.done.wait [#allocation3], 32768  }
   0xa   :  { %5964 = vsyncadd [#allocation3], 4294934528 }
   0xb   :  { %5965 = dma.done.wait [#allocation6], 16384  }
   0xc   :  { %5966 = vsyncadd [#allocation6], 4294950912  ;;  %v68_v0 = vld [vmem:[%s6524_s1 + $0x78] sm:$0xff]  ;;  %v67_v1 = vld [vmem:[%s6524_s1 + $0x70] sm:$0xff]  ;;  %vm94_vm0 = vcmask 64512   ;;  %v92_v23 = vlaneseq  ;;  %s3785_s10 = sshll.u32 %s6527_s4, 4  ;;  %s3786_s10 = int_to_ptr.hbm [resolvable:$true] %s3785_s10 }
   0xd   :  { %69 = vmatpush.msra.mxu0 %v68_v0  ;;  %v66_v2 = vld [vmem:[%s6524_s1 + $0x68] sm:$0xff]  ;;  %v65_v3 = vld [vmem:[%s6524_s1 + $0x60] sm:$0xff]  ;;  %v64_v6 = vld [vmem:[%s6524_s1 + $0x58] sm:$0xff]  ;;  %s5983_s11 = smov [#allocation7]   ;;  %s5984_s13 = smov 8  }
   0xe   :  { %v50_v4 = vld [vmem:[%s6523_s0] sm:$0xff]  ;;  %v51_v5 = vld [vmem:[%s6523_s0 + $0x8] sm:$0xff]  ;;  %v63_v8 = vld [vmem:[%s6524_s1 + $0x50] sm:$0xff]  ;;  %v6081_v24 = vand.u32 127, %v92_v23  ;;  %s3783_s12 = sshll.u32 %s5983_s11, 4  ;;  %s3784_s12 = int_to_ptr.vmem [resolvable:$true] %s3783_s12 }
   0xf   :  { %70 = vmatpush.msra.mxu0 %v67_v1  ;;  %v6038_v7 = vpack.c.bf16 %v51_v5, %v50_v4  ;;  %v62_v9 = vld [vmem:[%s6524_s1 + $0x48] sm:$0xff]  ;;  %v61_v10 = vld [vmem:[%s6524_s1 + $0x40] sm:$0xff]  ;;  %v60_v11 = vld [vmem:[%s6524_s1 + $0x38] sm:$0xff] }
  0x10   :  { %v59_v12 = vld [vmem:[%s6524_s1 + $0x30] sm:$0xff]  ;;  %v58_v13 = vld [vmem:[%s6524_s1 + $0x28] sm:$0xff]  ;;  %v57_v14 = vld [vmem:[%s6524_s1 + $0x20] sm:$0xff] }
  0x11   :  { %71 = vmatpush.msra.mxu0 %v66_v2  ;;  %v56_v15 = vld [vmem:[%s6524_s1 + $0x18] sm:$0xff]  ;;  %v55_v16 = vld [vmem:[%s6524_s1 + $0x10] sm:$0xff]  ;;  %v54_v17 = vld [vmem:[%s6524_s1 + $0x8] sm:$0xff] }
  0x12   :  { %v53_v18 = vld [vmem:[%s6524_s1] sm:$0xff]  ;;  %v4705_v45 = vld [vmem:[#allocation2 + $0x708] sm:$0xf] }
  0x13   :  { %72 = vmatpush.msra.mxu0 %v65_v3  ;;  %v5559_v43 = vld [vmem:[#allocation2 + $0x704] sm:$0xf]  ;;  %v5576_v47 = vld [vmem:[#allocation2 + $0x784] sm:$0xf0]  ;;  %v4697_v54 = vld [vmem:[#allocation2 + $0x700] sm:$0xf] }
  0x14   :  { %v4699_v44 = vld [vmem:[#allocation2 + $0x780] sm:$0xf0]  ;;  %v4706_v50 = vor.u32 %v5576_v47, %v4705_v45  ;;  %v4577_v51 = vld [vmem:[#allocation2 + $0x608] sm:$0xf]  ;;  %v5575_v55 = vld [vmem:[#allocation2 + $0x77c] sm:$0xf0] }
  0x15   :  { %73 = vmatpush.msra.mxu0 %v64_v6  ;;  %v4702_v46 = vor.u32 %v5559_v43, %v4699_v44  ;;  %v5527_v48 = vld [vmem:[#allocation2 + $0x604] sm:$0xf]  ;;  %v5544_v52 = vld [vmem:[#allocation2 + $0x684] sm:$0xf0]  ;;  %v4698_v59 = vor.u32 %v5575_v55, %v4697_v54  ;;  %v4569_v62 = vld [vmem:[#allocation2 + $0x600] sm:$0xf] }
  0x16   :  { %v4571_v49 = vld [vmem:[#allocation2 + $0x680] sm:$0xf0]  ;;  %1771 = vmatpush.bf16.msra.mxu3 %v4706_v50  ;;  %v4578_v56 = vor.u32 %v5544_v52, %v4577_v51  ;;  %v4449_v60 = vld [vmem:[#allocation2 + $0x508] sm:$0xf]  ;;  %v5543_v63 = vld [vmem:[#allocation2 + $0x67c] sm:$0xf0] }
  0x17   :  { %74 = vmatpush.msra.mxu0 %v63_v8  ;;  %1757 = vmatpush.bf16.msra.mxu2 %v4702_v46  ;;  %v4574_v53 = vor.u32 %v5527_v48, %v4571_v49  ;;  %v5495_v57 = vld [vmem:[#allocation2 + $0x504] sm:$0xf]  ;;  %v5512_v61 = vld [vmem:[#allocation2 + $0x584] sm:$0xf0]  ;;  %v4570_v0 = vor.u32 %v5543_v63, %v4569_v62  ;;  %v5560_v3 = vld [vmem:[#allocation2 + $0x70c] sm:$0xf] }
  0x18   :  { %v4443_v58 = vld [vmem:[#allocation2 + $0x580] sm:$0xf0]  ;;  %1743 = vmatpush.bf16.msra.mxu1 %v4698_v59  ;;  %v4065_v47 = vld [vmem:[#allocation2 + $0x208] sm:$0xf]  ;;  %v4057_v51 = vld [vmem:[#allocation2 + $0x200] sm:$0xf] }
  0x19   :  { %75 = vmatpush.msra.mxu0 %v62_v9  ;;  %v4446_v1 = vor.u32 %v5495_v57, %v4443_v58  ;;  %v5463_v2 = vld [vmem:[#allocation2 + $0x404] sm:$0xf]  ;;  %v4441_v9 = vld [vmem:[#allocation2 + $0x500] sm:$0xf]  ;;  %v5416_v48 = vld [vmem:[#allocation2 + $0x284] sm:$0xf0] }
  0x1a   :  { %1772 = vmatpush.bf16.msra.mxu3 %v4578_v56  ;;  %v4315_v6 = vld [vmem:[#allocation2 + $0x480] sm:$0xf0]  ;;  %v5415_v54 = vld [vmem:[#allocation2 + $0x27c] sm:$0xf0]  ;;  %v5432_v55 = vld [vmem:[#allocation2 + $0x30c] sm:$0xf]  ;;  %v4066_v57 = vor.u32 %v5416_v48, %v4065_v47 }
  0x1b   :  { %76 = vmatpush.msra.mxu0 %v61_v10  ;;  %1758 = vmatpush.bf16.msra.mxu2 %v4574_v53  ;;  %v5511_v10 = vld [vmem:[#allocation2 + $0x57c] sm:$0xf0]  ;;  %v5431_v23 = vld [vmem:[#allocation2 + $0x304] sm:$0xf]  ;;  %v4195_v56 = vld [vmem:[#allocation2 + $0x388] sm:$0xf0] }
  0x1c   :  { %1744 = vmatpush.bf16.msra.mxu1 %v4570_v0  ;;  %v5399_v44 = vld [vmem:[#allocation2 + $0x204] sm:$0xf]  ;;  %v5384_v62 = vld [vmem:[#allocation2 + $0x184] sm:$0xf0]  ;;  %v4058_v0 = vor.u32 %v5415_v54, %v4057_v51  ;;  %v4465_v47 = vld [vmem:[#allocation2 + $0x518] sm:$0xf] }
  0x1d   :  { %77 = vmatpush.msra.mxu0 %v60_v11  ;;  %v4321_v11 = vld [vmem:[#allocation2 + $0x408] sm:$0xf]  ;;  %v4059_v45 = vld [vmem:[#allocation2 + $0x280] sm:$0xf0]  ;;  %v3939_v51 = vld [vmem:[#allocation2 + $0x188] sm:$0xf0] }
  0x1e   :  { %v4062_v53 = vor.u32 %v5399_v44, %v4059_v45  ;;  %v5367_v58 = vld [vmem:[#allocation2 + $0x104] sm:$0xf]  ;;  %v4459_v44 = vld [vmem:[#allocation2 + $0x590] sm:$0xf0] }
  0x1f   :  { %78 = vmatpush.msra.mxu0 %v59_v12  ;;  %v5480_v12 = vld [vmem:[#allocation2 + $0x484] sm:$0xf0]  ;;  %1759 = vmatpush.bf16.msra.mxu2 %v4446_v1  ;;  %v3931_v59 = vld [vmem:[#allocation2 + $0x180] sm:$0xf0]  ;;  %v4198_v1 = vor.u32 %v5432_v55, %v4195_v56  ;;  %v5465_v55 = vld [vmem:[#allocation2 + $0x414] sm:$0xf] }
  0x20   :  { %v4331_v56 = vld [vmem:[#allocation2 + $0x490] sm:$0xf0] }
  0x21   :  { %79 = vmatpush.msra.mxu0 %v58_v13  ;;  %v4442_v13 = vor.u32 %v5511_v10, %v4441_v9  ;;  %v5335_v10 = vld [vmem:[#allocation2 + $0x4] sm:$0xf] }
  0x23   :  { %80 = vmatpush.msra.mxu0 %v57_v14  ;;  %v5528_v14 = vld [vmem:[#allocation2 + $0x60c] sm:$0xf]  ;;  %1745 = vmatpush.bf16.msra.mxu1 %v4442_v13  ;;  %v5561_v13 = vld [vmem:[#allocation2 + $0x714] sm:$0xf] }
  0x25   :  { %81 = vmatpush.msra.mxu0 %v56_v15  ;;  %v4579_v15 = vld [vmem:[#allocation2 + $0x688] sm:$0xf0] }
  0x27   :  { %82 = vmatpush.msra.mxu0 %v55_v16  ;;  %v4318_v16 = vor.u32 %v5463_v2, %v4315_v6  ;;  %v3929_v2 = vld [vmem:[#allocation2 + $0x100] sm:$0xf]  ;;  %v4067_v6 = vld [vmem:[#allocation2 + $0x288] sm:$0xf0] }
  0x29   :  { %83 = vmatpush.msra.mxu0 %v54_v17  ;;  %v4582_v17 = vor.u32 %v5528_v14, %v4579_v15  ;;  %1760 = vmatpush.bf16.msra.mxu2 %v4318_v16  ;;  %v4715_v14 = vld [vmem:[#allocation2 + $0x790] sm:$0xf0]  ;;  %v3809_v15 = vld [vmem:[#allocation2 + $0x8] sm:$0xf] }
  0x2a   :  { %v5352_v16 = vld [vmem:[#allocation2 + $0x84] sm:$0xf0] }
  0x2b   :  { %84 = vmatpush.msra.mxu0 %v53_v18  ;;  %v4313_v18 = vld [vmem:[#allocation2 + $0x400] sm:$0xf] }
  0x2c   :  { %85 = vmatmul.f32.vlgmr.msra.gmra.mxu0 %v50_v4  ;;  %v4707_v4 = vld [vmem:[#allocation2 + $0x788] sm:$0xf0] }
  0x2d   :  { %v4710_v8 = vor.u32 %v5560_v3, %v4707_v4  ;;  %v5383_v3 = vld [vmem:[#allocation2 + $0x17c] sm:$0xf0]  ;;  %v3934_v4 = vor.u32 %v5367_v58, %v3931_v59  ;;  %v4585_v58 = vld [vmem:[#allocation2 + $0x610] sm:$0xf] }
  0x2e   :  { %v5545_v59 = vld [vmem:[#allocation2 + $0x68c] sm:$0xf0] }
  0x2f   :  { %1785 = vmatpush.bf16.msrb.mxu0 %v4710_v8 }
  0x33   :  { %1786 = vmatpush.bf16.msrb.mxu0 %v4582_v17  ;;  %v4721_v17 = vld [vmem:[#allocation2 + $0x718] sm:$0xf] }
  0x34   :  { %88 = vmatmul.f32.gmra.mxu0 %v51_v5  ;;  %v4450_v5 = vor.u32 %v5512_v61, %v4449_v60  ;;  %v3937_v61 = vld [vmem:[#allocation2 + $0x108] sm:$0xf] }
  0x35   :  { %v3938_v9 = vor.u32 %v5384_v62, %v3937_v61  ;;  %v4586_v61 = vor.u32 %v5545_v59, %v4585_v58  ;;  %v5482_v62 = vld [vmem:[#allocation2 + $0x494] sm:$0xf0] }
  0x36   :  { %1773 = vmatpush.bf16.msra.mxu3 %v4450_v5  ;;  %v5400_v5 = vld [vmem:[#allocation2 + $0x20c] sm:$0xf]  ;;  %v3825_v58 = vld [vmem:[#allocation2 + $0x18] sm:$0xf] }
  0xa9   :  { %v6073_v19 = vpop.f32.mrf.mxu0 }
  0xaa   :  { %v95_v20 = vsel %vm94_vm0, %v6073_v19, -inf }
  0xab   :  { %96 = vmax.xlane.f32.xlu0 %v95_v20  ;;  %v5479_v20 = vld [vmem:[#allocation2 + $0x47c] sm:$0xf0] }
  0xb1   :  { %v6077_v21 = vpop.f32.mrf.mxu0 }
  0xb2   :  { %v98_v22 = vsel %vm94_vm0, %v6077_v21, -inf }
  0xb3   :  { %99 = vmax.xlane.f32.xlu0 %v98_v22  ;;  %v4322_v22 = vor.u32 %v5480_v12, %v4321_v11 }
  0xb5   :  { %1774 = vmatpush.bf16.msra.mxu3 %v4322_v22 }
 0x11e   :  { %v6083_v25 = vpop.xlane.xlu0 %96 }
 0x11f   :  { %vm101_vm1 = vcmp.eq.f32.partialorder %v6073_v19, %v6083_v25 }
 0x120   :  { %v103_v26 = vsel %vm101_vm1, %v6081_v24, 8 }
 0x121   :  { %v105_v27 = vsel %vm94_vm0, %v103_v26, 2147483647  ;;  %v4187_v26 = vld [vmem:[#allocation2 + $0x380] sm:$0xf0] }
 0x122   :  { %v107_v28 = vshra.s32 %v105_v27, 16  ;;  %v106_v35 = vand.u32 65535, %v105_v27  ;;  %v5496_v27 = vld [vmem:[#allocation2 + $0x50c] sm:$0xf] }
 0x124   :  { %v109_v29 = vcvt.s32.f32 %v107_v28  ;;  %v108_v37 = vcvt.s32.f32 %v106_v35  ;;  %v4185_v35 = vld [vmem:[#allocation2 + $0x300] sm:$0xf] }
 0x126   :  { %110 = vmin.xlane.f32.xlu1 %v109_v29  ;;  %v6089_v30 = vpop.xlane.xlu0 %99 }
 0x127   :  { %vm102_vm2 = vcmp.eq.f32.partialorder %v6077_v21, %v6089_v30 }
 0x128   :  { %v104_v31 = vsel %vm102_vm2, %v6081_v24, 8 }
 0x129   :  { %v120_v32 = vsel %vm94_vm0, %v104_v31, 2147483647  ;;  %v5448_v31 = vld [vmem:[#allocation2 + $0x384] sm:$0xf0] }
 0x12a   :  { %v122_v33 = vshra.s32 %v120_v32, 16  ;;  %v121_v39 = vand.u32 65535, %v120_v32  ;;  %v4451_v32 = vld [vmem:[#allocation2 + $0x588] sm:$0xf0] }
 0x12c   :  { %v124_v34 = vcvt.s32.f32 %v122_v33  ;;  %v123_v41 = vcvt.s32.f32 %v121_v39  ;;  %v4314_v33 = vor.u32 %v5479_v20, %v4313_v18  ;;  %v5464_v39 = vld [vmem:[#allocation2 + $0x40c] sm:$0xf]  ;;  %v3930_v18 = vor.u32 %v5383_v3, %v3929_v2 }
 0x12d   :  { %v4070_v20 = vor.u32 %v5400_v5, %v4067_v6  ;;  %v5562_v5 = vld [vmem:[#allocation2 + $0x71c] sm:$0xf] }
 0x12e   :  { %125 = vmin.xlane.f32.xlu1 %v124_v34  ;;  %1746 = vmatpush.bf16.msra.mxu1 %v4314_v33  ;;  %v4587_v33 = vld [vmem:[#allocation2 + $0x690] sm:$0xf0] }
 0x199   :  { %v6095_v36 = vpop.xlane.xlu1 %110 }
 0x19a   :  { %vm112_vm3 = vcmp.eq.f32.partialorder %v109_v29, %v6095_v36  ;;  %v117_v28 = vcvt.f32.s32 %v6095_v36  ;;  %v4193_v29 = vld [vmem:[#allocation2 + $0x308] sm:$0xf] }
 0x19b   :  { %v113_v38 = vsel %vm112_vm3, %v108_v37, inf  ;;  %v4190_v37 = vor.u32 %v5431_v23, %v4187_v26  ;;  %v4194_v43 = vor.u32 %v5448_v31, %v4193_v29  ;;  %v5578_v26 = vld [vmem:[#allocation2 + $0x794] sm:$0xf0]  ;;  %v4718_v29 = vor.u32 %v5561_v13, %v4715_v14 }
 0x19c   :  { %114 = vmin.xlane.f32.xlu2 %v113_v38  ;;  %v5447_v38 = vld [vmem:[#allocation2 + $0x37c] sm:$0xf0]  ;;  %v118_v46 = vshll.u32 %v117_v28, 16  ;;  %v3810_v31 = vor.u32 %v5352_v16, %v3809_v15  ;;  %v5450_v13 = vld [vmem:[#allocation2 + $0x394] sm:$0xf0] }
 0x19d   :  { %v4186_v49 = vor.u32 %v5447_v38, %v4185_v35  ;;  %1761 = vmatpush.bf16.msra.mxu2 %v4190_v37  ;;  %1775 = vmatpush.bf16.msra.mxu3 %v4194_v43  ;;  %v5351_v28 = vld [vmem:[#allocation2 + $0x7c] sm:$0xf0]  ;;  %v4722_v35 = vor.u32 %v5578_v26, %v4721_v17  ;;  %v5497_v43 = vld [vmem:[#allocation2 + $0x514] sm:$0xf]  ;;  %v5530_v17 = vld [vmem:[#allocation2 + $0x61c] sm:$0xf] }
 0x19e   :  { %v5401_v15 = vld [vmem:[#allocation2 + $0x214] sm:$0xf]  ;;  %v4329_v26 = vld [vmem:[#allocation2 + $0x410] sm:$0xf] }
 0x19f   :  { %1747 = vmatpush.bf16.msra.mxu1 %v4186_v49  ;;  %v5514_v49 = vld [vmem:[#allocation2 + $0x594] sm:$0xf0]  ;;  %v4075_v16 = vld [vmem:[#allocation2 + $0x290] sm:$0xf0] }
 0x1a1   :  { %v6098_v40 = vpop.xlane.xlu1 %125  ;;  %1762 = vmatpush.bf16.msra.mxu2 %v4062_v53  ;;  %1776 = vmatpush.bf16.msra.mxu3 %v4066_v57  ;;  %v4466_v53 = vor.u32 %v5514_v49, %v4465_v47  ;;  %v4334_v57 = vor.u32 %v5465_v55, %v4331_v56  ;;  %v3819_v47 = vld [vmem:[#allocation2 + $0x90] sm:$0xf0]  ;;  %v4073_v56 = vld [vmem:[#allocation2 + $0x210] sm:$0xf] }
 0x1a2   :  { %vm127_vm4 = vcmp.eq.f32.partialorder %v124_v34, %v6098_v40  ;;  %v4454_v34 = vor.u32 %v5496_v27, %v4451_v32  ;;  %v132_v60 = vcvt.f32.s32 %v6098_v40  ;;  %v3801_v27 = vld [vmem:[#allocation2] sm:$0xf]  ;;  %v5529_v32 = vld [vmem:[#allocation2 + $0x614] sm:$0xf] }
 0x1a3   :  { %v128_v42 = vsel %vm127_vm4, %v123_v41, inf  ;;  %v4323_v41 = vld [vmem:[#allocation2 + $0x488] sm:$0xf0]  ;;  %1748 = vmatpush.bf16.msra.mxu1 %v4058_v0  ;;  %v3802_v37 = vor.u32 %v5351_v28, %v3801_v27  ;;  %v5481_v27 = vld [vmem:[#allocation2 + $0x48c] sm:$0xf0] }
 0x1a4   :  { %129 = vmin.xlane.f32.xlu2 %v128_v42  ;;  %1787 = vmatpush.bf16.msrb.mxu0 %v4454_v34  ;;  %v4326_v50 = vor.u32 %v5464_v39, %v4323_v41  ;;  %v133_v11 = vshll.u32 %v132_v60, 16  ;;  %v4593_v39 = vld [vmem:[#allocation2 + $0x618] sm:$0xf]  ;;  %v5336_v0 = vld [vmem:[#allocation2 + $0xc] sm:$0xf] }
 0x1a5   :  { %1763 = vmatpush.bf16.msra.mxu2 %v3934_v4  ;;  %1777 = vmatpush.bf16.msra.mxu3 %v3938_v9  ;;  %v5546_v41 = vld [vmem:[#allocation2 + $0x694] sm:$0xf0]  ;;  %v4203_v4 = vld [vmem:[#allocation2 + $0x390] sm:$0xf0] }
 0x1a6   :  { %v4594_v45 = vor.u32 %v5546_v41, %v4593_v39  ;;  %v4337_v60 = vld [vmem:[#allocation2 + $0x418] sm:$0xf]  ;;  %v4467_v39 = vld [vmem:[#allocation2 + $0x598] sm:$0xf0] }
 0x1a7   :  { %1749 = vmatpush.bf16.msra.mxu1 %v3930_v18  ;;  %v4338_v2 = vor.u32 %v5482_v62, %v4337_v60  ;;  %v4078_v18 = vor.u32 %v5401_v15, %v4075_v16  ;;  %v4081_v28 = vld [vmem:[#allocation2 + $0x218] sm:$0xf]  ;;  %v5580_v62 = vld [vmem:[#allocation2 + $0x7a4] sm:$0xf0]  ;;  %v5499_v16 = vld [vmem:[#allocation2 + $0x524] sm:$0xf] }
 0x1a8   :  { %1788 = vmatpush.bf16.msrb.mxu0 %v4326_v50  ;;  %v5368_v50 = vld [vmem:[#allocation2 + $0x10c] sm:$0xf]  ;;  %v5354_v60 = vld [vmem:[#allocation2 + $0x94] sm:$0xf0] }
 0x1a9   :  { %1778 = vmatpush.bf16.msra.mxu3 %v3810_v31  ;;  %v3942_v54 = vor.u32 %v5368_v50, %v3939_v51  ;;  %v5418_v31 = vld [vmem:[#allocation2 + $0x294] sm:$0xf0]  ;;  %v4339_v50 = vld [vmem:[#allocation2 + $0x498] sm:$0xf0]  ;;  %v5563_v51 = vld [vmem:[#allocation2 + $0x724] sm:$0xf] }
 0x1ab   :  { %1750 = vmatpush.bf16.msra.mxu1 %v3802_v37  ;;  %v5498_v37 = vld [vmem:[#allocation2 + $0x51c] sm:$0xf] }
 0x1ac   :  { %1789 = vmatpush.bf16.msrb.mxu0 %v4198_v1  ;;  %1779 = vmatmul.bf16.vlgmr.msra.gmra.mxu3 %v6038_v7  ;;  %v3811_v1 = vld [vmem:[#allocation2 + $0x88] sm:$0xf0]  ;;  %v4470_v41 = vor.u32 %v5498_v37, %v4467_v39  ;;  %v3955_v37 = vld [vmem:[#allocation2 + $0x198] sm:$0xf0]  ;;  %v4347_v39 = vld [vmem:[#allocation2 + $0x4a0] sm:$0xf0] }
 0x1ad   :  { %1827 = vmatpush.bf16.msrb.mxu3 %v4722_v35  ;;  %v3814_v3 = vor.u32 %v5336_v0, %v3811_v1  ;;  %v3947_v35 = vld [vmem:[#allocation2 + $0x190] sm:$0xf0]  ;;  %v3826_v0 = vor.u32 %v5354_v60, %v3825_v58  ;;  %v5452_v60 = vld [vmem:[#allocation2 + $0x3a4] sm:$0xf0] }
 0x1ae   :  { %1751 = vmatmul.bf16.vlgmr.msra.gmra.mxu1 %v6038_v7 }
 0x1b0   :  { %1790 = vmatpush.bf16.msrb.mxu0 %v4070_v20  ;;  %v4595_v20 = vld [vmem:[#allocation2 + $0x698] sm:$0xf0] }
 0x1b1   :  { %1828 = vmatpush.bf16.msrb.mxu3 %v4594_v45 }
 0x1b4   :  { %1791 = vmatpush.bf16.msrb.mxu0 %v3942_v54 }
 0x1b5   :  { %1829 = vmatpush.bf16.msrb.mxu3 %v4466_v53  ;;  %v4731_v53 = vld [vmem:[#allocation2 + $0x7a0] sm:$0xf0] }
 0x1b6   :  { %v4734_v55 = vor.u32 %v5563_v51, %v4731_v53  ;;  %v4739_v53 = vld [vmem:[#allocation2 + $0x7a8] sm:$0xf0] }
 0x1b8   :  { %1792 = vmatpush.bf16.msrb.mxu0 %v3814_v3  ;;  %v4211_v3 = vld [vmem:[#allocation2 + $0x398] sm:$0xf0] }
 0x1b9   :  { %1830 = vmatpush.bf16.msrb.mxu3 %v4338_v2  ;;  %v5434_v2 = vld [vmem:[#allocation2 + $0x31c] sm:$0xf] }
 0x1bb   :  { %1793 = vmatmul.bf16.vlgmr.msrb.gmra.mxu0 %v6038_v7 }
 0x20f   :  { %v115_v42 = vpop.xlane.xlu2 %114 }
 0x210   :  { %v116_v36 = vcvt.f32.s32 %v115_v42  ;;  %v4590_v42 = vor.u32 %v5529_v32, %v4587_v33  ;;  %v4082_v32 = vor.u32 %v5418_v31, %v4081_v28  ;;  %v5369_v33 = vld [vmem:[#allocation2 + $0x114] sm:$0xf]  ;;  %v4481_v31 = vld [vmem:[#allocation2 + $0x528] sm:$0xf] }
 0x212   :  { %v6102_v52 = vadd.s32 %v118_v46, %v116_v36  ;;  %v4713_v46 = vld [vmem:[#allocation2 + $0x710] sm:$0xf] }
 0x213   :  { %v5577_v36 = vld [vmem:[#allocation2 + $0x78c] sm:$0xf0] }
 0x214   :  { %vm135_vm5 = vcmp.eq.s32.totalorder %v6081_v24, %v6102_v52  ;;  %v4714_v48 = vor.u32 %v5577_v36, %v4713_v46  ;;  %v5337_v36 = vld [vmem:[#allocation2 + $0x14] sm:$0xf] }
 0x215   :  { %v6111_v63 = vsel %vm135_vm5, -inf, %v6073_v19  ;;  %v3803_v19 = vld [vmem:[#allocation2 + $0x80] sm:$0xf0]  ;;  %v3822_v49 = vor.u32 %v5337_v36, %v3819_v47  ;;  %v3827_v36 = vld [vmem:[#allocation2 + $0x98] sm:$0xf0] }
 0x216   :  { %v139_v40 = vsel %vm94_vm0, %v6111_v63, -inf  ;;  %v3806_v23 = vor.u32 %v5335_v10, %v3803_v19  ;;  %1799 = vmatpush.bf16.msrb.mxu1 %v4714_v48  ;;  %v4457_v10 = vld [vmem:[#allocation2 + $0x510] sm:$0xf]  ;;  %v5466_v48 = vld [vmem:[#allocation2 + $0x41c] sm:$0xf] }
 0x217   :  { %140 = vmax.xlane.f32.xlu0 %v139_v40  ;;  %v130_v8 = vpop.xlane.xlu2 %129  ;;  %v5433_v40 = vld [vmem:[#allocation2 + $0x314] sm:$0xf]  ;;  %v5513_v19 = vld [vmem:[#allocation2 + $0x58c] sm:$0xf0]  ;;  %v4342_v54 = vor.u32 %v5466_v48, %v4339_v50  ;;  %v5435_v48 = vld [vmem:[#allocation2 + $0x324] sm:$0xf] }
 0x218   :  { %v131_v12 = vcvt.f32.s32 %v130_v8  ;;  %1764 = vmatpush.bf16.msra.mxu2 %v3806_v23  ;;  %v4206_v6 = vor.u32 %v5433_v40, %v4203_v4  ;;  %v4723_v8 = vld [vmem:[#allocation2 + $0x798] sm:$0xf0]  ;;  %v4598_v23 = vor.u32 %v5530_v17, %v4595_v20  ;;  %v4214_v40 = vor.u32 %v5434_v2, %v4211_v3  ;;  %v5531_v4 = vld [vmem:[#allocation2 + $0x624] sm:$0xf]  ;;  %v5564_v50 = vld [vmem:[#allocation2 + $0x72c] sm:$0xf] }
 0x219   :  { %v4726_v9 = vor.u32 %v5562_v5, %v4723_v8  ;;  %v4603_v5 = vld [vmem:[#allocation2 + $0x6a0] sm:$0xf0]  ;;  %v3945_v8 = vld [vmem:[#allocation2 + $0x110] sm:$0xf]  ;;  %v5532_v3 = vld [vmem:[#allocation2 + $0x62c] sm:$0xf] }
 0x21a   :  { %v6115_v22 = vadd.s32 %v133_v11, %v131_v12  ;;  %1800 = vmatpush.bf16.msrb.mxu1 %v4586_v61  ;;  %v4209_v11 = vld [vmem:[#allocation2 + $0x318] sm:$0xf]  ;;  %v4458_v12 = vor.u32 %v5513_v19, %v4457_v10  ;;  %v4737_v61 = vld [vmem:[#allocation2 + $0x728] sm:$0xf]  ;;  %v4475_v17 = vld [vmem:[#allocation2 + $0x5a0] sm:$0xf0] }
 0x21b   :  { %1765 = vmatmul.bf16.vlgmr.msra.gmra.mxu2 %v6038_v7  ;;  %1841 = vmatpush.bf16.msra.mxu0 %v4726_v9  ;;  %v4210_v14 = vor.u32 %v5450_v13, %v4209_v11  ;;  %v4738_v1 = vor.u32 %v5580_v62, %v4737_v61  ;;  %v5385_v9 = vld [vmem:[#allocation2 + $0x18c] sm:$0xf0]  ;;  %v4609_v10 = vld [vmem:[#allocation2 + $0x628] sm:$0xf]  ;;  %v4083_v13 = vld [vmem:[#allocation2 + $0x298] sm:$0xf0]  ;;  %v4478_v20 = vor.u32 %v5499_v16, %v4475_v17 }
 0x21c   :  { %vm136_vm6 = vcmp.eq.s32.totalorder %v6081_v24, %v6115_v22  ;;  %1813 = vmatpush.bf16.msrb.mxu2 %v4718_v29  ;;  %v4330_v29 = vor.u32 %v5481_v27, %v4329_v26  ;;  %v3946_v19 = vor.u32 %v5385_v9, %v3945_v8  ;;  %v5548_v11 = vld [vmem:[#allocation2 + $0x6a4] sm:$0xf0]  ;;  %v4729_v26 = vld [vmem:[#allocation2 + $0x720] sm:$0xf]  ;;  %v4742_v61 = vor.u32 %v5564_v50, %v4739_v53  ;;  %v5403_v62 = vld [vmem:[#allocation2 + $0x224] sm:$0xf] }
 0x21d   :  { %v6123_v34 = vsel %vm136_vm6, -inf, %v6077_v21  ;;  %v4462_v21 = vor.u32 %v5497_v43, %v4459_v44  ;;  %1831 = vmatpush.bf16.msrb.mxu3 %v4210_v14  ;;  %v5449_v43 = vld [vmem:[#allocation2 + $0x38c] sm:$0xf0]  ;;  %v3953_v44 = vld [vmem:[#allocation2 + $0x118] sm:$0xf]  ;;  %v4610_v14 = vor.u32 %v5548_v11, %v4609_v10 }
 0x21e   :  { %v142_v38 = vsel %vm94_vm0, %v6123_v34, -inf  ;;  %1801 = vmatpush.bf16.msrb.mxu1 %v4458_v12  ;;  %v5402_v12 = vld [vmem:[#allocation2 + $0x21c] sm:$0xf]  ;;  %v5579_v27 = vld [vmem:[#allocation2 + $0x79c] sm:$0xf0] }
 0x21f   :  { %143 = vmax.xlane.f32.xlu1 %v142_v38  ;;  %1842 = vmatpush.bf16.msra.mxu0 %v4598_v23  ;;  %v3950_v38 = vor.u32 %v5369_v33, %v3947_v35  ;;  %v4086_v15 = vor.u32 %v5402_v12, %v4083_v13  ;;  %v5353_v23 = vld [vmem:[#allocation2 + $0x8c] sm:$0xf0]  ;;  %v5370_v33 = vld [vmem:[#allocation2 + $0x11c] sm:$0xf]  ;;  %v5483_v8 = vld [vmem:[#allocation2 + $0x49c] sm:$0xf0] }
 0x220   :  { %1814 = vmatpush.bf16.msrb.mxu2 %v4590_v42  ;;  %v4201_v42 = vld [vmem:[#allocation2 + $0x310] sm:$0xf]  ;;  %v4097_v10 = vld [vmem:[#allocation2 + $0x228] sm:$0xf]  ;;  %v5371_v12 = vld [vmem:[#allocation2 + $0x124] sm:$0xf] }
 0x221   :  { %1832 = vmatpush.bf16.msrb.mxu3 %v4082_v32  ;;  %v4202_v45 = vor.u32 %v5449_v43, %v4201_v42  ;;  %v5516_v32 = vld [vmem:[#allocation2 + $0x5a4] sm:$0xf0]  ;;  %v4601_v43 = vld [vmem:[#allocation2 + $0x620] sm:$0xf]  ;;  %v3963_v13 = vld [vmem:[#allocation2 + $0x1a0] sm:$0xf0] }
 0x222   :  { %1802 = vmatpush.bf16.msrb.mxu1 %v4330_v29  ;;  %v4730_v29 = vor.u32 %v5579_v27, %v4729_v26  ;;  %v4482_v35 = vor.u32 %v5516_v32, %v4481_v31  ;;  %v5500_v16 = vld [vmem:[#allocation2 + $0x52c] sm:$0xf]  ;;  %v3966_v27 = vor.u32 %v5371_v12, %v3963_v13  ;;  %v5339_v31 = vld [vmem:[#allocation2 + $0x24] sm:$0xf]  ;;  %v4753_v50 = vld [vmem:[#allocation2 + $0x738] sm:$0xf] }
 0x223   :  { %1843 = vmatpush.bf16.msra.mxu0 %v4470_v41  ;;  %v3958_v41 = vor.u32 %v5370_v33, %v3955_v37  ;;  %v4483_v17 = vld [vmem:[#allocation2 + $0x5a8] sm:$0xf0]  ;;  %v3835_v33 = vld [vmem:[#allocation2 + $0xa0] sm:$0xf0]  ;;  %v4745_v12 = vld [vmem:[#allocation2 + $0x730] sm:$0xf] }
 0x224   :  { %1815 = vmatpush.bf16.msrb.mxu2 %v4462_v21  ;;  %v5386_v21 = vld [vmem:[#allocation2 + $0x194] sm:$0xf0]  ;;  %v4486_v32 = vor.u32 %v5500_v16, %v4483_v17  ;;  %v4355_v37 = vld [vmem:[#allocation2 + $0x4a8] sm:$0xf0]  ;;  %v5581_v13 = vld [vmem:[#allocation2 + $0x7ac] sm:$0xf0] }
 0x225   :  { %v3954_v46 = vor.u32 %v5386_v21, %v3953_v44  ;;  %v5547_v44 = vld [vmem:[#allocation2 + $0x69c] sm:$0xf0]  ;;  %v5484_v21 = vld [vmem:[#allocation2 + $0x4a4] sm:$0xf0]  ;;  %v5436_v53 = vld [vmem:[#allocation2 + $0x32c] sm:$0xf] }
 0x226   :  { %1803 = vmatpush.bf16.msrb.mxu1 %v4202_v45  ;;  %v4353_v45 = vld [vmem:[#allocation2 + $0x428] sm:$0xf]  ;;  %v4602_v47 = vor.u32 %v5547_v44, %v4601_v43  ;;  %v4497_v17 = vld [vmem:[#allocation2 + $0x538] sm:$0xf] }
 0x227   :  { %1833 = vmatpush.bf16.msrb.mxu3 %v3954_v46  ;;  %1844 = vmatpush.bf16.msra.mxu0 %v4342_v54  ;;  %v5338_v46 = vld [vmem:[#allocation2 + $0x1c] sm:$0xf]  ;;  %v4354_v51 = vor.u32 %v5484_v21, %v4353_v45  ;;  %v4473_v54 = vld [vmem:[#allocation2 + $0x520] sm:$0xf] }
 0x228   :  { %1816 = vmatpush.bf16.msrb.mxu2 %v4334_v57  ;;  %v5417_v57 = vld [vmem:[#allocation2 + $0x28c] sm:$0xf0]  ;;  %v4089_v45 = vld [vmem:[#allocation2 + $0x220] sm:$0xf] }
 0x229   :  { %v4074_v59 = vor.u32 %v5417_v57, %v4073_v56  ;;  %v3830_v57 = vor.u32 %v5338_v46, %v3827_v36  ;;  %v5419_v21 = vld [vmem:[#allocation2 + $0x29c] sm:$0xf0]  ;;  %v3838_v46 = vor.u32 %v5339_v31, %v3835_v33  ;;  %v3841_v36 = vld [vmem:[#allocation2 + $0x28] sm:$0xf]  ;;  %v4746_v31 = vor.u32 %v5581_v13, %v4745_v12  ;;  %v4617_v33 = vld [vmem:[#allocation2 + $0x630] sm:$0xf] }
 0x22a   :  { %v4233_v12 = vld [vmem:[#allocation2 + $0x330] sm:$0xf] }
 0x22b   :  { %1804 = vmatpush.bf16.msrb.mxu1 %v4074_v59  ;;  %1834 = vmatpush.bf16.msrb.mxu3 %v3826_v0  ;;  %v4225_v59 = vld [vmem:[#allocation2 + $0x328] sm:$0xf]  ;;  %v4091_v0 = vld [vmem:[#allocation2 + $0x2a0] sm:$0xf0]  ;;  %v5453_v13 = vld [vmem:[#allocation2 + $0x3ac] sm:$0xf0] }
 0x22c   :  { %1817 = vmatpush.bf16.msrb.mxu2 %v4206_v6  ;;  %v4606_v6 = vor.u32 %v5531_v4, %v4603_v5  ;;  %1845 = vmatpush.bf16.msra.mxu0 %v4214_v40  ;;  %v4611_v40 = vld [vmem:[#allocation2 + $0x6a8] sm:$0xf0]  ;;  %v4226_v5 = vor.u32 %v5452_v60, %v4225_v59  ;;  %v4094_v9 = vor.u32 %v5403_v62, %v4091_v0  ;;  %v4619_v59 = vld [vmem:[#allocation2 + $0x6b0] sm:$0xf0]  ;;  %v5387_v62 = vld [vmem:[#allocation2 + $0x19c] sm:$0xf0] }
 0x22d   :  { %v4614_v11 = vor.u32 %v5532_v3, %v4611_v40  ;;  %v4625_v3 = vld [vmem:[#allocation2 + $0x638] sm:$0xf] }
 0x22e   :  { %1835 = vmatmul.bf16.vlgmr.msrb.gmra.mxu3 %v6038_v7  ;;  %v5550_v40 = vld [vmem:[#allocation2 + $0x6b4] sm:$0xf0] }
 0x22f   :  { %1883 = vmatpush.bf16.msra.mxu3 %v4738_v1  ;;  %1805 = vmatpush.bf16.msrb.mxu1 %v3946_v19  ;;  %v5420_v19 = vld [vmem:[#allocation2 + $0x2a4] sm:$0xf0] }
 0x230   :  { %1818 = vmatpush.bf16.msrb.mxu2 %v4078_v18  ;;  %v3817_v18 = vld [vmem:[#allocation2 + $0x10] sm:$0xf]  ;;  %1846 = vmatpush.bf16.msra.mxu0 %v4086_v15 }
 0x231   :  { %v3818_v28 = vor.u32 %v5353_v23, %v3817_v18  ;;  %v4098_v18 = vor.u32 %v5420_v19, %v4097_v10  ;;  %v5451_v23 = vld [vmem:[#allocation2 + $0x39c] sm:$0xf0] }
 0x232   :  { %v3833_v10 = vld [vmem:[#allocation2 + $0x20] sm:$0xf] }
 0x233   :  { %1884 = vmatpush.bf16.msra.mxu3 %v4610_v14  ;;  %1806 = vmatpush.bf16.msrb.mxu1 %v3818_v28  ;;  %v3969_v28 = vld [vmem:[#allocation2 + $0x128] sm:$0xf]  ;;  %v5355_v19 = vld [vmem:[#allocation2 + $0x9c] sm:$0xf0] }
 0x234   :  { %1819 = vmatpush.bf16.msrb.mxu2 %v3950_v38  ;;  %v5467_v38 = vld [vmem:[#allocation2 + $0x424] sm:$0xf]  ;;  %1847 = vmatpush.bf16.msra.mxu0 %v3958_v41  ;;  %v5565_v41 = vld [vmem:[#allocation2 + $0x734] sm:$0xf] }
 0x235   :  { %v4350_v42 = vor.u32 %v5467_v38, %v4347_v39 }
 0x236   :  { %1807 = vmatmul.bf16.vlgmr.msrb.gmra.mxu1 %v6038_v7 }
 0x237   :  { %1855 = vmatpush.bf16.msra.mxu1 %v4730_v29  ;;  %1885 = vmatpush.bf16.msra.mxu3 %v4482_v35  ;;  %v5388_v29 = vld [vmem:[#allocation2 + $0x1a4] sm:$0xf0]  ;;  %v5468_v35 = vld [vmem:[#allocation2 + $0x42c] sm:$0xf] }
 0x238   :  { %1820 = vmatpush.bf16.msrb.mxu2 %v3822_v49  ;;  %v4219_v49 = vld [vmem:[#allocation2 + $0x3a0] sm:$0xf0]  ;;  %1848 = vmatpush.bf16.msra.mxu0 %v3830_v57  ;;  %v3970_v44 = vor.u32 %v5388_v29, %v3969_v28  ;;  %v4227_v57 = vld [vmem:[#allocation2 + $0x3a8] sm:$0xf0]  ;;  %v5469_v28 = vld [vmem:[#allocation2 + $0x434] sm:$0xf] }
 0x239   :  { %v4222_v58 = vor.u32 %v5435_v48, %v4219_v49  ;;  %v4358_v48 = vor.u32 %v5468_v35, %v4355_v37  ;;  %v4363_v29 = vld [vmem:[#allocation2 + $0x4b0] sm:$0xf0]  ;;  %v5549_v35 = vld [vmem:[#allocation2 + $0x6ac] sm:$0xf0] }
 0x23b   :  { %1821 = vmatmul.bf16.vlgmr.msrb.gmra.mxu2 %v6038_v7  ;;  %1856 = vmatpush.bf16.msra.mxu1 %v4602_v47  ;;  %v5356_v47 = vld [vmem:[#allocation2 + $0xa4] sm:$0xf0] }
 0x23c   :  { %1869 = vmatpush.bf16.msra.mxu2 %v4734_v55  ;;  %v5515_v55 = vld [vmem:[#allocation2 + $0x59c] sm:$0xf0]  ;;  %1886 = vmatpush.bf16.msra.mxu3 %v4354_v51  ;;  %v5582_v51 = vld [vmem:[#allocation2 + $0x7b4] sm:$0xf0]  ;;  %v3842_v60 = vor.u32 %v5356_v47, %v3841_v36  ;;  %v4755_v36 = vld [vmem:[#allocation2 + $0x7b8] sm:$0xf0] }
 0x23d   :  { %v4474_v2 = vor.u32 %v5515_v55, %v4473_v54  ;;  %1897 = vmatpush.bf16.msrb.mxu0 %v4742_v61  ;;  %v4090_v55 = vor.u32 %v5419_v21, %v4089_v45  ;;  %v3961_v61 = vld [vmem:[#allocation2 + $0x120] sm:$0xf]  ;;  %v4754_v0 = vor.u32 %v5582_v51, %v4753_v50  ;;  %v5437_v45 = vld [vmem:[#allocation2 + $0x334] sm:$0xf] }
 0x23e   :  { %1849 = vmatmul.bf16.vlgmr.msra.gmra.mxu0 %v6038_v7  ;;  %v4235_v21 = vld [vmem:[#allocation2 + $0x3b0] sm:$0xf0] }
 0x23f   :  { %1857 = vmatpush.bf16.msra.mxu1 %v4474_v2  ;;  %v4238_v51 = vor.u32 %v5437_v45, %v4235_v21  ;;  %v4769_v45 = vld [vmem:[#allocation2 + $0x748] sm:$0xf] }
 0x240   :  { %1870 = vmatpush.bf16.msra.mxu2 %v4606_v6  ;;  %v4345_v6 = vld [vmem:[#allocation2 + $0x420] sm:$0xf]  ;;  %1887 = vmatpush.bf16.msra.mxu3 %v4226_v5  ;;  %v5404_v5 = vld [vmem:[#allocation2 + $0x22c] sm:$0xf]  ;;  %v5584_v21 = vld [vmem:[#allocation2 + $0x7c4] sm:$0xf0] }
 0x241   :  { %v4346_v15 = vor.u32 %v5483_v8, %v4345_v6  ;;  %1898 = vmatpush.bf16.msrb.mxu0 %v4614_v11  ;;  %v3962_v6 = vor.u32 %v5387_v62, %v3961_v61  ;;  %v4099_v8 = vld [vmem:[#allocation2 + $0x2a8] sm:$0xf0]  ;;  %v4626_v11 = vor.u32 %v5550_v40, %v4625_v3  ;;  %v5534_v61 = vld [vmem:[#allocation2 + $0x63c] sm:$0xf]  ;;  %v4113_v40 = vld [vmem:[#allocation2 + $0x238] sm:$0xf] }
 0x242   :  { %v4627_v62 = vld [vmem:[#allocation2 + $0x6b8] sm:$0xf0] }
 0x243   :  { %1858 = vmatpush.bf16.msra.mxu1 %v4346_v15  ;;  %v4102_v15 = vor.u32 %v5404_v5, %v4099_v8  ;;  %v5422_v5 = vld [vmem:[#allocation2 + $0x2b4] sm:$0xf0]  ;;  %v5373_v8 = vld [vmem:[#allocation2 + $0x134] sm:$0xf] }
 0x244   :  { %1871 = vmatpush.bf16.msra.mxu2 %v4478_v20  ;;  %v4217_v20 = vld [vmem:[#allocation2 + $0x320] sm:$0xf]  ;;  %1888 = vmatpush.bf16.msra.mxu3 %v4098_v18  ;;  %v5518_v18 = vld [vmem:[#allocation2 + $0x5b4] sm:$0xf0] }
 0x245   :  { %v4218_v39 = vor.u32 %v5451_v23, %v4217_v20  ;;  %1899 = vmatpush.bf16.msrb.mxu0 %v4486_v32  ;;  %v5372_v20 = vld [vmem:[#allocation2 + $0x12c] sm:$0xf]  ;;  %v3834_v23 = vor.u32 %v5355_v19, %v3833_v10  ;;  %v4498_v32 = vor.u32 %v5518_v18, %v4497_v17  ;;  %v5502_v10 = vld [vmem:[#allocation2 + $0x53c] sm:$0xf]  ;;  %v5390_v17 = vld [vmem:[#allocation2 + $0x1b4] sm:$0xf0] }
 0x246   :  { %v4499_v19 = vld [vmem:[#allocation2 + $0x5b8] sm:$0xf0] }
 0x247   :  { %1859 = vmatpush.bf16.msra.mxu1 %v4218_v39  ;;  %v4369_v39 = vld [vmem:[#allocation2 + $0x438] sm:$0xf]  ;;  %v4502_v18 = vor.u32 %v5502_v10, %v4499_v19  ;;  %v5520_v10 = vld [vmem:[#allocation2 + $0x5c4] sm:$0xf0]  ;;  %v5374_v19 = vld [vmem:[#allocation2 + $0x13c] sm:$0xf] }
 0x248   :  { %1872 = vmatpush.bf16.msra.mxu2 %v4350_v42  ;;  %v4747_v42 = vld [vmem:[#allocation2 + $0x7b0] sm:$0xf0]  ;;  %1889 = vmatpush.bf16.msra.mxu3 %v3970_v44  ;;  %v3843_v44 = vld [vmem:[#allocation2 + $0xa8] sm:$0xf0] }
 0x249   :  { %v4750_v49 = vor.u32 %v5565_v41, %v4747_v42  ;;  %1900 = vmatpush.bf16.msrb.mxu0 %v4358_v48  ;;  %v5486_v41 = vld [vmem:[#allocation2 + $0x4b4] sm:$0xf0]  ;;  %v5340_v42 = vld [vmem:[#allocation2 + $0x2c] sm:$0xf]  ;;  %v4489_v48 = vld [vmem:[#allocation2 + $0x530] sm:$0xf] }
 0x24a   :  { %v4370_v47 = vor.u32 %v5486_v41, %v4369_v39  ;;  %v3846_v50 = vor.u32 %v5340_v42, %v3843_v44  ;;  %v3857_v39 = vld [vmem:[#allocation2 + $0x38] sm:$0xf] }
 0x24b   :  { %1860 = vmatpush.bf16.msra.mxu1 %v4090_v55  ;;  %v5454_v55 = vld [vmem:[#allocation2 + $0x3b4] sm:$0xf0] }
 0x24c   :  { %1873 = vmatpush.bf16.msra.mxu2 %v4222_v58  ;;  %v5533_v58 = vld [vmem:[#allocation2 + $0x634] sm:$0xf]  ;;  %1890 = vmatpush.bf16.msra.mxu3 %v3842_v60  ;;  %v5358_v41 = vld [vmem:[#allocation2 + $0xb4] sm:$0xf0] }
 0x24d   :  { %v4622_v2 = vor.u32 %v5533_v58, %v4619_v59  ;;  %v5405_v58 = vld [vmem:[#allocation2 + $0x234] sm:$0xf] }
 0x24e   :  { %v4107_v59 = vld [vmem:[#allocation2 + $0x2b0] sm:$0xf0] }
 0x24f   :  { %1861 = vmatpush.bf16.msra.mxu1 %v3962_v6  ;;  %1891 = vmatmul.bf16.vlgmr.msra.gmra.mxu3 %v6038_v7  ;;  %v4110_v3 = vor.u32 %v5405_v58, %v4107_v59  ;;  %v4630_v6 = vor.u32 %v5534_v61, %v4627_v62  ;;  %v4641_v58 = vld [vmem:[#allocation2 + $0x648] sm:$0xf]  ;;  %v4115_v62 = vld [vmem:[#allocation2 + $0x2b8] sm:$0xf0] }
 0x250   :  { %1874 = vmatpush.bf16.msra.mxu2 %v4094_v9  ;;  %v4491_v9 = vld [vmem:[#allocation2 + $0x5b0] sm:$0xf0]  ;;  %1939 = vmatpush.bf16.msrb.mxu3 %v4754_v0  ;;  %v5552_v59 = vld [vmem:[#allocation2 + $0x6c4] sm:$0xf0] }
 0x253   :  { %1862 = vmatpush.bf16.msra.mxu1 %v3834_v23  ;;  %v3851_v23 = vld [vmem:[#allocation2 + $0xb0] sm:$0xf0] }
 0x254   :  { %1875 = vmatpush.bf16.msra.mxu2 %v3966_v27  ;;  %v3971_v27 = vld [vmem:[#allocation2 + $0x1a8] sm:$0xf0]  ;;  %1940 = vmatpush.bf16.msrb.mxu3 %v4626_v11  ;;  %v4114_v11 = vor.u32 %v5422_v5, %v4113_v40  ;;  %v4642_v40 = vor.u32 %v5552_v59, %v4641_v58  ;;  %v4761_v5 = vld [vmem:[#allocation2 + $0x740] sm:$0xf]  ;;  %v4129_v59 = vld [vmem:[#allocation2 + $0x248] sm:$0xf] }
 0x255   :  { %v3974_v37 = vor.u32 %v5372_v20, %v3971_v27  ;;  %v5341_v20 = vld [vmem:[#allocation2 + $0x34] sm:$0xf]  ;;  %v5470_v27 = vld [vmem:[#allocation2 + $0x43c] sm:$0xf] }
 0x256   :  { %1863 = vmatmul.bf16.vlgmr.msra.gmra.mxu1 %v6038_v7 }
 0x257   :  { %1911 = vmatpush.bf16.msrb.mxu1 %v4746_v31  ;;  %v5567_v31 = vld [vmem:[#allocation2 + $0x744] sm:$0xf] }
 0x258   :  { %1876 = vmatpush.bf16.msra.mxu2 %v3838_v46  ;;  %v5566_v46 = vld [vmem:[#allocation2 + $0x73c] sm:$0xf]  ;;  %1941 = vmatpush.bf16.msrb.mxu3 %v4498_v32  ;;  %v4763_v32 = vld [vmem:[#allocation2 + $0x7c0] sm:$0xf0] }
 0x259   :  { %v4766_v44 = vor.u32 %v5567_v31, %v4763_v32  ;;  %v5342_v31 = vld [vmem:[#allocation2 + $0x3c] sm:$0xf] }
 0x25a   :  { %v3859_v32 = vld [vmem:[#allocation2 + $0xb8] sm:$0xf0] }
 0x25b   :  { %1877 = vmatmul.bf16.vlgmr.msra.gmra.mxu2 %v6038_v7 }
 0x25c   :  { %1925 = vmatpush.bf16.msrb.mxu2 %v4750_v49  ;;  %v5517_v49 = vld [vmem:[#allocation2 + $0x5ac] sm:$0xf0]  ;;  %1942 = vmatpush.bf16.msrb.mxu3 %v4370_v47  ;;  %v5535_v47 = vld [vmem:[#allocation2 + $0x644] sm:$0xf] }
 0x25d   :  { %v4490_v60 = vor.u32 %v5517_v49, %v4489_v48  ;;  %v4635_v48 = vld [vmem:[#allocation2 + $0x6c0] sm:$0xf0]  ;;  %v3858_v49 = vor.u32 %v5358_v41, %v3857_v39  ;;  %v4771_v39 = vld [vmem:[#allocation2 + $0x7c8] sm:$0xf0] }
 0x260   :  { %1926 = vmatpush.bf16.msrb.mxu2 %v4622_v2  ;;  %v5485_v2 = vld [vmem:[#allocation2 + $0x4ac] sm:$0xf0] }
 0x28a   :  { %v6133_v56 = vpop.xlane.xlu0 %140 }
 0x28b   :  { %vm145_vm7 = vcmp.eq.f32.partialorder %v6111_v63, %v6133_v56 }
 0x28c   :  { %v147_v1 = vsel %vm145_vm7, %v6081_v24, 8 }
 0x28d   :  { %v6140_v4 = vsel %vm94_vm0, %v147_v1, 2147483647  ;;  %v4230_v1 = vor.u32 %v5436_v53, %v4227_v57  ;;  %v4241_v53 = vld [vmem:[#allocation2 + $0x338] sm:$0xf]  ;;  %v4758_v57 = vor.u32 %v5566_v46, %v4755_v36  ;;  %v4243_v36 = vld [vmem:[#allocation2 + $0x3b8] sm:$0xf0] }
 0x28e   :  { %v151_v63 = vshra.s32 %v6140_v4, 16  ;;  %v4242_v0 = vor.u32 %v5454_v55, %v4241_v53  ;;  %v4770_v53 = vor.u32 %v5584_v21, %v4769_v45  ;;  %v3862_v45 = vor.u32 %v5342_v31, %v3859_v32 }
 0x28f   :  { %1901 = vmatpush.bf16.msrb.mxu0 %v4230_v1  ;;  %v4361_v1 = vld [vmem:[#allocation2 + $0x430] sm:$0xf] }
 0x290   :  { %v6143_v14 = vcvt.s32.f32 %v151_v63  ;;  %v5501_v63 = vld [vmem:[#allocation2 + $0x534] sm:$0xf]  ;;  %1943 = vmatpush.bf16.msrb.mxu3 %v4242_v0  ;;  %v5503_v0 = vld [vmem:[#allocation2 + $0x544] sm:$0xf] }
 0x291   :  { %v4494_v16 = vor.u32 %v5501_v63, %v4491_v9  ;;  %v3979_v63 = vld [vmem:[#allocation2 + $0x1b0] sm:$0xf0]  ;;  %v4362_v9 = vor.u32 %v5485_v2, %v4361_v1  ;;  %v4507_v1 = vld [vmem:[#allocation2 + $0x5c0] sm:$0xf0]  ;;  %v3849_v2 = vld [vmem:[#allocation2 + $0x30] sm:$0xf] }
 0x292   :  { %v6146_v26 = vpop.xlane.xlu1 %143  ;;  %154 = vmin.xlane.f32.xlu2 %v6143_v14 }
 0x293   :  { %vm146_vm8 = vcmp.eq.f32.partialorder %v6123_v34, %v6146_v26  ;;  %1902 = vmatpush.bf16.msrb.mxu0 %v4102_v15  ;;  %1927 = vmatpush.bf16.msrb.mxu2 %v4494_v16  ;;  %v3982_v15 = vor.u32 %v5373_v8, %v3979_v63  ;;  %v3985_v16 = vld [vmem:[#allocation2 + $0x138] sm:$0xf]  ;;  %v4510_v63 = vor.u32 %v5503_v0, %v4507_v1  ;;  %v3995_v0 = vld [vmem:[#allocation2 + $0x1c0] sm:$0xf0] }
 0x294   :  { %v148_v38 = vsel %vm146_vm8, %v6081_v24, 8  ;;  %1944 = vmatpush.bf16.msrb.mxu3 %v4114_v11 }
 0x295   :  { %v6153_v43 = vsel %vm94_vm0, %v148_v38, 2147483647  ;;  %v4366_v38 = vor.u32 %v5469_v28, %v4363_v29  ;;  %v4234_v28 = vor.u32 %v5453_v13, %v4233_v12  ;;  %v4371_v29 = vld [vmem:[#allocation2 + $0x4b8] sm:$0xf0]  ;;  %v5471_v13 = vld [vmem:[#allocation2 + $0x444] sm:$0xf] }
 0x296   :  { %v166_v34 = vshra.s32 %v6153_v43, 16  ;;  %v4374_v42 = vor.u32 %v5470_v27, %v4371_v29  ;;  %v3987_v12 = vld [vmem:[#allocation2 + $0x1b8] sm:$0xf0]  ;;  %v5488_v29 = vld [vmem:[#allocation2 + $0x4c4] sm:$0xf0] }
 0x297   :  { %1903 = vmatpush.bf16.msrb.mxu0 %v3974_v37  ;;  %1928 = vmatpush.bf16.msrb.mxu2 %v4366_v38  ;;  %v5421_v37 = vld [vmem:[#allocation2 + $0x2ac] sm:$0xf0]  ;;  %v3854_v38 = vor.u32 %v5341_v20, %v3851_v23  ;;  %v5551_v20 = vld [vmem:[#allocation2 + $0x6bc] sm:$0xf0]  ;;  %v3990_v23 = vor.u32 %v5374_v19, %v3987_v12  ;;  %v5343_v19 = vld [vmem:[#allocation2 + $0x44] sm:$0xf] }
 0x298   :  { %v6156_v54 = vcvt.s32.f32 %v166_v34  ;;  %v4618_v34 = vor.u32 %v5549_v35, %v4617_v33  ;;  %v3986_v33 = vor.u32 %v5390_v17, %v3985_v16  ;;  %v4105_v35 = vld [vmem:[#allocation2 + $0x230] sm:$0xf]  ;;  %v5472_v12 = vld [vmem:[#allocation2 + $0x44c] sm:$0xf] }
 0x299   :  { %v4106_v46 = vor.u32 %v5421_v37, %v4105_v35  ;;  %v4251_v35 = vld [vmem:[#allocation2 + $0x3c0] sm:$0xf0] }
 0x29a   :  { %169 = vmin.xlane.f32.xlu0 %v6156_v54  ;;  %1912 = vmatpush.bf16.msrb.mxu1 %v4618_v34  ;;  %v5438_v34 = vld [vmem:[#allocation2 + $0x33c] sm:$0xf] }
 0x29b   :  { %1904 = vmatpush.bf16.msrb.mxu0 %v3846_v50  ;;  %1929 = vmatpush.bf16.msrb.mxu2 %v4238_v51  ;;  %v3977_v50 = vld [vmem:[#allocation2 + $0x130] sm:$0xf]  ;;  %v4246_v55 = vor.u32 %v5438_v34, %v4243_v36  ;;  %v4257_v34 = vld [vmem:[#allocation2 + $0x348] sm:$0xf] }
 0x29c   :  { %1945 = vmatpush.bf16.msrb.mxu3 %v3986_v33  ;;  %v5389_v51 = vld [vmem:[#allocation2 + $0x1ac] sm:$0xf0]  ;;  %v5439_v33 = vld [vmem:[#allocation2 + $0x344] sm:$0xf] }
 0x29d   :  { %v3978_v61 = vor.u32 %v5389_v51, %v3977_v50  ;;  %v4254_v21 = vor.u32 %v5439_v33, %v4251_v35  ;;  %v5536_v50 = vld [vmem:[#allocation2 + $0x64c] sm:$0xf]  ;;  %v4785_v33 = vld [vmem:[#allocation2 + $0x758] sm:$0xf] }
 0x29e   :  { %1913 = vmatpush.bf16.msrb.mxu1 %v4490_v60  ;;  %1905 = vmatmul.bf16.vlgmr.msrb.gmra.mxu0 %v6038_v7  ;;  %v5406_v60 = vld [vmem:[#allocation2 + $0x23c] sm:$0xf]  ;;  %v4643_v51 = vld [vmem:[#allocation2 + $0x6c8] sm:$0xf0]  ;;  %v5586_v35 = vld [vmem:[#allocation2 + $0x7d4] sm:$0xf0] }
 0x29f   :  { %1953 = vmatpush.bf16.msra.mxu0 %v4758_v57  ;;  %1930 = vmatpush.bf16.msrb.mxu2 %v4110_v3  ;;  %v4638_v57 = vor.u32 %v5535_v47, %v4635_v48  ;;  %v5357_v3 = vld [vmem:[#allocation2 + $0xac] sm:$0xf0]  ;;  %v4118_v8 = vor.u32 %v5406_v60, %v4115_v62  ;;  %v5407_v47 = vld [vmem:[#allocation2 + $0x244] sm:$0xf]  ;;  %v5424_v60 = vld [vmem:[#allocation2 + $0x2c4] sm:$0xf0] }
 0x2a0   :  { %1946 = vmatpush.bf16.msrb.mxu3 %v3858_v49  ;;  %v3850_v11 = vor.u32 %v5357_v3, %v3849_v2  ;;  %v4123_v48 = vld [vmem:[#allocation2 + $0x2c0] sm:$0xf0]  ;;  %v5504_v2 = vld [vmem:[#allocation2 + $0x54c] sm:$0xf] }
 0x2a1   :  { %v4126_v58 = vor.u32 %v5407_v47, %v4123_v48  ;;  %v5375_v62 = vld [vmem:[#allocation2 + $0x144] sm:$0xf]  ;;  %v4515_v3 = vld [vmem:[#allocation2 + $0x5c8] sm:$0xf0]  ;;  %v4657_v47 = vld [vmem:[#allocation2 + $0x658] sm:$0xf] }
 0x2a2   :  { %1914 = vmatpush.bf16.msrb.mxu1 %v4362_v9  ;;  %v4513_v9 = vld [vmem:[#allocation2 + $0x548] sm:$0xf]  ;;  %v5554_v48 = vld [vmem:[#allocation2 + $0x6d4] sm:$0xf0] }
 0x2a3   :  { %1954 = vmatpush.bf16.msra.mxu0 %v4630_v6  ;;  %1931 = vmatpush.bf16.msrb.mxu2 %v3982_v15  ;;  %v5583_v6 = vld [vmem:[#allocation2 + $0x7bc] sm:$0xf0]  ;;  %v4379_v15 = vld [vmem:[#allocation2 + $0x4c0] sm:$0xf0]  ;;  %v4514_v17 = vor.u32 %v5520_v10, %v4513_v9  ;;  %v5392_v9 = vld [vmem:[#allocation2 + $0x1c4] sm:$0xf0]  ;;  %v4518_v10 = vor.u32 %v5504_v2, %v4515_v3 }
 0x2a4   :  { %1995 = vmatpush.bf16.msra.mxu3 %v4770_v53  ;;  %v4762_v16 = vor.u32 %v5583_v6, %v4761_v5  ;;  %v4382_v27 = vor.u32 %v5471_v13, %v4379_v15  ;;  %v4249_v5 = vld [vmem:[#allocation2 + $0x340] sm:$0xf]  ;;  %v4387_v15 = vld [vmem:[#allocation2 + $0x4c8] sm:$0xf0]  ;;  %v5522_v2 = vld [vmem:[#allocation2 + $0x5d4] sm:$0xf0] }
 0x2a5   :  { %1947 = vmatmul.bf16.vlgmr.msrb.gmra.mxu3 %v6038_v7  ;;  %v5455_v6 = vld [vmem:[#allocation2 + $0x3bc] sm:$0xf0]  ;;  %v4390_v31 = vor.u32 %v5472_v12, %v4387_v15  ;;  %v4401_v12 = vld [vmem:[#allocation2 + $0x458] sm:$0xf] }
 0x2a6   :  { %1915 = vmatpush.bf16.msrb.mxu1 %v4234_v28  ;;  %v4385_v28 = vld [vmem:[#allocation2 + $0x448] sm:$0xf]  ;;  %v4250_v13 = vor.u32 %v5455_v6, %v4249_v5  ;;  %v4003_v5 = vld [vmem:[#allocation2 + $0x1c8] sm:$0xf0] }
 0x2a7   :  { %1955 = vmatpush.bf16.msra.mxu0 %v4502_v18  ;;  %1932 = vmatpush.bf16.msrb.mxu2 %v3854_v38  ;;  %v4633_v18 = vld [vmem:[#allocation2 + $0x640] sm:$0xf]  ;;  %v5568_v38 = vld [vmem:[#allocation2 + $0x74c] sm:$0xf]  ;;  %v4386_v41 = vor.u32 %v5488_v29, %v4385_v28  ;;  %v3873_v28 = vld [vmem:[#allocation2 + $0x48] sm:$0xf] }
 0x2a8   :  { %1996 = vmatpush.bf16.msra.mxu3 %v4642_v40  ;;  %v4634_v37 = vor.u32 %v5551_v20, %v4633_v18  ;;  %v4774_v36 = vor.u32 %v5568_v38, %v4771_v39  ;;  %v4130_v40 = vor.u32 %v5424_v60, %v4129_v59  ;;  %v4121_v20 = vld [vmem:[#allocation2 + $0x240] sm:$0xf]  ;;  %v5360_v29 = vld [vmem:[#allocation2 + $0xc4] sm:$0xf0]  ;;  %v4259_v39 = vld [vmem:[#allocation2 + $0x3c8] sm:$0xf0]  ;;  %v4658_v59 = vor.u32 %v5554_v48, %v4657_v47 }
 0x2a9   :  { %v4777_v60 = vld [vmem:[#allocation2 + $0x750] sm:$0xf] }
 0x2aa   :  { %1916 = vmatpush.bf16.msrb.mxu1 %v4106_v46  ;;  %1933 = vmatmul.bf16.vlgmr.msrb.gmra.mxu2 %v6038_v7  ;;  %v5456_v46 = vld [vmem:[#allocation2 + $0x3c4] sm:$0xf0]  ;;  %v4393_v47 = vld [vmem:[#allocation2 + $0x450] sm:$0xf] }
 0x2ab   :  { %1956 = vmatpush.bf16.msra.mxu0 %v4374_v42  ;;  %1981 = vmatpush.bf16.msra.mxu2 %v4766_v44  ;;  %v4505_v42 = vld [vmem:[#allocation2 + $0x540] sm:$0xf]  ;;  %v4258_v53 = vor.u32 %v5456_v46, %v4257_v34  ;;  %v4786_v34 = vor.u32 %v5586_v35, %v4785_v33  ;;  %v4521_v35 = vld [vmem:[#allocation2 + $0x550] sm:$0xf] }
 0x2ac   :  { %1997 = vmatpush.bf16.msra.mxu3 %v4514_v17  ;;  %v5519_v44 = vld [vmem:[#allocation2 + $0x5bc] sm:$0xf0]  ;;  %v4779_v17 = vld [vmem:[#allocation2 + $0x7d0] sm:$0xf0]  ;;  %v5489_v48 = vld [vmem:[#allocation2 + $0x4cc] sm:$0xf0] }
 0x2ad   :  { %v4506_v49 = vor.u32 %v5519_v44, %v4505_v42  ;;  %v4651_v42 = vld [vmem:[#allocation2 + $0x6d0] sm:$0xf0]  ;;  %v3874_v44 = vor.u32 %v5360_v29, %v3873_v28  ;;  %v5570_v29 = vld [vmem:[#allocation2 + $0x75c] sm:$0xf] }
 0x2ae   :  { %1917 = vmatpush.bf16.msrb.mxu1 %v3978_v61  ;;  %v4646_v61 = vor.u32 %v5536_v50, %v4643_v51  ;;  %v4131_v51 = vld [vmem:[#allocation2 + $0x2c8] sm:$0xf0]  ;;  %v4267_v28 = vld [vmem:[#allocation2 + $0x3d0] sm:$0xf0] }
 0x2af   :  { %1957 = vmatpush.bf16.msra.mxu0 %v4246_v55  ;;  %1982 = vmatpush.bf16.msra.mxu2 %v4638_v57  ;;  %v4377_v55 = vld [vmem:[#allocation2 + $0x440] sm:$0xf] }
 0x2b0   :  { %1998 = vmatpush.bf16.msra.mxu3 %v4386_v41  ;;  %v5487_v57 = vld [vmem:[#allocation2 + $0x4bc] sm:$0xf0]  ;;  %v5537_v41 = vld [vmem:[#allocation2 + $0x654] sm:$0xf] }
 0x2b1   :  { %v4378_v1 = vor.u32 %v5487_v57, %v4377_v55  ;;  %v4523_v55 = vld [vmem:[#allocation2 + $0x5d0] sm:$0xf0]  ;;  %v3865_v57 = vld [vmem:[#allocation2 + $0x40] sm:$0xf] }
 0x2b2   :  { %1918 = vmatpush.bf16.msrb.mxu1 %v3850_v11  ;;  %v3867_v11 = vld [vmem:[#allocation2 + $0xc0] sm:$0xf0] }
 0x2b3   :  { %1958 = vmatpush.bf16.msra.mxu0 %v4118_v8  ;;  %1983 = vmatpush.bf16.msra.mxu2 %v4510_v63  ;;  %v3998_v8 = vor.u32 %v5375_v62, %v3995_v0  ;;  %v4001_v63 = vld [vmem:[#allocation2 + $0x148] sm:$0xf] }
 0x2b4   :  { %1999 = vmatpush.bf16.msra.mxu3 %v4258_v53  ;;  %v4002_v18 = vor.u32 %v5392_v9, %v4001_v63  ;;  %v5505_v53 = vld [vmem:[#allocation2 + $0x554] sm:$0xf] }
 0x2b5   :  { %1919 = vmatmul.bf16.vlgmr.msrb.gmra.mxu1 %v6038_v7  ;;  %v4526_v0 = vor.u32 %v5505_v53, %v4523_v55  ;;  %v4395_v63 = vld [vmem:[#allocation2 + $0x4d0] sm:$0xf0] }
 0x2b6   :  { %1967 = vmatpush.bf16.msra.mxu1 %v4762_v16  ;;  %v5569_v16 = vld [vmem:[#allocation2 + $0x754] sm:$0xf] }
 0x2b7   :  { %1959 = vmatpush.bf16.msra.mxu0 %v3990_v23  ;;  %1984 = vmatpush.bf16.msra.mxu2 %v4382_v27  ;;  %v5423_v23 = vld [vmem:[#allocation2 + $0x2bc] sm:$0xf0]  ;;  %v3870_v27 = vor.u32 %v5343_v19, %v3867_v11  ;;  %v4782_v32 = vor.u32 %v5569_v16, %v4779_v17  ;;  %v5553_v19 = vld [vmem:[#allocation2 + $0x6cc] sm:$0xf0]  ;;  %v5344_v16 = vld [vmem:[#allocation2 + $0x4c] sm:$0xf] }
 0x2b8   :  { %2000 = vmatpush.bf16.msra.mxu3 %v4130_v40  ;;  %v4122_v38 = vor.u32 %v5423_v23, %v4121_v20  ;;  %v5376_v40 = vld [vmem:[#allocation2 + $0x14c] sm:$0xf]  ;;  %v5377_v55 = vld [vmem:[#allocation2 + $0x154] sm:$0xf] }
 0x2b9   :  { %v4006_v11 = vor.u32 %v5376_v40, %v4003_v5  ;;  %v3875_v17 = vld [vmem:[#allocation2 + $0xc8] sm:$0xf0]  ;;  %v5345_v5 = vld [vmem:[#allocation2 + $0x54] sm:$0xf] }
 0x2ba   :  { %1968 = vmatpush.bf16.msra.mxu1 %v4634_v37  ;;  %v5440_v37 = vld [vmem:[#allocation2 + $0x34c] sm:$0xf]  ;;  %v3878_v23 = vor.u32 %v5344_v16, %v3875_v17  ;;  %v3889_v16 = vld [vmem:[#allocation2 + $0x58] sm:$0xf] }
 0x2bb   :  { %1960 = vmatpush.bf16.msra.mxu0 %v3862_v45  ;;  %1985 = vmatpush.bf16.msra.mxu2 %v4254_v21  ;;  %v3993_v45 = vld [vmem:[#allocation2 + $0x140] sm:$0xf]  ;;  %v4262_v46 = vor.u32 %v5440_v37, %v4259_v39  ;;  %v5521_v37 = vld [vmem:[#allocation2 + $0x5cc] sm:$0xf0] }
 0x2bc   :  { %2001 = vmatpush.bf16.msra.mxu3 %v4002_v18  ;;  %v5391_v21 = vld [vmem:[#allocation2 + $0x1bc] sm:$0xf0]  ;;  %v4522_v39 = vor.u32 %v5521_v37, %v4521_v35  ;;  %v4667_v35 = vld [vmem:[#allocation2 + $0x6e0] sm:$0xf0]  ;;  %v4009_v37 = vld [vmem:[#allocation2 + $0x150] sm:$0xf] }
 0x2bd   :  { %v3994_v50 = vor.u32 %v5391_v21, %v3993_v45  ;;  %v4139_v45 = vld [vmem:[#allocation2 + $0x2d0] sm:$0xf0]  ;;  %v5538_v21 = vld [vmem:[#allocation2 + $0x65c] sm:$0xf] }
 0x2be   :  { %1969 = vmatpush.bf16.msra.mxu1 %v4506_v49  ;;  %1961 = vmatmul.bf16.vlgmr.msra.gmra.mxu0 %v6038_v7  ;;  %v5408_v49 = vld [vmem:[#allocation2 + $0x24c] sm:$0xf] }
 0x2bf   :  { %2009 = vmatpush.bf16.msrb.mxu0 %v4774_v36  ;;  %1986 = vmatpush.bf16.msra.mxu2 %v4126_v58  ;;  %v4654_v36 = vor.u32 %v5537_v41, %v4651_v42  ;;  %v5359_v58 = vld [vmem:[#allocation2 + $0xbc] sm:$0xf0]  ;;  %v4134_v62 = vor.u32 %v5408_v49, %v4131_v51  ;;  %v5458_v41 = vld [vmem:[#allocation2 + $0x3d4] sm:$0xf0] }
 0x2c0   :  { %2002 = vmatpush.bf16.msra.mxu3 %v3874_v44  ;;  %v3866_v3 = vor.u32 %v5359_v58, %v3865_v57  ;;  %v5409_v44 = vld [vmem:[#allocation2 + $0x254] sm:$0xf]  ;;  %v4145_v49 = vld [vmem:[#allocation2 + $0x258] sm:$0xf]  ;;  %v5506_v58 = vld [vmem:[#allocation2 + $0x55c] sm:$0xf] }
 0x2c1   :  { %v5426_v51 = vld [vmem:[#allocation2 + $0x2d4] sm:$0xf0]  ;;  %v4011_v57 = vld [vmem:[#allocation2 + $0x1d0] sm:$0xf0] }
 0x2c2   :  { %1970 = vmatpush.bf16.msra.mxu1 %v4378_v1  ;;  %v4529_v1 = vld [vmem:[#allocation2 + $0x558] sm:$0xf]  ;;  %v4146_v53 = vor.u32 %v5426_v51, %v4145_v49  ;;  %v3881_v49 = vld [vmem:[#allocation2 + $0x50] sm:$0xf]  ;;  %v4793_v51 = vld [vmem:[#allocation2 + $0x760] sm:$0xf] }
 0x2c3   :  { %2010 = vmatpush.bf16.msrb.mxu0 %v4646_v61  ;;  %1987 = vmatpush.bf16.msra.mxu2 %v3998_v8  ;;  %v5585_v61 = vld [vmem:[#allocation2 + $0x7cc] sm:$0xf0]  ;;  %v5473_v8 = vld [vmem:[#allocation2 + $0x454] sm:$0xf]  ;;  %v4530_v9 = vor.u32 %v5522_v2, %v4529_v1  ;;  %v4017_v1 = vld [vmem:[#allocation2 + $0x158] sm:$0xf] }
 0x2c4   :  { %2051 = vmatpush.bf16.msrb.mxu3 %v4786_v34  ;;  %v4778_v6 = vor.u32 %v5585_v61, %v4777_v60  ;;  %v4398_v15 = vor.u32 %v5473_v8, %v4395_v63  ;;  %v4142_v34 = vor.u32 %v5409_v44, %v4139_v45  ;;  %v4531_v60 = vld [vmem:[#allocation2 + $0x5d8] sm:$0xf0]  ;;  %v5556_v44 = vld [vmem:[#allocation2 + $0x6e4] sm:$0xf0] }
 0x2c5   :  { %2003 = vmatmul.bf16.vlgmr.msra.gmra.mxu3 %v6038_v7  ;;  %v4534_v61 = vor.u32 %v5506_v58, %v4531_v60  ;;  %v5474_v8 = vld [vmem:[#allocation2 + $0x45c] sm:$0xf]  ;;  %v5524_v58 = vld [vmem:[#allocation2 + $0x5e4] sm:$0xf0] }
 0x2c6   :  { %1971 = vmatpush.bf16.msra.mxu1 %v4250_v13  ;;  %v5490_v13 = vld [vmem:[#allocation2 + $0x4d4] sm:$0xf0]  ;;  %v5410_v45 = vld [vmem:[#allocation2 + $0x25c] sm:$0xf] }
 0x2c7   :  { %2011 = vmatpush.bf16.msrb.mxu0 %v4518_v10  ;;  %1988 = vmatpush.bf16.msra.mxu2 %v3870_v27  ;;  %v4649_v10 = vld [vmem:[#allocation2 + $0x650] sm:$0xf]  ;;  %v4402_v20 = vor.u32 %v5490_v13, %v4401_v12  ;;  %v5441_v27 = vld [vmem:[#allocation2 + $0x354] sm:$0xf]  ;;  %v5378_v60 = vld [vmem:[#allocation2 + $0x15c] sm:$0xf] }
 0x2c8   :  { %2052 = vmatpush.bf16.msrb.mxu3 %v4658_v59  ;;  %v4650_v18 = vor.u32 %v5553_v19, %v4649_v10  ;;  %v4014_v59 = vor.u32 %v5377_v55, %v4011_v57  ;;  %v5571_v10 = vld [vmem:[#allocation2 + $0x764] sm:$0xf]  ;;  %v4137_v13 = vld [vmem:[#allocation2 + $0x250] sm:$0xf]  ;;  %v5587_v55 = vld [vmem:[#allocation2 + $0x7dc] sm:$0xf0] }
 0x2c9   :  { %v4795_v19 = vld [vmem:[#allocation2 + $0x7e0] sm:$0xf0]  ;;  %v4545_v57 = vld [vmem:[#allocation2 + $0x568] sm:$0xf] }
 0x2ca   :  { %1972 = vmatpush.bf16.msra.mxu1 %v4122_v38  ;;  %1989 = vmatmul.bf16.vlgmr.msra.gmra.mxu2 %v6038_v7  ;;  %v4273_v38 = vld [vmem:[#allocation2 + $0x358] sm:$0xf]  ;;  %v4798_v12 = vor.u32 %v5571_v10, %v4795_v19  ;;  %v5443_v10 = vld [vmem:[#allocation2 + $0x364] sm:$0xf] }
 0x2cb   :  { %2012 = vmatpush.bf16.msrb.mxu0 %v4390_v31  ;;  %2037 = vmatpush.bf16.msrb.mxu2 %v4782_v32  ;;  %v4270_v31 = vor.u32 %v5441_v27, %v4267_v28  ;;  %v4787_v32 = vld [vmem:[#allocation2 + $0x7d8] sm:$0xf0]  ;;  %v4274_v42 = vor.u32 %v5458_v41, %v4273_v38  ;;  %v5393_v38 = vld [vmem:[#allocation2 + $0x1cc] sm:$0xf0] }
 0x2cc   :  { %2053 = vmatpush.bf16.msrb.mxu3 %v4530_v9  ;;  %v4790_v33 = vor.u32 %v5570_v29, %v4787_v32  ;;  %v4403_v9 = vld [vmem:[#allocation2 + $0x4d8] sm:$0xf0]  ;;  %v5539_v32 = vld [vmem:[#allocation2 + $0x664] sm:$0xf]  ;;  %v4010_v41 = vor.u32 %v5393_v38, %v4009_v37  ;;  %v4675_v38 = vld [vmem:[#allocation2 + $0x6e8] sm:$0xf0] }
 0x2cd   :  { %v5442_v29 = vld [vmem:[#allocation2 + $0x35c] sm:$0xf] }
 0x2ce   :  { %1973 = vmatpush.bf16.msra.mxu1 %v3994_v50  ;;  %v4394_v50 = vor.u32 %v5489_v48, %v4393_v47 }
 0x2cf   :  { %2013 = vmatpush.bf16.msrb.mxu0 %v4262_v46  ;;  %2038 = vmatpush.bf16.msrb.mxu2 %v4654_v36  ;;  %v4659_v46 = vld [vmem:[#allocation2 + $0x6d8] sm:$0xf0] }
 0x2d0   :  { %2054 = vmatpush.bf16.msrb.mxu3 %v4402_v20  ;;  %v4662_v36 = vor.u32 %v5538_v21, %v4659_v46  ;;  %v4801_v20 = vld [vmem:[#allocation2 + $0x768] sm:$0xf]  ;;  %v5507_v46 = vld [vmem:[#allocation2 + $0x564] sm:$0xf] }
 0x2d2   :  { %1974 = vmatpush.bf16.msra.mxu1 %v3866_v3  ;;  %v5394_v3 = vld [vmem:[#allocation2 + $0x1d4] sm:$0xf0] }
 0x2d3   :  { %2014 = vmatpush.bf16.msrb.mxu0 %v4134_v62  ;;  %2039 = vmatpush.bf16.msrb.mxu2 %v4526_v0  ;;  %v4265_v62 = vld [vmem:[#allocation2 + $0x350] sm:$0xf]  ;;  %v4018_v40 = vor.u32 %v5394_v3, %v4017_v1  ;;  %v4411_v1 = vld [vmem:[#allocation2 + $0x4e0] sm:$0xf0]  ;;  %v5555_v3 = vld [vmem:[#allocation2 + $0x6dc] sm:$0xf0] }
 0x2d4   :  { %2055 = vmatpush.bf16.msrb.mxu3 %v4274_v42  ;;  %v5457_v0 = vld [vmem:[#allocation2 + $0x3cc] sm:$0xf0]  ;;  %v4673_v42 = vld [vmem:[#allocation2 + $0x668] sm:$0xf] }
 0x2d5   :  { %1975 = vmatmul.bf16.vlgmr.msra.gmra.mxu1 %v6038_v7  ;;  %v4266_v2 = vor.u32 %v5457_v0, %v4265_v62  ;;  %v4674_v21 = vor.u32 %v5556_v44, %v4673_v42  ;;  %v5475_v62 = vld [vmem:[#allocation2 + $0x464] sm:$0xf]  ;;  %v4546_v0 = vor.u32 %v5524_v58, %v4545_v57  ;;  %v4161_v42 = vld [vmem:[#allocation2 + $0x268] sm:$0xf] }
 0x2d6   :  { %2023 = vmatpush.bf16.msrb.mxu1 %v4778_v6  ;;  %v3883_v6 = vld [vmem:[#allocation2 + $0xd0] sm:$0xf0]  ;;  %v5428_v44 = vld [vmem:[#allocation2 + $0x2e4] sm:$0xf0] }
 0x2d7   :  { %2015 = vmatpush.bf16.msrb.mxu0 %v4006_v11  ;;  %2040 = vmatpush.bf16.msrb.mxu2 %v4398_v15  ;;  %v3886_v63 = vor.u32 %v5345_v5, %v3883_v6  ;;  %v4406_v11 = vor.u32 %v5474_v8, %v4403_v9  ;;  %v5425_v15 = vld [vmem:[#allocation2 + $0x2cc] sm:$0xf0]  ;;  %v4417_v5 = vld [vmem:[#allocation2 + $0x468] sm:$0xf]  ;;  %v4414_v8 = vor.u32 %v5475_v62, %v4411_v1  ;;  %v3891_v9 = vld [vmem:[#allocation2 + $0xd8] sm:$0xf0] }
 0x2d8   :  { %2056 = vmatpush.bf16.msrb.mxu3 %v4146_v53  ;;  %v4138_v17 = vor.u32 %v5425_v15, %v4137_v13  ;;  %v5492_v6 = vld [vmem:[#allocation2 + $0x4e4] sm:$0xf0]  ;;  %v4803_v13 = vld [vmem:[#allocation2 + $0x7e8] sm:$0xf0] }
 0x2d9   :  { %v4418_v15 = vor.u32 %v5492_v6, %v4417_v5  ;;  %v4033_v57 = vld [vmem:[#allocation2 + $0x168] sm:$0xf]  ;;  %v5476_v1 = vld [vmem:[#allocation2 + $0x46c] sm:$0xf]  ;;  %v4811_v5 = vld [vmem:[#allocation2 + $0x7f0] sm:$0xf0] }
 0x2da   :  { %2024 = vmatpush.bf16.msrb.mxu1 %v4650_v18  ;;  %v5362_v18 = vld [vmem:[#allocation2 + $0xd4] sm:$0xf0]  ;;  %v5396_v58 = vld [vmem:[#allocation2 + $0x1e4] sm:$0xf0]  ;;  %v4153_v6 = vld [vmem:[#allocation2 + $0x260] sm:$0xf] }
 0x2db   :  { %2016 = vmatpush.bf16.msrb.mxu0 %v3878_v23  ;;  %2041 = vmatpush.bf16.msrb.mxu2 %v4270_v31  ;;  %v5588_v23 = vld [vmem:[#allocation2 + $0x7e4] sm:$0xf0]  ;;  %v3890_v27 = vor.u32 %v5362_v18, %v3889_v16  ;;  %v4275_v31 = vld [vmem:[#allocation2 + $0x3d8] sm:$0xf0]  ;;  %v4537_v16 = vld [vmem:[#allocation2 + $0x560] sm:$0xf] }
 0x2dc   :  { %2057 = vmatpush.bf16.msrb.mxu3 %v4018_v40  ;;  %v4802_v28 = vor.u32 %v5588_v23, %v4801_v20  ;;  %v4289_v20 = vld [vmem:[#allocation2 + $0x368] sm:$0xf] }
 0x2dd   :  { %v5460_v23 = vld [vmem:[#allocation2 + $0x3e4] sm:$0xf0] }
 0x2de   :  { %2025 = vmatpush.bf16.msrb.mxu1 %v4522_v39  ;;  %2017 = vmatmul.bf16.vlgmr.msrb.gmra.mxu0 %v6038_v7  ;;  %v4670_v39 = vor.u32 %v5539_v32, %v4667_v35  ;;  %v5411_v32 = vld [vmem:[#allocation2 + $0x264] sm:$0xf]  ;;  %v5540_v35 = vld [vmem:[#allocation2 + $0x66c] sm:$0xf]  ;;  %v4290_v37 = vor.u32 %v5460_v23, %v4289_v20  ;;  %v5541_v23 = vld [vmem:[#allocation2 + $0x674] sm:$0xf] }
 0x2df   :  { %2065 = vmatpush.bf16.msra.mxu0 %v4790_v33  ;;  %2042 = vmatpush.bf16.msrb.mxu2 %v4142_v34  ;;  %v4278_v33 = vor.u32 %v5442_v29, %v4275_v31  ;;  %v4147_v34 = vld [vmem:[#allocation2 + $0x2d8] sm:$0xf0]  ;;  %v4291_v20 = vld [vmem:[#allocation2 + $0x3e8] sm:$0xf0] }
 0x2e0   :  { %2058 = vmatpush.bf16.msrb.mxu3 %v3890_v27  ;;  %v4150_v47 = vor.u32 %v5410_v45, %v4147_v34  ;;  %v150_v27 = vand.u32 65535, %v6140_v4  ;;  %v4678_v34 = vor.u32 %v5540_v35, %v4675_v38  ;;  %v5558_v35 = vld [vmem:[#allocation2 + $0x6f4] sm:$0xf0]  ;;  %v5412_v38 = vld [vmem:[#allocation2 + $0x26c] sm:$0xf] }
 0x2e2   :  { %2026 = vmatpush.bf16.msrb.mxu1 %v4394_v50  ;;  %v5361_v50 = vld [vmem:[#allocation2 + $0xcc] sm:$0xf0] }
 0x2e3   :  { %2066 = vmatpush.bf16.msra.mxu0 %v4662_v36  ;;  %2043 = vmatpush.bf16.msrb.mxu2 %v4014_v59  ;;  %v4539_v36 = vld [vmem:[#allocation2 + $0x5e0] sm:$0xf0]  ;;  %v3882_v53 = vor.u32 %v5361_v50, %v3881_v49  ;;  %v4794_v59 = vor.u32 %v5587_v55, %v4793_v51  ;;  %v4162_v49 = vor.u32 %v5428_v44, %v4161_v42  ;;  %v4547_v50 = vld [vmem:[#allocation2 + $0x5e8] sm:$0xf0]  ;;  %v4281_v51 = vld [vmem:[#allocation2 + $0x360] sm:$0xf] }
 0x2e4   :  { %2107 = vmatpush.bf16.msra.mxu3 %v4802_v28  ;;  %v4542_v48 = vor.u32 %v5507_v46, %v4539_v36  ;;  %v5379_v36 = vld [vmem:[#allocation2 + $0x164] sm:$0xf]  ;;  %v5509_v42 = vld [vmem:[#allocation2 + $0x574] sm:$0xf] }
 0x2e5   :  { %2059 = vmatmul.bf16.vlgmr.msrb.gmra.mxu3 %v6038_v7  ;;  %v4555_v44 = vld [vmem:[#allocation2 + $0x5f0] sm:$0xf0] }
 0x2e6   :  { %2027 = vmatpush.bf16.msrb.mxu1 %v4266_v2  ;;  %v4665_v2 = vld [vmem:[#allocation2 + $0x660] sm:$0xf] }
 0x2e7   :  { %2067 = vmatpush.bf16.msra.mxu0 %v4534_v61  ;;  %2044 = vmatpush.bf16.msrb.mxu2 %v3886_v63  ;;  %v4019_v61 = vld [vmem:[#allocation2 + $0x1d8] sm:$0xf0]  ;;  %v4666_v19 = vor.u32 %v5555_v3, %v4665_v2  ;;  %v4419_v2 = vld [vmem:[#allocation2 + $0x4e8] sm:$0xf0]  ;;  %v4034_v3 = vor.u32 %v5396_v58, %v4033_v57 }
 0x2e8   :  { %2108 = vmatpush.bf16.msra.mxu3 %v4674_v21  ;;  %v4022_v40 = vor.u32 %v5378_v60, %v4019_v61  ;;  %v5346_v63 = vld [vmem:[#allocation2 + $0x5c] sm:$0xf]  ;;  %v152_v21 = vcvt.s32.f32 %v150_v27  ;;  %v5347_v61 = vld [vmem:[#allocation2 + $0x64] sm:$0xf]  ;;  %v4683_v27 = vld [vmem:[#allocation2 + $0x6f0] sm:$0xf0] }
 0x2e9   :  { %v3894_v18 = vor.u32 %v5346_v63, %v3891_v9  ;;  %v3905_v63 = vld [vmem:[#allocation2 + $0x68] sm:$0xf] }
 0x2ea   :  { %2028 = vmatpush.bf16.msrb.mxu1 %v4138_v17  ;;  %2045 = vmatmul.bf16.vlgmr.msrb.gmra.mxu2 %v6038_v7  ;;  %v5523_v17 = vld [vmem:[#allocation2 + $0x5dc] sm:$0xf0]  ;;  %v5364_v9 = vld [vmem:[#allocation2 + $0xe4] sm:$0xf0] }
 0x2eb   :  { %2068 = vmatpush.bf16.msra.mxu0 %v4406_v11  ;;  %2093 = vmatpush.bf16.msra.mxu2 %v4798_v12  ;;  %v4283_v11 = vld [vmem:[#allocation2 + $0x3e0] sm:$0xf0]  ;;  %v5572_v12 = vld [vmem:[#allocation2 + $0x76c] sm:$0xf]  ;;  %v4538_v31 = vor.u32 %v5523_v17, %v4537_v16 }
 0x2ec   :  { %2109 = vmatpush.bf16.msra.mxu3 %v4546_v0  ;;  %v4286_v28 = vor.u32 %v5443_v10, %v4283_v11  ;;  %v4806_v29 = vor.u32 %v5572_v12, %v4803_v13  ;;  %v3899_v0 = vld [vmem:[#allocation2 + $0xe0] sm:$0xf0]  ;;  %v4817_v10 = vld [vmem:[#allocation2 + $0x778] sm:$0xf]  ;;  %v4422_v13 = vor.u32 %v5476_v1, %v4419_v2  ;;  %v5444_v16 = vld [vmem:[#allocation2 + $0x36c] sm:$0xf] }
 0x2ed   :  { %v5348_v2 = vld [vmem:[#allocation2 + $0x6c] sm:$0xf] }
 0x2ee   :  { %2029 = vmatpush.bf16.msrb.mxu1 %v4010_v41  ;;  %v5491_v41 = vld [vmem:[#allocation2 + $0x4dc] sm:$0xf0] }
 0x2ef   :  { %2069 = vmatpush.bf16.msra.mxu0 %v4278_v33  ;;  %2094 = vmatpush.bf16.msra.mxu2 %v4670_v39  ;;  %v4155_v33 = vld [vmem:[#allocation2 + $0x2e0] sm:$0xf0]  ;;  %v4409_v39 = vld [vmem:[#allocation2 + $0x460] sm:$0xf] }
 0x2f0   :  { %2110 = vmatpush.bf16.msra.mxu3 %v4418_v15  ;;  %v4158_v45 = vor.u32 %v5411_v32, %v4155_v33  ;;  %v4410_v46 = vor.u32 %v5491_v41, %v4409_v39  ;;  %v5395_v32 = vld [vmem:[#allocation2 + $0x1dc] sm:$0xf0]  ;;  %v4689_v33 = vld [vmem:[#allocation2 + $0x678] sm:$0xf]  ;;  %v4163_v41 = vld [vmem:[#allocation2 + $0x2e8] sm:$0xf0] }
 0x2f2   :  { %2030 = vmatpush.bf16.msrb.mxu1 %v3882_v53  ;;  %v5459_v53 = vld [vmem:[#allocation2 + $0x3dc] sm:$0xf0] }
 0x2f3   :  { %2070 = vmatpush.bf16.msra.mxu0 %v4150_v47  ;;  %2095 = vmatpush.bf16.msra.mxu2 %v4542_v48  ;;  %v4027_v47 = vld [vmem:[#allocation2 + $0x1e0] sm:$0xf0]  ;;  %v5508_v48 = vld [vmem:[#allocation2 + $0x56c] sm:$0xf] }
 0x2f4   :  { %2111 = vmatpush.bf16.msra.mxu3 %v4290_v37  ;;  %v4030_v60 = vor.u32 %v5379_v36, %v4027_v47  ;;  %v4550_v62 = vor.u32 %v5508_v48, %v4547_v50  ;;  %v4294_v37 = vor.u32 %v5444_v16, %v4291_v20  ;;  %v5589_v36 = vld [vmem:[#allocation2 + $0x7ec] sm:$0xf0]  ;;  %v4561_v47 = vld [vmem:[#allocation2 + $0x578] sm:$0xf]  ;;  %v4558_v50 = vor.u32 %v5509_v42, %v4555_v44  ;;  %v4171_v20 = vld [vmem:[#allocation2 + $0x2f0] sm:$0xf0] }
 0x2f5   :  { %2031 = vmatmul.bf16.vlgmr.msrb.gmra.mxu1 %v6038_v7  ;;  %v5526_v48 = vld [vmem:[#allocation2 + $0x5f4] sm:$0xf0]  ;;  %v5510_v44 = vld [vmem:[#allocation2 + $0x57c] sm:$0xf] }
 0x2f6   :  { %2079 = vmatpush.bf16.msra.mxu1 %v4794_v59  ;;  %v165_v59 = vand.u32 65535, %v6153_v43  ;;  %v3902_v43 = vor.u32 %v5347_v61, %v3899_v0  ;;  %v4562_v58 = vor.u32 %v5526_v48, %v4561_v47  ;;  %v4681_v61 = vld [vmem:[#allocation2 + $0x670] sm:$0xf]  ;;  %v5494_v0 = vld [vmem:[#allocation2 + $0x4f4] sm:$0xf0] }
 0x2f7   :  { %2071 = vmatpush.bf16.msra.mxu0 %v4022_v40  ;;  %2096 = vmatpush.bf16.msra.mxu2 %v4414_v8  ;;  %v5573_v40 = vld [vmem:[#allocation2 + $0x774] sm:$0xf]  ;;  %v5427_v8 = vld [vmem:[#allocation2 + $0x2dc] sm:$0xf0] }
 0x2f8   :  { %2112 = vmatpush.bf16.msra.mxu3 %v4162_v49  ;;  %v167_v12 = vcvt.s32.f32 %v165_v59  ;;  %v4814_v15 = vor.u32 %v5573_v40, %v4811_v5  ;;  %v4154_v17 = vor.u32 %v5427_v8, %v4153_v6  ;;  %v4166_v49 = vor.u32 %v5412_v38, %v4163_v41  ;;  %v5477_v59 = vld [vmem:[#allocation2 + $0x474] sm:$0xf]  ;;  %v3907_v40 = vld [vmem:[#allocation2 + $0xe8] sm:$0xf0] }
 0x2f9   :  { %v5445_v5 = vld [vmem:[#allocation2 + $0x374] sm:$0xf] }
 0x2fa   :  { %2080 = vmatpush.bf16.msra.mxu1 %v4666_v19  ;;  %v5590_v19 = vld [vmem:[#allocation2 + $0x7f4] sm:$0xf0]  ;;  %v4299_v6 = vld [vmem:[#allocation2 + $0x3f0] sm:$0xf0] }
 0x2fb   :  { %2072 = vmatpush.bf16.msra.mxu0 %v3894_v18  ;;  %2097 = vmatpush.bf16.msra.mxu2 %v4286_v28  ;;  %v3906_v18 = vor.u32 %v5364_v9, %v3905_v63  ;;  %v5574_v9 = vld [vmem:[#allocation2 + $0x77c] sm:$0xf]  ;;  %v4302_v16 = vor.u32 %v5445_v5, %v4299_v6  ;;  %v5397_v5 = vld [vmem:[#allocation2 + $0x1ec] sm:$0xf0] }
 0x2fc   :  { %2113 = vmatpush.bf16.msra.mxu3 %v4034_v3 }
 0x2fe   :  { %2081 = vmatpush.bf16.msra.mxu1 %v4538_v31  ;;  %2073 = vmatmul.bf16.vlgmr.msra.gmra.mxu0 %v6038_v7  ;;  %v4025_v31 = vld [vmem:[#allocation2 + $0x160] sm:$0xf] }
 0x2ff   :  { %2121 = vmatpush.bf16.msrb.mxu0 %v4806_v29  ;;  %2098 = vmatpush.bf16.msra.mxu2 %v4158_v45  ;;  %v4818_v29 = vor.u32 %v5590_v19, %v4817_v10  ;;  %v4026_v39 = vor.u32 %v5395_v32, %v4025_v31  ;;  %v4690_v45 = vor.u32 %v5558_v35, %v4689_v33  ;;  %v4553_v10 = vld [vmem:[#allocation2 + $0x570] sm:$0xf]  ;;  %v4177_v33 = vld [vmem:[#allocation2 + $0x278] sm:$0xf] }
 0x300   :  { %2114 = vmatpush.bf16.msra.mxu3 %v3906_v18  ;;  %v5525_v19 = vld [vmem:[#allocation2 + $0x5ec] sm:$0xf0]  ;;  %v5413_v18 = vld [vmem:[#allocation2 + $0x274] sm:$0xf]  ;;  %v5430_v35 = vld [vmem:[#allocation2 + $0x2f4] sm:$0xf0] }
 0x301   :  { %v4425_v31 = vld [vmem:[#allocation2 + $0x470] sm:$0xf]  ;;  %v4178_v42 = vor.u32 %v5430_v35, %v4177_v33  ;;  %v188_v33 = vsub.f32 %v6146_v26, %v6089_v30 }
 0x302   :  { %2082 = vmatpush.bf16.msra.mxu1 %v4410_v46  ;;  %v4809_v46 = vld [vmem:[#allocation2 + $0x770] sm:$0xf] }
 0x303   :  { %2122 = vmatpush.bf16.msrb.mxu0 %v4678_v34  ;;  %2099 = vmatpush.bf16.msra.mxu2 %v4030_v60  ;;  %v5363_v34 = vld [vmem:[#allocation2 + $0xdc] sm:$0xf0]  ;;  %v4810_v57 = vor.u32 %v5589_v36, %v4809_v46  ;;  %v4427_v60 = vld [vmem:[#allocation2 + $0x4f0] sm:$0xf0]  ;;  %v5493_v32 = vld [vmem:[#allocation2 + $0x4ec] sm:$0xf0] }
 0x304   :  { %2163 = vmatpush.bf16.msrb.mxu3 %v4818_v29  ;;  %v4430_v3 = vor.u32 %v5477_v59, %v4427_v60  ;;  %v4691_v29 = vld [vmem:[#allocation2 + $0x6f8] sm:$0xf0]  ;;  %v4426_v41 = vor.u32 %v5493_v32, %v4425_v31  ;;  %v4049_v46 = vld [vmem:[#allocation2 + $0x178] sm:$0xf]  ;;  %v5429_v59 = vld [vmem:[#allocation2 + $0x2ec] sm:$0xf0] }
 0x305   :  { %v6175_v4 = vpop.xlane.xlu2 %154  ;;  %2115 = vmatmul.bf16.vlgmr.msra.gmra.mxu3 %v6038_v7  ;;  %v5398_v36 = vld [vmem:[#allocation2 + $0x1f4] sm:$0xf0]  ;;  %v5976_v31 = vmov 0   ;;  %v191_v35 = vmul.f32 1.442695, %v188_v33  ;;  %v5981_v33 = vmov 7  }
 0x306   :  { %vm156_vm9 = vcmp.eq.f32.partialorder %v6143_v14, %v6175_v4  ;;  %v4282_v14 = vor.u32 %v5459_v53, %v4281_v51  ;;  %v5380_v53 = vld [vmem:[#allocation2 + $0x16c] sm:$0xf]  ;;  %v3921_v60 = vld [vmem:[#allocation2 + $0x78] sm:$0xf]  ;;  %5735 = vset.pattern.permute.xlu0 %v5976_v31  ;;  %5736 = vset.pattern.permute.xlu1 %v5976_v31  ;;  %v161_v26 = vcvt.f32.s32 %v6175_v4 }
 0x307   :  { %v157_v55 = vsel %vm156_vm9, %v152_v21, inf  ;;  %2123 = vmatpush.bf16.msrb.mxu0 %v4550_v62  ;;  %2100 = vmatpush.bf16.msra.mxu2 %v3902_v43  ;;  %v3897_v21 = vld [vmem:[#allocation2 + $0x60] sm:$0xf]  ;;  %v5557_v62 = vld [vmem:[#allocation2 + $0x6ec] sm:$0xf0]  ;;  %v5596_v31 = vld [vmem:[#allocation5 + $0x28] sm:$0xff] }
 0x308   :  { %158 = vmin.xlane.f32.xlu1 %v157_v55  ;;  %2083 = vmatpush.bf16.msra.mxu1 %v4282_v14  ;;  %v3898_v51 = vor.u32 %v5363_v34, %v3897_v21  ;;  %v4035_v55 = vld [vmem:[#allocation2 + $0x1e8] sm:$0xf0]  ;;  %v4433_v14 = vld [vmem:[#allocation2 + $0x478] sm:$0xf]  ;;  %v4682_v8 = vor.u32 %v5557_v62, %v4681_v61  ;;  %v4819_v43 = vld [vmem:[#allocation2 + $0x7f8] sm:$0xf0] }
 0x309   :  { %2164 = vmatpush.bf16.msrb.mxu3 %v4690_v45  ;;  %v4038_v1 = vor.u32 %v5380_v53, %v4035_v55  ;;  %v4434_v63 = vor.u32 %v5494_v0, %v4433_v14  ;;  %v4563_v45 = vld [vmem:[#allocation2 + $0x5f8] sm:$0xf0]  ;;  %v4297_v21 = vld [vmem:[#allocation2 + $0x370] sm:$0xf]  ;;  %v4050_v53 = vor.u32 %v5398_v36, %v4049_v46  ;;  %v5366_v61 = vld [vmem:[#allocation2 + $0xf4] sm:$0xf0] }
 0x30a   :  { %2101 = vmatmul.bf16.vlgmr.msra.gmra.mxu2 %v6038_v7  ;;  %v5461_v34 = vld [vmem:[#allocation2 + $0x3ec] sm:$0xf0]  ;;  %v4566_v48 = vor.u32 %v5510_v44, %v4563_v45  ;;  %v5478_v55 = vld [vmem:[#allocation2 + $0x47c] sm:$0xf] }
 0x30b   :  { %2124 = vmatpush.bf16.msrb.mxu0 %v4422_v13  ;;  %2149 = vmatpush.bf16.msrb.mxu2 %v4814_v15  ;;  %v5462_v13 = vld [vmem:[#allocation2 + $0x3f4] sm:$0xf0]  ;;  %v3910_v15 = vor.u32 %v5348_v2, %v3907_v40  ;;  %v5446_v2 = vld [vmem:[#allocation2 + $0x37c] sm:$0xf]  ;;  %v4041_v40 = vld [vmem:[#allocation2 + $0x170] sm:$0xf] }
 0x30c   :  { %2084 = vmatpush.bf16.msra.mxu1 %v4154_v17  ;;  %v4822_v17 = vor.u32 %v5574_v9, %v4819_v43  ;;  %v4179_v9 = vld [vmem:[#allocation2 + $0x2f8] sm:$0xf0]  ;;  %v3913_v43 = vld [vmem:[#allocation2 + $0x70] sm:$0xf] }
 0x30d   :  { %v6181_v11 = vpop.xlane.xlu0 %169  ;;  %2165 = vmatpush.bf16.msrb.mxu3 %v4562_v58  ;;  %v4169_v58 = vld [vmem:[#allocation2 + $0x270] sm:$0xf] }
 0x30e   :  { %vm171_vm10 = vcmp.eq.f32.partialorder %v6156_v54, %v6181_v11  ;;  %v4686_v54 = vor.u32 %v5541_v23, %v4683_v27  ;;  %v4554_v23 = vor.u32 %v5525_v19, %v4553_v10  ;;  %v4170_v0 = vor.u32 %v5429_v59, %v4169_v58  ;;  %v5365_v10 = vld [vmem:[#allocation2 + $0xec] sm:$0xf0] }
 0x30f   :  { %v172_v28 = vsel %vm171_vm10, %v167_v12, inf  ;;  %2125 = vmatpush.bf16.msrb.mxu0 %v4294_v37  ;;  %v4305_v12 = vld [vmem:[#allocation2 + $0x378] sm:$0xf]  ;;  %v4174_v37 = vor.u32 %v5413_v18, %v4171_v20  ;;  %v3923_v18 = vld [vmem:[#allocation2 + $0xf8] sm:$0xf0] }
 0x310   :  { %173 = vmin.xlane.f32.xlu2 %v172_v28  ;;  %2150 = vmatpush.bf16.msrb.mxu2 %v4686_v54  ;;  %v4306_v27 = vor.u32 %v5462_v13, %v4305_v12  ;;  %v5542_v28 = vld [vmem:[#allocation2 + $0x67c] sm:$0xf]  ;;  %v5381_v54 = vld [vmem:[#allocation2 + $0x174] sm:$0xf]  ;;  %v3914_v12 = vor.u32 %v5365_v10, %v3913_v43 }
 0x311   :  { %2085 = vmatpush.bf16.msra.mxu1 %v4026_v39  ;;  %2166 = vmatpush.bf16.msrb.mxu3 %v4434_v63  ;;  %v4694_v38 = vor.u32 %v5542_v28, %v4691_v29  ;;  %v4043_v39 = vld [vmem:[#allocation2 + $0x1f0] sm:$0xf0]  ;;  %v5414_v63 = vld [vmem:[#allocation2 + $0x27c] sm:$0xf]  ;;  %v5975_v29 = vmov 1  }
 0x312   :  { %v4046_v47 = vor.u32 %v5381_v54, %v4043_v39  ;;  %v4182_v19 = vor.u32 %v5414_v63, %v4179_v9  ;;  %v5382_v13 = vld [vmem:[#allocation2 + $0x17c] sm:$0xf]  ;;  %5737 = vset.pattern.permute.xlu2 %v5975_v29  ;;  %v5979_v63 = vmov 6   ;;  %v5620_v29 = vld [vmem:[#allocation5 + $0xe8] sm:$0xff] }
 0x313   :  { %2126 = vmatpush.bf16.msrb.mxu0 %v4166_v49  ;;  %v5349_v49 = vld [vmem:[#allocation2 + $0x74] sm:$0xf]  ;;  %v5614_v9 = vld [vmem:[#allocation5 + $0xb8] sm:$0xff] }
 0x314   :  { %2151 = vmatpush.bf16.msrb.mxu2 %v4558_v50  ;;  %v3915_v50 = vld [vmem:[#allocation2 + $0xf0] sm:$0xf0]  ;;  %v5622_v43 = vld [vmem:[#allocation5 + $0xf8] sm:$0xff] }
 0x315   :  { %2086 = vmatpush.bf16.msra.mxu1 %v3898_v51  ;;  %2167 = vmatpush.bf16.msrb.mxu3 %v4306_v27  ;;  %v4298_v51 = vor.u32 %v5461_v34, %v4297_v21  ;;  %v3918_v62 = vor.u32 %v5349_v49, %v3915_v50  ;;  %v181_v27 = vsub.f32 %v6083_v25, %v6083_v25  ;;  %v5598_v10 = vld [vmem:[#allocation5 + $0x38] sm:$0xff] }
 0x317   :  { %2127 = vmatpush.bf16.msrb.mxu0 %v4038_v1  ;;  %v3922_v1 = vor.u32 %v5366_v61, %v3921_v60  ;;  %v183_v32 = vmul.f32 1.442695, %v181_v27 }
 0x318   :  { %2087 = vmatmul.bf16.vlgmr.msra.gmra.mxu1 %v6038_v7  ;;  %2152 = vmatpush.bf16.msrb.mxu2 %v4430_v3  ;;  %v4307_v3 = vld [vmem:[#allocation2 + $0x3f8] sm:$0xf0] }
 0x319   :  { %2135 = vmatpush.bf16.msrb.mxu1 %v4810_v57  ;;  %2168 = vmatpush.bf16.msrb.mxu3 %v4178_v42  ;;  %v4435_v57 = vld [vmem:[#allocation2 + $0x4f8] sm:$0xf0]  ;;  %v4310_v6 = vor.u32 %v5446_v2, %v4307_v3  ;;  %v6203_v42 = vpop.f32.mrf.mxu1 }
 0x31a   :  { %v4438_v14 = vor.u32 %v5478_v55, %v4435_v57 }
 0x31b   :  { %2128 = vmatpush.bf16.msrb.mxu0 %v3910_v15  ;;  %v4051_v15 = vld [vmem:[#allocation2 + $0x1f8] sm:$0xf0] }
 0x31c   :  { %2153 = vmatpush.bf16.msrb.mxu2 %v4302_v16  ;;  %v4054_v16 = vor.u32 %v5382_v13, %v4051_v15  ;;  %v5613_v15 = vld [vmem:[#allocation5 + $0xb0] sm:$0xff] }
 0x31d   :  { %2136 = vmatpush.bf16.msrb.mxu1 %v4682_v8  ;;  %2169 = vmatpush.bf16.msrb.mxu3 %v4050_v53  ;;  %v4042_v8 = vor.u32 %v5397_v5, %v4041_v40  ;;  %v5977_v40 = vmov 3  }
 0x31e   :  { %2129 = vmatmul.bf16.vlgmr.msrb.gmra.mxu0 %v6038_v7 }
 0x31f   :  { %2177 = vmatpush.bf16.msra.mxu0 %v4822_v17  ;;  %v5350_v17 = vld [vmem:[#allocation2 + $0x7c] sm:$0xf] }
 0x320   :  { %2154 = vmatpush.bf16.msrb.mxu2 %v4174_v37  ;;  %v3926_v20 = vor.u32 %v5350_v17, %v3923_v18  ;;  %v5597_v17 = vld [vmem:[#allocation5 + $0x30] sm:$0xff] }
 0x321   :  { %2137 = vmatpush.bf16.msrb.mxu1 %v4554_v23  ;;  %2170 = vmatpush.bf16.msrb.mxu3 %v3922_v1  ;;  %v187_v23 = vsub.f32 %v6133_v56, %v6083_v25  ;;  %v6210_v50 = vpop.f32.mrf.mxu1  ;;  %v5605_v18 = vld [vmem:[#allocation5 + $0x70] sm:$0xff] }
 0x323   :  { %2178 = vmatpush.bf16.msra.mxu0 %v4694_v38  ;;  %v189_v28 = vmul.f32 1.442695, %v187_v23 }
 0x324   :  { %2155 = vmatpush.bf16.msrb.mxu2 %v4046_v47  ;;  %2171 = vmatmul.bf16.vlgmr.msrb.gmra.mxu3 %v6038_v7 }
 0x325   :  { %2138 = vmatpush.bf16.msrb.mxu1 %v4426_v41  ;;  %5751 = vpow2.f32 %v189_v28  ;;  %v6201_v41 = vpop.f32.mrf.mxu2  ;;  %3581 = vmatpush.bf16.msra.mxu3 %v5614_v9  ;;  %v5612_v28 = vld [vmem:[#allocation5 + $0xa8] sm:$0xff] }
 0x326   :  { %5753 = vpow2.f32 %v183_v32  ;;  %v5604_v32 = vld [vmem:[#allocation5 + $0x68] sm:$0xff] }
 0x327   :  { %2179 = vmatpush.bf16.msra.mxu0 %v4566_v48  ;;  %5755 = vpow2.f32 %v191_v35  ;;  %v176_v48 = vcvt.f32.s32 %v6181_v11  ;;  %v5619_v35 = vld [vmem:[#allocation5 + $0xe0] sm:$0xff]  ;;  %v5592_v9 = vld [vmem:[#allocation5 + $0x8] sm:$0xff] }
 0x328   :  { %2156 = vmatpush.bf16.msrb.mxu2 %v3918_v62  ;;  %v6219_v62 = vpop.f32.mrf.mxu3 }
 0x329   :  { %2139 = vmatpush.bf16.msrb.mxu1 %v4298_v51  ;;  %v177_v58 = vshll.u32 %v176_v48, 16  ;;  %v6231_v3 = vpop.f32.mrf.mxu1  ;;  %3582 = vmatpush.bf16.msra.mxu3 %v5613_v15 }
 0x32b   :  { %2180 = vmatpush.bf16.msra.mxu0 %v4438_v14  ;;  %2157 = vmatmul.bf16.vlgmr.msrb.gmra.mxu2 %v6038_v7  ;;  %v5752_v56 = vpop.eup %5751  ;;  %v6221_v14 = vpop.f32.mrf.mxu0 }
 0x32c   :  { %v5754_v38 = vpop.eup %5753 }
 0x32d   :  { %2140 = vmatpush.bf16.msrb.mxu1 %v4170_v0  ;;  %v193_v25 = vadd.f32 %v5754_v38, %v5752_v56  ;;  %v5756_v54 = vpop.eup %5755  ;;  %v6208_v49 = vpop.f32.mrf.mxu2  ;;  %3583 = vmatpush.bf16.msra.mxu3 %v5612_v28 }
 0x32f   :  { %2181 = vmatpush.bf16.msra.mxu0 %v4310_v6 }
 0x330   :  { %v6236_v5 = vpop.f32.mrf.mxu3 }
 0x331   :  { %2141 = vmatpush.bf16.msrb.mxu1 %v4042_v8  ;;  %v6242_v8 = vpop.f32.mrf.mxu1 }
 0x333   :  { %2182 = vmatpush.bf16.msra.mxu0 %v4182_v19  ;;  %v6238_v6 = vpop.f32.mrf.mxu0  ;;  %v5606_v19 = vld [vmem:[#allocation5 + $0x78] sm:$0xff] }
 0x334   :  { %3567 = vmatpush.bf16.msra.mxu2 %v5606_v19  ;;  %v5645_v19 = vld [vmem:[#allocation5 + $0x1b0] sm:$0xff] }
 0x335   :  { %2142 = vmatpush.bf16.msrb.mxu1 %v3914_v12  ;;  %v6229_v2 = vpop.f32.mrf.mxu2 }
 0x337   :  { %2183 = vmatpush.bf16.msra.mxu0 %v4054_v16  ;;  %v5621_v16 = vld [vmem:[#allocation5 + $0xf0] sm:$0xff] }
 0x338   :  { %2143 = vmatmul.bf16.vlgmr.msrb.gmra.mxu1 %v6038_v7  ;;  %v6248_v12 = vpop.f32.mrf.mxu3  ;;  %3568 = vmatpush.bf16.msra.mxu2 %v5605_v18  ;;  %v2210_v18 = vsub.f32 0.0, %v6238_v6 }
 0x339   :  { %3553 = vmatpush.bf16.msra.mxu1 %v5598_v10  ;;  %v6254_v27 = vpop.f32.mrf.mxu1  ;;  %v2209_v10 = vsub.f32 0.0, %v6236_v5 }
 0x33b   :  { %2184 = vmatpush.bf16.msra.mxu0 %v3926_v20  ;;  %v6250_v13 = vpop.f32.mrf.mxu0  ;;  %v5980_v20 = vmov 4  }
 0x33c   :  { %3569 = vmatpush.bf16.msra.mxu2 %v5604_v32  ;;  %v2261_v32 = vmul.f32 1.442695, %v2210_v18 }
 0x33d   :  { %v6240_v22 = vpop.f32.mrf.mxu2  ;;  %3554 = vmatpush.bf16.msra.mxu1 %v5597_v17  ;;  %v5599_v17 = vld [vmem:[#allocation5 + $0x40] sm:$0xff] }
 0x33e   :  { %2185 = vmatmul.bf16.vlgmr.msra.gmra.mxu0 %v6038_v7  ;;  %v182_v7 = vsub.f32 %v6089_v30, %v6089_v30  ;;  %v162_v30 = vshll.u32 %v161_v26, 16  ;;  %v5610_v26 = vld [vmem:[#allocation5 + $0x98] sm:$0xff] }
 0x33f   :  { %3595 = vmatpush.bf16.msrb.mxu0 %v5622_v43  ;;  %v5600_v43 = vld [vmem:[#allocation5 + $0x48] sm:$0xff] }
 0x340   :  { %v185_v37 = vmul.f32 1.442695, %v182_v7  ;;  %v5611_v7 = vld [vmem:[#allocation5 + $0xa0] sm:$0xff] }
 0x341   :  { %3555 = vmatpush.bf16.msra.mxu1 %v5596_v31  ;;  %3584 = vmatpush.bf16.msra.mxu3 %v5611_v7 }
 0x342   :  { %5757 = vpow2.f32 %v185_v37 }
 0x343   :  { %5759 = vrcp.f32 %v193_v25  ;;  %3596 = vmatpush.bf16.msrb.mxu0 %v5621_v16  ;;  %v6260_v37 = vpop.f32.mrf.mxu0  ;;  %v5603_v25 = vld [vmem:[#allocation5 + $0x60] sm:$0xff] }
 0x344   :  { %6535 = vst [vmem:[#allocation12_spill] sm:$0xff] %v6260_v37  ;;  %3570 = vmatpush.bf16.msra.mxu2 %v5603_v25  ;;  %v5591_v16 = vld [vmem:[#allocation5] sm:$0xff]  ;;  %v5630_v25 = vld [vmem:[#allocation5 + $0x138] sm:$0xff] }
 0x345   :  { %v6252_v23 = vpop.f32.mrf.mxu2  ;;  %3585 = vmatpush.bf16.msra.mxu3 %v5610_v26  ;;  %v5644_v26 = vld [vmem:[#allocation5 + $0x1a8] sm:$0xff] }
 0x346   :  { %6534 = vst [vmem:[#allocation11_spill] sm:$0xff] %v6252_v23 }
 0x347   :  { %3597 = vmatpush.bf16.msrb.mxu0 %v5620_v29  ;;  %v2259_v29 = vmul.f32 1.442695, %v2209_v10  ;;  %v5628_v10 = vld [vmem:[#allocation5 + $0x128] sm:$0xff] }
 0x348   :  { %v5758_v39 = vpop.eup %5757 }
 0x349   :  { %v194_v44 = vadd.f32 %v5758_v39, %v5756_v54  ;;  %v5760_v45 = vpop.eup %5759 }
 0x34a   :  { %v197_v46 = vmul.f32 %v5760_v45, %v5754_v38  ;;  %v201_v47 = vmul.f32 %v5760_v45, %v5752_v56  ;;  %v6258_v56 = vpop.f32.mrf.mxu3  ;;  %v5595_v38 = vld [vmem:[#allocation5 + $0x20] sm:$0xff]  ;;  %v5618_v45 = vld [vmem:[#allocation5 + $0xd8] sm:$0xff] }
 0x34b   :  { %5761 = vrcp.f32 %v194_v44  ;;  %v6266_v44 = vpop.f32.mrf.mxu1  ;;  %3598 = vmatpush.bf16.msrb.mxu0 %v5619_v35  ;;  %3556 = vmatpush.bf16.msra.mxu1 %v5595_v38  ;;  %v2192_v35 = vsub.f32 0.0, %v6201_v41  ;;  %v2191_v38 = vsub.f32 0.0, %v6203_v42 }
 0x34c   :  { %v199_v4 = vsel %vm135_vm5, %v197_v46, 0.0  ;;  %v5617_v46 = vld [vmem:[#allocation5 + $0xd0] sm:$0xff] }
 0x34f   :  { %3599 = vmatpush.bf16.msrb.mxu0 %v5618_v45  ;;  %v2208_v45 = vsub.f32 0.0, %v6208_v49 }
 0x351   :  { %v5762_v53 = vpop.eup %5761 }
 0x352   :  { %v198_v11 = vmul.f32 %v5762_v53, %v5758_v39  ;;  %v202_v61 = vmul.f32 %v5762_v53, %v5756_v54  ;;  %v5982_v54 = vmov 5   ;;  %v6264_v39 = vpop.f32.mrf.mxu2  ;;  %v6268_v48 = vpop.f32.mrf.mxu3  ;;  %v5616_v53 = vld [vmem:[#allocation5 + $0xc8] sm:$0xff] }
 0x353   :  { %3600 = vmatpush.bf16.msrb.mxu0 %v5617_v46 }
 0x354   :  { %v200_v52 = vsel %vm136_vm6, %v198_v11, 0.0  ;;  %v5615_v11 = vld [vmem:[#allocation5 + $0xc0] sm:$0xff] }
 0x357   :  { %3601 = vmatpush.bf16.msrb.mxu0 %v5616_v53  ;;  %v5651_v53 = vld [vmem:[#allocation5 + $0x1e0] sm:$0xff] }
 0x35b   :  { %3602 = vmatpush.bf16.msrb.mxu0 %v5615_v11  ;;  %v2196_v11 = vsub.f32 0.0, %v6229_v2 }
 0x35d   :  { %v2233_v18 = vmul.f32 1.442695, %v2196_v11 }
 0x37b   :  { %v159_v21 = vpop.xlane.xlu1 %158 }
 0x37c   :  { %v160_v34 = vcvt.f32.s32 %v159_v21  ;;  %v5594_v21 = vld [vmem:[#allocation5 + $0x18] sm:$0xff] }
 0x37d   :  { %3557 = vmatpush.bf16.msra.mxu1 %v5594_v21  ;;  %v5652_v21 = vld [vmem:[#allocation5 + $0x1e8] sm:$0xff] }
 0x37e   :  { %v163_v36 = vadd.s32 %v162_v30, %v160_v34  ;;  %v5602_v30 = vld [vmem:[#allocation5 + $0x58] sm:$0xff]  ;;  %v5609_v34 = vld [vmem:[#allocation5 + $0x90] sm:$0xff] }
 0x37f   :  { %3571 = vmatpush.bf16.msra.mxu2 %v5602_v30  ;;  %3586 = vmatpush.bf16.msra.mxu3 %v5609_v34  ;;  %v5629_v30 = vld [vmem:[#allocation5 + $0x130] sm:$0xff] }
 0x380   :  { %vm179_vm11 = vcmp.eq.s32.totalorder %v6081_v24, %v163_v36  ;;  %v5593_v36 = vld [vmem:[#allocation5 + $0x10] sm:$0xff] }
 0x381   :  { %v203_v51 = vsel %vm179_vm11, %v201_v47, 0.0  ;;  %v5601_v47 = vld [vmem:[#allocation5 + $0x50] sm:$0xff]  ;;  %3558 = vmatpush.bf16.msra.mxu1 %v5593_v36  ;;  %v2225_v36 = vmul.f32 1.442695, %v2192_v35 }
 0x382   :  { %v6215_v55 = vadd.f32 %v203_v51, %v199_v4  ;;  %v6270_v4 = vpop.f32.mrf.mxu0  ;;  %v5608_v51 = vld [vmem:[#allocation5 + $0x88] sm:$0xff]  ;;  %v5637_v34 = vld [vmem:[#allocation5 + $0x170] sm:$0xff] }
 0x383   :  { %v174_v57 = vpop.xlane.xlu2 %173  ;;  %6536 = vst [vmem:[#allocation13_spill] sm:$0xff] %v6270_v4  ;;  %3572 = vmatpush.bf16.msra.mxu2 %v5601_v47  ;;  %3587 = vmatpush.bf16.msra.mxu3 %v5608_v51  ;;  %v2207_v47 = vsub.f32 0.0, %v6210_v50  ;;  %v5643_v51 = vld [vmem:[#allocation5 + $0x1a0] sm:$0xff] }
 0x384   :  { %v175_v59 = vcvt.f32.s32 %v174_v57  ;;  %2417 = vperm.xlu0 %5735, %v6215_v55   ;;  %2426 = vperm.xlu2 %5737, %v6215_v55   ;;  %v6275_v57 = vpop.f32.mrf.mxu2 }
 0x385   :  { %3559 = vmatpush.bf16.msra.mxu1 %v5592_v9 }
 0x386   :  { %v178_v60 = vadd.s32 %v177_v58, %v175_v59  ;;  %v6277_v58 = vpop.f32.mrf.mxu1  ;;  %v5607_v59 = vld [vmem:[#allocation5 + $0x80] sm:$0xff] }
 0x387   :  { %3588 = vmatpush.bf16.msra.mxu3 %v5607_v59  ;;  %3573 = vmatpush.bf16.msra.mxu2 %v5600_v43  ;;  %v2223_v59 = vmul.f32 1.442695, %v2191_v38 }
 0x388   :  { %vm180_vm12 = vcmp.eq.s32.totalorder %v6081_v24, %v178_v60  ;;  %v5978_v24 = vmov 2   ;;  %v6279_v60 = vpop.f32.mrf.mxu3 }
 0x389   :  { %v204_v0 = vsel %vm180_vm12, %v202_v61, 0.0  ;;  %6537 = vst [vmem:[#allocation14_spill] sm:$0xff] %v6279_v60  ;;  %3560 = vmatpush.bf16.msra.mxu1 %v5591_v16  ;;  %v5650_v16 = vld [vmem:[#allocation5 + $0x1d8] sm:$0xff] }
 0x38a   :  { %v6227_v1 = vadd.f32 %v204_v0, %v200_v52  ;;  %v6281_v61 = vpop.f32.mrf.mxu0 }
 0x38b   :  { %6538 = vst [vmem:[#allocation15_spill] sm:$0xff] %v6281_v61  ;;  %3574 = vmatpush.bf16.msra.mxu2 %v5599_v17 }
 0x38c   :  { %5741 = vset.pattern.permute.xlu0 %v5977_v40  ;;  %2430 = vperm.xlu2 %5737, %v6227_v1   ;;  %v6285_v52 = vpop.f32.mrf.mxu2 }
 0x38d   :  { %2422 = vperm.xlu1 %5736, %v6227_v1   ;;  %2446 = vperm.xlu0 %5741, %v6227_v1  }
 0x38e   :  { %v6287_v0 = vpop.f32.mrf.mxu1  ;;  %3609 = vmatpush.bf16.msrb.mxu1 %v5630_v25  ;;  %v2195_v25 = vsub.f32 0.0, %v6231_v3 }
 0x392   :  { %v6295_v28 = vpop.f32.mrf.mxu0  ;;  %3610 = vmatpush.bf16.msrb.mxu1 %v5629_v30  ;;  %v5649_v30 = vld [vmem:[#allocation5 + $0x1d0] sm:$0xff] }
 0x394   :  { %5739 = vset.pattern.permute.xlu2 %v5978_v24 }
 0x395   :  { %5738 = vset.pattern.permute.xlu1 %v5978_v24  ;;  %5746 = vset.pattern.permute.xlu0 %v5979_v63  ;;  %v5646_v24 = vld [vmem:[#allocation5 + $0x1b8] sm:$0xff] }
 0x396   :  { %2438 = vperm.xlu2 %5739, %v6227_v1   ;;  %2434 = vperm.xlu1 %5738, %v6215_v55   ;;  %v6299_v7 = vpop.f32.mrf.mxu1 }
 0x397   :  { %2466 = vperm.xlu0 %5746, %v6215_v55   ;;  %3637 = vmatpush.bf16.msrb.mxu3 %v5646_v24 }
 0x398   :  { %3611 = vmatpush.bf16.msrb.mxu1 %v5628_v10 }
 0x39b   :  { %3638 = vmatpush.bf16.msrb.mxu3 %v5645_v19  ;;  %v5636_v19 = vld [vmem:[#allocation5 + $0x168] sm:$0xff] }
 0x39e   :  { %5742 = vset.pattern.permute.xlu2 %v5980_v20  ;;  %5740 = vset.pattern.permute.xlu1 %v5977_v40  ;;  %v2193_v40 = vsub.f32 0.0, %v6219_v62 }
 0x39f   :  { %2450 = vperm.xlu2 %5742, %v6215_v55   ;;  %2442 = vperm.xlu1 %5740, %v6215_v55  }
 0x3a0   :  { %5750 = vset.pattern.permute.xlu0 %v5981_v33  ;;  %v2227_v15 = vmul.f32 1.442695, %v2193_v40  ;;  %3639 = vmatpush.bf16.msrb.mxu3 %v5644_v26  ;;  %v2257_v40 = vmul.f32 1.442695, %v2208_v45  ;;  %v5635_v26 = vld [vmem:[#allocation5 + $0x160] sm:$0xff] }
 0x3a2   :  { %5763 = vpow2.f32 %v2227_v15  ;;  %v2255_v15 = vmul.f32 1.442695, %v2207_v47  ;;  %v2231_v47 = vmul.f32 1.442695, %v2195_v25 }
 0x3a3   :  { %5765 = vpow2.f32 %v2259_v29  ;;  %v2197_v29 = vsub.f32 0.0, %v6248_v12 }
 0x3a4   :  { %3640 = vmatpush.bf16.msrb.mxu3 %v5643_v51  ;;  %v5626_v51 = vld [vmem:[#allocation5 + $0x118] sm:$0xff] }
 0x3a7   :  { %5743 = vset.pattern.permute.xlu2 %v5982_v54  ;;  %5744 = vset.pattern.permute.xlu1 %v5980_v20  ;;  %v6293_v20 = vpop.f32.mrf.mxu3 }
 0x3a8   :  { %2458 = vperm.xlu2 %5743, %v6215_v55   ;;  %2454 = vperm.xlu1 %5744, %v6227_v1   ;;  %v5764_v46 = vpop.eup %5763 }
 0x3a9   :  { %v5766_v9 = vpop.eup %5765  ;;  %v2289_v43 = vadd.f32 1.0, %v5764_v46 }
 0x3aa   :  { %v2305_v35 = vadd.f32 1.0, %v5766_v9  ;;  %v5640_v9 = vld [vmem:[#allocation5 + $0x188] sm:$0xff] }
 0x3af   :  { %v6306_v24 = vpop.f32.mrf.mxu3 }
 0x3b0   :  { %5747 = vset.pattern.permute.xlu2 %v5979_v63  ;;  %5745 = vset.pattern.permute.xlu1 %v5982_v54  ;;  %v5654_v63 = vld [vmem:[#allocation5 + $0x1f8] sm:$0xff] }
 0x3b1   :  { %2470 = vperm.xlu2 %5747, %v6227_v1   ;;  %2462 = vperm.xlu1 %5745, %v6227_v1   ;;  %v5638_v54 = vld [vmem:[#allocation5 + $0x178] sm:$0xff] }
 0x3b2   :  { %3651 = vmatpush.bf16.msra.mxu0 %v5654_v63  ;;  %3623 = vmatpush.bf16.msrb.mxu2 %v5638_v54  ;;  %v6308_v63 = vpop.f32.mrf.mxu0  ;;  %v5627_v54 = vld [vmem:[#allocation5 + $0x120] sm:$0xff] }
 0x3b3   :  { %3612 = vmatpush.bf16.msrb.mxu1 %v5627_v54  ;;  %v2213_v54 = vsub.f32 0.0, %v6258_v56 }
 0x3b6   :  { %3624 = vmatpush.bf16.msrb.mxu2 %v5637_v34  ;;  %v2235_v34 = vmul.f32 1.442695, %v2197_v29  ;;  %v5625_v29 = vld [vmem:[#allocation5 + $0x110] sm:$0xff] }
 0x3b7   :  { %v6316_v11 = vpop.f32.mrf.mxu3  ;;  %3613 = vmatpush.bf16.msrb.mxu1 %v5626_v51 }
 0x3b9   :  { %5749 = vset.pattern.permute.xlu2 %v5981_v33  ;;  %5748 = vset.pattern.permute.xlu1 %v5981_v33  ;;  %v6297_v33 = vpop.f32.mrf.mxu2 }
 0x3ba   :  { %2478 = vperm.xlu2 %5749, %v6227_v1   ;;  %2474 = vperm.xlu1 %5748, %v6215_v55   ;;  %v5653_v1 = vld [vmem:[#allocation5 + $0x1f0] sm:$0xff]  ;;  %v2194_v55 = vsub.f32 0.0, %v6221_v14 }
 0x3bb   :  { %3652 = vmatpush.bf16.msra.mxu0 %v5653_v1  ;;  %3625 = vmatpush.bf16.msrb.mxu2 %v5636_v19 }
 0x3bc   :  { %v2229_v31 = vmul.f32 1.442695, %v2194_v55  ;;  %v5642_v55 = vld [vmem:[#allocation5 + $0x198] sm:$0xff]  ;;  %3614 = vmatpush.bf16.msrb.mxu1 %v5625_v29  ;;  %v2214_v29 = vsub.f32 0.0, %v6260_v37 }
 0x3bd   :  { %3641 = vmatpush.bf16.msrb.mxu3 %v5642_v55 }
 0x3be   :  { %5767 = vpow2.f32 %v2229_v31 }
 0x3bf   :  { %5769 = vpow2.f32 %v2261_v32  ;;  %3653 = vmatpush.bf16.msra.mxu0 %v5652_v21  ;;  %v6313_v32 = vpop.f32.mrf.mxu1  ;;  %v5641_v21 = vld [vmem:[#allocation5 + $0x190] sm:$0xff]  ;;  %3626 = vmatpush.bf16.msrb.mxu2 %v5635_v26  ;;  %v5639_v26 = vld [vmem:[#allocation5 + $0x180] sm:$0xff] }
 0x3c0   :  { %5771 = vpow2.f32 %v2225_v36 }
 0x3c1   :  { %5773 = vpow2.f32 %v2223_v59  ;;  %v6311_v31 = vpop.f32.mrf.mxu2  ;;  %3642 = vmatpush.bf16.msrb.mxu3 %v5641_v21 }
 0x3c2   :  { %5775 = vpow2.f32 %v2257_v40  ;;  %v6318_v40 = vpop.f32.mrf.mxu0 }
 0x3c3   :  { %3654 = vmatpush.bf16.msra.mxu0 %v5651_v53  ;;  %5777 = vrcp.f32 %v2289_v43  ;;  %v5634_v53 = vld [vmem:[#allocation5 + $0x158] sm:$0xff]  ;;  %v5648_v43 = vld [vmem:[#allocation5 + $0x1c8] sm:$0xff] }
 0x3c4   :  { %v5768_v1 = vpop.eup %5767  ;;  %5779 = vpow2.f32 %v2255_v15  ;;  %3627 = vmatpush.bf16.msrb.mxu2 %v5634_v53  ;;  %v2198_v53 = vsub.f32 0.0, %v6250_v13 }
 0x3c5   :  { %v5770_v17 = vpop.eup %5769  ;;  %v2290_v38 = vadd.f32 1.0, %v5768_v1  ;;  %5781 = vpow2.f32 %v2233_v18  ;;  %v2212_v18 = vsub.f32 0.0, %v6240_v22  ;;  %3643 = vmatpush.bf16.msrb.mxu3 %v5640_v9  ;;  %v2267_v9 = vmul.f32 1.442695, %v2213_v54 }
 0x3c6   :  { %v2306_v45 = vadd.f32 1.0, %v5770_v17  ;;  %v5772_v46 = vpop.eup %5771  ;;  %5783 = vrcp.f32 %v2305_v35  ;;  %v5633_v35 = vld [vmem:[#allocation5 + $0x150] sm:$0xff]  ;;  %v2237_v54 = vmul.f32 1.442695, %v2198_v53 }
 0x3c7   :  { %3655 = vmatpush.bf16.msra.mxu0 %v5650_v16  ;;  %v5774_v36 = vpop.eup %5773  ;;  %5785 = vrcp.f32 %v2290_v38  ;;  %v6322_v1 = vpop.f32.mrf.mxu1  ;;  %v2288_v55 = vadd.f32 1.0, %v5772_v46  ;;  %v2265_v51 = vmul.f32 1.442695, %v2212_v18 }
 0x3c8   :  { %v5776_v59 = vpop.eup %5775  ;;  %5787 = vrcp.f32 %v2306_v45  ;;  %6540 = vst [vmem:[#allocation17_spill] sm:$0xff] %v6322_v1  ;;  %v2287_v17 = vadd.f32 1.0, %v5774_v36  ;;  %v5647_v45 = vld [vmem:[#allocation5 + $0x1c0] sm:$0xff]  ;;  %3628 = vmatpush.bf16.msrb.mxu2 %v5633_v35  ;;  %v2006_v35 = vpop.f32.mrf.mxu3 }
 0x3c9   :  { %v5778_v10 = vpop.eup %5777  ;;  %5789 = vpow2.f32 %v2235_v34  ;;  %v6320_v19 = vpop.f32.mrf.mxu2  ;;  %v2304_v25 = vadd.f32 1.0, %v5776_v59  ;;  %3644 = vmatpush.bf16.msrb.mxu3 %v5639_v26  ;;  %v2200_v26 = vsub.f32 0.0, %v6252_v23 }
 0x3ca   :  { %6539 = vst [vmem:[#allocation16_spill] sm:$0xff] %v6320_v19  ;;  %v5780_v15 = vpop.eup %5779  ;;  %5791 = vpow2.f32 %v2231_v47  ;;  %v2353_v59 = vmul.f32 %v5778_v10, %v6219_v62  ;;  %v2020_v62 = vpop.f32.mrf.mxu0  ;;  %v5624_v10 = vld [vmem:[#allocation5 + $0x108] sm:$0xff] }
 0x3cb   :  { %3656 = vmatpush.bf16.msra.mxu0 %v5649_v30  ;;  %v5782_v16 = vpop.eup %5781  ;;  %v2303_v30 = vadd.f32 1.0, %v5780_v15  ;;  %5793 = vrcp.f32 %v2288_v55  ;;  %3615 = vmatpush.bf16.msrb.mxu1 %v5624_v10 }
 0x3cc   :  { %v5784_v38 = vpop.eup %5783  ;;  %v2292_v46 = vadd.f32 1.0, %v5782_v16  ;;  %5795 = vrcp.f32 %v2287_v17 }
 0x3cd   :  { %v5786_v21 = vpop.eup %5785  ;;  %5797 = vrcp.f32 %v2304_v25  ;;  %v2369_v55 = vmul.f32 %v5784_v38, %v6236_v5  ;;  %v5632_v25 = vld [vmem:[#allocation5 + $0x148] sm:$0xff] }
 0x3ce   :  { %v5788_v34 = vpop.eup %5787  ;;  %v2354_v16 = vmul.f32 %v5786_v21, %v6221_v14  ;;  %5799 = vrcp.f32 %v2303_v30  ;;  %v2204_v21 = vsub.f32 0.0, %v6275_v57  ;;  %3629 = vmatpush.bf16.msrb.mxu2 %v5632_v25  ;;  %v5623_v30 = vld [vmem:[#allocation5 + $0x100] sm:$0xff] }
 0x3cf   :  { %3657 = vmatpush.bf16.msra.mxu0 %v5648_v43  ;;  %v5790_v47 = vpop.eup %5789  ;;  %v2211_v43 = vsub.f32 0.0, %v6242_v8  ;;  %v2370_v17 = vmul.f32 %v5788_v34, %v6238_v6  ;;  %5801 = vrcp.f32 %v2292_v46  ;;  %v6336_v5 = vpop.f32.mrf.mxu1  ;;  %v5631_v34 = vld [vmem:[#allocation5 + $0x140] sm:$0xff]  ;;  %3616 = vmatpush.bf16.msrb.mxu1 %v5623_v30  ;;  %v2199_v30 = vsub.f32 0.0, %v6254_v27 }
 0x3d0   :  { %v5792_v15 = vpop.eup %5791  ;;  %v2293_v18 = vadd.f32 1.0, %v5790_v47  ;;  %5803 = vpow2.f32 %v2265_v51  ;;  %6542 = vst [vmem:[#allocation19_spill] sm:$0xff] %v6336_v5  ;;  %v2385_v47 = vmul.f32 %v2353_v59, %v6316_v11  ;;  %v2401_v51 = vmul.f32 %v2369_v55, %v2006_v35 }
 0x3d1   :  { %v6338_v14 = vpop.eup %5793  ;;  %v2291_v38 = vadd.f32 1.0, %v5792_v15  ;;  %5805 = vpow2.f32 %v2267_v9  ;;  %v2263_v6 = vmul.f32 1.442695, %v2211_v43  ;;  %v2386_v53 = vmul.f32 %v2354_v16, %v6318_v40  ;;  %v5678_v16 = vld [vmem:[#allocation5 + $0x2b8] sm:$0xff] }
 0x3d2   :  { %v6341_v46 = vpop.eup %5795  ;;  %v2402_v23 = vmul.f32 %v2370_v17, %v2020_v62  ;;  %5807 = vrcp.f32 %v2293_v18  ;;  %v2269_v15 = vmul.f32 1.442695, %v2214_v29  ;;  %v2203_v9 = vsub.f32 0.0, %v6277_v58  ;;  %v5686_v17 = vld [vmem:[#allocation5 + $0x2f8] sm:$0xff]  ;;  %3630 = vmatpush.bf16.msrb.mxu2 %v5631_v34 }
 0x3d3   :  { %3658 = vmatpush.bf16.msra.mxu0 %v5647_v45  ;;  %v6334_v45 = vpop.f32.mrf.mxu2  ;;  %v6345_v5 = vpop.eup %5797  ;;  %v2220_v43 = vsub.f32 0.0, %v6285_v52  ;;  %5809 = vpow2.f32 %v2237_v54  ;;  %v2241_v40 = vmul.f32 1.442695, %v2200_v26  ;;  %v2201_v59 = vsub.f32 0.0, %v6268_v48 }
 0x3d4   :  { %6541 = vst [vmem:[#allocation18_spill] sm:$0xff] %v6334_v45  ;;  %v6349_v25 = vpop.eup %5799  ;;  %v2219_v55 = vsub.f32 0.0, %v6287_v0  ;;  %5811 = vrcp.f32 %v2291_v38  ;;  %v2249_v29 = vmul.f32 1.442695, %v2204_v21  ;;  %v2216_v21 = vsub.f32 0.0, %v6264_v39 }
 0x3d5   :  { %v6351_v11 = vpop.eup %5801  ;;  %5813 = vpow2.f32 %v2263_v6 }
 0x3d6   :  { %v5804_v18 = vpop.eup %5803  ;;  %5815 = vpow2.f32 %v2269_v15  ;;  %v2279_v38 = vmul.f32 1.442695, %v2219_v55 }
 0x3d7   :  { %v6357_v26 = vpop.f32.mrf.mxu1  ;;  %5817 = vpow2.f32 %v2241_v40  ;;  %v2308_v6 = vadd.f32 1.0, %v5804_v18  ;;  %v5684_v40 = vld [vmem:[#allocation5 + $0x2e8] sm:$0xff]  ;;  %v2273_v18 = vmul.f32 1.442695, %v2216_v21 }
 0x3d8   :  { %6544 = vst [vmem:[#allocation21_spill] sm:$0xff] %v6357_v26  ;;  %5819 = vpow2.f32 %v2249_v29 }
 0x3db   :  { %v6355_v54 = vpop.f32.mrf.mxu2 }
 0x3dc   :  { %6543 = vst [vmem:[#allocation20_spill] sm:$0xff] %v6355_v54 }
 0x3de   :  { %v2427_v36 = vpop.permute.xlu2 %2426 }
 0x3df   :  { %v2483_v45 = vmul.f32 %v2427_v36, %v2385_v47  ;;  %v2484_v1 = vmul.f32 %v2427_v36, %v2386_v53  ;;  %v5806_v36 = vpop.eup %5805  ;;  %v2281_v47 = vmul.f32 1.442695, %v2220_v43 }
 0x3e0   :  { %v2309_v53 = vadd.f32 1.0, %v5806_v36 }
 0x3e6   :  { %v2431_v10 = vpop.permute.xlu2 %2430 }
 0x3e7   :  { %v2499_v19 = vmul.f32 %v2431_v10, %v2401_v51  ;;  %v2500_v37 = vmul.f32 %v2431_v10, %v2402_v23  ;;  %v2247_v23 = vmul.f32 1.442695, %v2203_v9  ;;  %v6359_v51 = vpop.eup %5807  ;;  %v2239_v9 = vmul.f32 1.442695, %v2199_v30  ;;  %v5676_v10 = vld [vmem:[#allocation5 + $0x2a8] sm:$0xff] }
 0x3e9   :  { %v2515_v35 = vpack.c.bf16 %v2499_v19, %v2483_v45  ;;  %v2516_v62 = vpack.c.bf16 %v2500_v37, %v2484_v1  ;;  %v5677_v37 = vld [vmem:[#allocation5 + $0x2b0] sm:$0xff]  ;;  %v2243_v1 = vmul.f32 1.442695, %v2201_v59  ;;  %v5810_v45 = vpop.eup %5809  ;;  %5821 = vpow2.f32 %v2247_v23  ;;  %v5675_v23 = vld [vmem:[#allocation5 + $0x2a0] sm:$0xff] }
 0x3ea   :  { %v5685_v19 = vld [vmem:[#allocation5 + $0x2f0] sm:$0xff]  ;;  %v6363_v34 = vpop.eup %5811  ;;  %5823 = vpow2.f32 %v2281_v47  ;;  %v2294_v55 = vadd.f32 1.0, %v5810_v45  ;;  %v5683_v47 = vld [vmem:[#allocation5 + $0x2e0] sm:$0xff] }
 0x3eb   :  { %3589 = vmatmul.bf16.vlgmr.msra.gmra.mxu3 %v2515_v35  ;;  %3603 = vmatmul.bf16.vlgmr.msrb.gmra.mxu0 %v2516_v62  ;;  %v5814_v15 = vpop.eup %5813  ;;  %5825 = vpow2.f32 %v2279_v38 }
 0x3ec   :  { %3693 = vmatpush.bf16.msra.mxu3 %v5678_v16  ;;  %3707 = vmatpush.bf16.msrb.mxu0 %v5686_v17  ;;  %v5816_v59 = vpop.eup %5815  ;;  %5827 = vpow2.f32 %v2243_v1  ;;  %v2215_v16 = vsub.f32 0.0, %v6266_v44  ;;  %v2307_v35 = vadd.f32 1.0, %v5814_v15 }
 0x3ed   :  { %v5818_v17 = vpop.eup %5817  ;;  %5829 = vrcp.f32 %v2308_v6  ;;  %v2310_v36 = vadd.f32 1.0, %v5816_v59  ;;  %v5682_v59 = vld [vmem:[#allocation5 + $0x2d8] sm:$0xff] }
 0x3ee   :  { %v5820_v29 = vpop.eup %5819  ;;  %5831 = vrcp.f32 %v2309_v53  ;;  %v2271_v38 = vmul.f32 1.442695, %v2215_v16  ;;  %v2217_v53 = vsub.f32 0.0, %v6279_v60  ;;  %v2352_v16 = vmul.f32 %v6338_v14, %v6201_v41 }
 0x3ef   :  { %v5822_v62 = vpop.eup %5821  ;;  %5833 = vpow2.f32 %v2239_v9  ;;  %v2300_v45 = vadd.f32 1.0, %v5820_v29 }
 0x3f0   :  { %v6365_v43 = vpop.permute.xlu2 %2438  ;;  %3694 = vmatpush.bf16.msra.mxu3 %v5677_v37  ;;  %3708 = vmatpush.bf16.msrb.mxu0 %v5685_v19  ;;  %v5824_v30 = vpop.eup %5823  ;;  %5835 = vrcp.f32 %v2294_v55  ;;  %v2299_v15 = vadd.f32 1.0, %v5822_v62  ;;  %v2351_v62 = vmul.f32 %v6341_v46, %v6203_v42  ;;  %v2275_v14 = vmul.f32 1.442695, %v2217_v53  ;;  %v5673_v42 = vld [vmem:[#allocation5 + $0x290] sm:$0xff] }
 0x3f1   :  { %v6368_v37 = vpop.f32.mrf.mxu2  ;;  %v6370_v19 = vpop.f32.mrf.mxu1  ;;  %5837 = vpow2.f32 %v2273_v18 }
 0x3f2   :  { %6545 = vst [vmem:[#allocation22_spill] sm:$0xff] %v6368_v37  ;;  %v5826_v1 = vpop.eup %5825  ;;  %5839 = vrcp.f32 %v2307_v35 }
 0x3f3   :  { %6546 = vst [vmem:[#allocation23_spill] sm:$0xff] %v6370_v19  ;;  %v5828_v21 = vpop.eup %5827  ;;  %5841 = vrcp.f32 %v2310_v36  ;;  %v2315_v18 = vadd.f32 1.0, %v5826_v1  ;;  %v2368_v36 = vmul.f32 %v6345_v5, %v6208_v49  ;;  %v2296_v5 = vadd.f32 1.0, %v5818_v17 }
 0x3f4   :  { %3695 = vmatpush.bf16.msra.mxu3 %v5676_v10  ;;  %3709 = vmatpush.bf16.msrb.mxu0 %v5684_v40  ;;  %v6373_v9 = vpop.eup %5829  ;;  %v2316_v10 = vadd.f32 1.0, %v5824_v30  ;;  %v5674_v40 = vld [vmem:[#allocation5 + $0x298] sm:$0xff]  ;;  %5843 = vpow2.f32 %v2271_v38  ;;  %v6389_v30 = vpop.f32.mrf.mxu0  ;;  %v2202_v38 = vsub.f32 0.0, %v6270_v4  ;;  %v2297_v17 = vadd.f32 1.0, %v5828_v21 }
 0x3f5   :  { %v6375_v55 = vpop.eup %5831  ;;  %5845 = vrcp.f32 %v2300_v45  ;;  %v5681_v45 = vld [vmem:[#allocation5 + $0x2d0] sm:$0xff]  ;;  %v6412_v21 = vmul.f32 %v6351_v11, %v6229_v2  ;;  %v2355_v2 = vmul.f32 %v6363_v34, %v6231_v3 }
 0x3f6   :  { %v2418_v6 = vpop.permute.xlu0 %2417  ;;  %v5834_v35 = vpop.eup %5833  ;;  %5847 = vrcp.f32 %v2299_v15  ;;  %v2384_v15 = vmul.f32 %v2352_v16, %v6297_v33  ;;  %v2245_v26 = vmul.f32 1.442695, %v2202_v38  ;;  %v5680_v38 = vld [vmem:[#allocation5 + $0x2c8] sm:$0xff]  ;;  %v5661_v3 = vld [vmem:[#allocation5 + $0x230] sm:$0xff] }
 0x3f7   :  { %v6391_v41 = vpop.eup %5835  ;;  %5849 = vrcp.f32 %v2316_v10  ;;  %v2383_v10 = vmul.f32 %v2351_v62, %v6299_v7  ;;  %v2205_v7 = vsub.f32 0.0, %v6293_v20  ;;  %v5670_v62 = vld [vmem:[#allocation5 + $0x278] sm:$0xff] }
 0x3f8   :  { %3696 = vmatpush.bf16.msra.mxu3 %v5675_v23  ;;  %3710 = vmatpush.bf16.msrb.mxu0 %v5683_v47  ;;  %v2367_v23 = vmul.f32 %v6349_v25, %v6210_v50  ;;  %v6387_v47 = vpop.f32.mrf.mxu3  ;;  %v5838_v1 = vpop.eup %5837  ;;  %v2218_v50 = vsub.f32 0.0, %v6281_v61  ;;  %5851 = vrcp.f32 %v2315_v18  ;;  %v2482_v60 = vmul.f32 %v2418_v6, %v2384_v15 }
 0x3f9   :  { %v6379_v29 = vpop.permute.xlu2 %2450  ;;  %v6394_v49 = vpop.eup %5839  ;;  %5853 = vpow2.f32 %v2275_v14  ;;  %v2481_v4 = vmul.f32 %v2418_v6, %v2383_v10  ;;  %v5672_v6 = vld [vmem:[#allocation5 + $0x288] sm:$0xff]  ;;  %v2295_v15 = vadd.f32 1.0, %v5834_v35  ;;  %v2206_v35 = vsub.f32 0.0, %v6295_v28  ;;  %v5679_v10 = vld [vmem:[#allocation5 + $0x2c0] sm:$0xff] }
 0x3fa   :  { %6547 = vst [vmem:[#allocation24_spill] sm:$0xff] %v6379_v29  ;;  %v6397_v46 = vpop.f32.mrf.mxu2  ;;  %v6399_v25 = vpop.f32.mrf.mxu1  ;;  %v2277_v16 = vmul.f32 1.442695, %v2218_v50  ;;  %5855 = vrcp.f32 %v2296_v5  ;;  %v6418_v50 = vmul.f32 %v6359_v51, %v6248_v12  ;;  %v5671_v5 = vld [vmem:[#allocation5 + $0x280] sm:$0xff] }
 0x3fb   :  { %v6401_v53 = vpop.eup %5841  ;;  %5857 = vrcp.f32 %v2297_v17 }
 0x3fc   :  { %3697 = vmatpush.bf16.msra.mxu3 %v5674_v40  ;;  %3711 = vmatpush.bf16.msrb.mxu0 %v5682_v59  ;;  %v2400_v40 = vmul.f32 %v2368_v36, %v6311_v31  ;;  %v2399_v59 = vmul.f32 %v2367_v23, %v6313_v32  ;;  %v5844_v29 = vpop.eup %5843  ;;  %v5662_v31 = vld [vmem:[#allocation5 + $0x238] sm:$0xff]  ;;  %5859 = vpow2.f32 %v2245_v26 }
 0x3fd   :  { %v5846_v61 = vpop.eup %5845  ;;  %5861 = vpow2.f32 %v2277_v16  ;;  %v2311_v34 = vadd.f32 1.0, %v5844_v29  ;;  %v2253_v16 = vmul.f32 1.442695, %v2206_v35 }
 0x3fe   :  { %v5848_v33 = vpop.eup %5847  ;;  %v2364_v51 = vmul.f32 %v5846_v61, %v6275_v57  ;;  %v2373_v57 = vmul.f32 %v6375_v55, %v6258_v56  ;;  %5863 = vrcp.f32 %v2295_v15 }
 0x3ff   :  { %v2423_v18 = vpop.permute.xlu1 %2422  ;;  %v6407_v54 = vpop.permute.xlu0 %2446  ;;  %v2363_v26 = vmul.f32 %v5848_v33, %v6277_v58  ;;  %v2358_v58 = vmul.f32 %v6391_v41, %v6250_v13  ;;  %v5668_v13 = vld [vmem:[#allocation5 + $0x268] sm:$0xff] }
 0x400   :  { %v2497_v19 = vmul.f32 %v2423_v18, %v2399_v59  ;;  %v2498_v37 = vmul.f32 %v2423_v18, %v2400_v40  ;;  %3698 = vmatpush.bf16.msra.mxu3 %v5673_v42  ;;  %3712 = vmatpush.bf16.msrb.mxu0 %v5681_v45  ;;  %v5850_v32 = vpop.eup %5849  ;;  %v2221_v45 = vsub.f32 0.0, %v6306_v24  ;;  %v6427_v11 = vpop.f32.mrf.mxu3  ;;  %v2222_v40 = vsub.f32 0.0, %v6308_v63 }
 0x401   :  { %v5852_v42 = vpop.eup %5851 }
 0x402   :  { %v2513_v36 = vpack.c.bf16 %v2497_v19, %v2481_v4  ;;  %v2514_v23 = vpack.c.bf16 %v2498_v37, %v2482_v60  ;;  %v6414_v14 = vpop.permute.xlu2 %2458  ;;  %v6425_v4 = vmul.f32 %v6373_v9, %v6240_v22  ;;  %v2312_v60 = vadd.f32 1.0, %v5838_v1  ;;  %v6429_v37 = vpop.f32.mrf.mxu0  ;;  %v5669_v22 = vld [vmem:[#allocation5 + $0x270] sm:$0xff] }
 0x403   :  { %v5854_v12 = vpop.eup %5853  ;;  %v2251_v19 = vmul.f32 1.442695, %v2205_v7  ;;  %v2380_v9 = vmul.f32 %v5850_v32, %v6285_v52  ;;  %v2379_v1 = vmul.f32 %v5852_v42, %v6287_v0  ;;  %v2283_v61 = vmul.f32 1.442695, %v2221_v45  ;;  %v2160_v59 = vpop.f32.mrf.mxu2  ;;  %v6548_v0 = vld [vmem:[#allocation12_spill] sm:$0xff] }
 0x404   :  { %3561 = vmatmul.bf16.vlgmr.msra.gmra.mxu1 %v2513_v36  ;;  %3575 = vmatmul.bf16.vlgmr.msra.gmra.mxu2 %v2514_v23  ;;  %v2146_v17 = vpop.f32.mrf.mxu1  ;;  %v6439_v29 = vpop.eup %5855  ;;  %v2371_v52 = vmul.f32 %v6394_v49, %v6242_v8  ;;  %v2374_v18 = vmul.f32 %v6401_v53, %v6548_v0  ;;  %5865 = vrcp.f32 %v2312_v60  ;;  %v2313_v55 = vadd.f32 1.0, %v5854_v12  ;;  %v6549_v23 = vld [vmem:[#allocation16_spill] sm:$0xff] }
 0x405   :  { %3665 = vmatpush.bf16.msra.mxu1 %v5662_v31  ;;  %3679 = vmatpush.bf16.msra.mxu2 %v5670_v62  ;;  %v6447_v56 = vpop.eup %5857  ;;  %5867 = vpow2.f32 %v2251_v19  ;;  %v2396_v7 = vmul.f32 %v2364_v51, %v6397_v46  ;;  %v5660_v62 = vld [vmem:[#allocation5 + $0x228] sm:$0xff]  ;;  %v2395_v8 = vmul.f32 %v2363_v26, %v6399_v25  ;;  %v2412_v49 = vmul.f32 %v2380_v9, %v2160_v59  ;;  %v6550_v46 = vld [vmem:[#allocation17_spill] sm:$0xff] }
 0x406   :  { %3699 = vmatpush.bf16.msra.mxu3 %v5672_v6  ;;  %3713 = vmatpush.bf16.msrb.mxu0 %v5680_v38  ;;  %v5860_v41 = vpop.eup %5859  ;;  %5869 = vrcp.f32 %v2311_v34  ;;  %v2411_v53 = vmul.f32 %v2379_v1, %v2146_v17  ;;  %v2285_v36 = vmul.f32 1.442695, %v2222_v40  ;;  %v2388_v6 = vmul.f32 %v6412_v21, %v6549_v23  ;;  %v6551_v21 = vld [vmem:[#allocation18_spill] sm:$0xff]  ;;  %v5659_v34 = vld [vmem:[#allocation5 + $0x220] sm:$0xff] }
 0x407   :  { %v5862_v32 = vpop.eup %5861  ;;  %5871 = vpow2.f32 %v2283_v61  ;;  %v2387_v38 = vmul.f32 %v2355_v2, %v6550_v46  ;;  %v2298_v35 = vadd.f32 1.0, %v5860_v41  ;;  %v2404_v2 = vmul.f32 %v6425_v4, %v6551_v21  ;;  %v5667_v26 = vld [vmem:[#allocation5 + $0x260] sm:$0xff] }
 0x408   :  { %v2435_v33 = vpop.permute.xlu1 %2434  ;;  %v6454_v15 = vpop.f32.mrf.mxu3  ;;  %5873 = vpow2.f32 %v2253_v16  ;;  %v2314_v59 = vadd.f32 1.0, %v5862_v32  ;;  %v2405_v4 = vmul.f32 %v2373_v57, %v6427_v11  ;;  %v2406_v17 = vmul.f32 %v2374_v18, %v6429_v37  ;;  %v5658_v37 = vld [vmem:[#allocation5 + $0x218] sm:$0xff] }
 0x409   :  { %3666 = vmatpush.bf16.msra.mxu1 %v5661_v3  ;;  %3680 = vmatpush.bf16.msra.mxu2 %v5669_v22  ;;  %v2467_v31 = vpop.permute.xlu0 %2466  ;;  %v6466_v19 = vpop.eup %5863  ;;  %v6552_v3 = vld [vmem:[#allocation19_spill] sm:$0xff]  ;;  %v2485_v1 = vmul.f32 %v2435_v33, %v2387_v38  ;;  %5875 = vpow2.f32 %v2285_v36  ;;  %v2389_v0 = vmul.f32 %v6418_v50, %v6387_v47  ;;  %v2390_v16 = vmul.f32 %v2358_v58, %v6389_v30  ;;  %v5666_v57 = vld [vmem:[#allocation5 + $0x258] sm:$0xff] }
 0x40a   :  { %3700 = vmatpush.bf16.msra.mxu3 %v5671_v5  ;;  %3714 = vmatpush.bf16.msrb.mxu0 %v5679_v10  ;;  %v6456_v45 = vpop.f32.mrf.mxu0  ;;  %v6458_v60 = vmul.f32 %v2467_v31, %v2395_v8  ;;  %v6460_v25 = vmul.f32 %v2467_v31, %v2396_v7  ;;  %v2403_v22 = vmul.f32 %v2371_v52, %v6552_v3  ;;  %v5866_v9 = vpop.eup %5865  ;;  %5877 = vrcp.f32 %v2313_v55  ;;  %v5710_v58 = vld [vmem:[#allocation5 + $0x3b8] sm:$0xff]  ;;  %v5709_v38 = vld [vmem:[#allocation5 + $0x3b0] sm:$0xff] }
 0x40b   :  { %v2471_v42 = vpop.permute.xlu2 %2470  ;;  %v2486_v5 = vmul.f32 %v2435_v33, %v2388_v6  ;;  %v5868_v40 = vpop.eup %5867  ;;  %v2502_v7 = vmul.f32 %v6365_v43, %v2404_v2  ;;  %5879 = vrcp.f32 %v2298_v35  ;;  %v5718_v8 = vld [vmem:[#allocation5 + $0x3f8] sm:$0xff]  ;;  %v2376_v35 = vmul.f32 %v5866_v9, %v6264_v39  ;;  %v5708_v39 = vld [vmem:[#allocation5 + $0x3a8] sm:$0xff] }
 0x40c   :  { %v6462_v12 = vmul.f32 %v2471_v42, %v2411_v53  ;;  %v6464_v51 = vmul.f32 %v2471_v42, %v2412_v49  ;;  %v5870_v52 = vpop.eup %5869  ;;  %v2501_v33 = vmul.f32 %v6365_v43, %v2403_v22  ;;  %5881 = vrcp.f32 %v2314_v59  ;;  %v5665_v53 = vld [vmem:[#allocation5 + $0x250] sm:$0xff] }
 0x40d   :  { %3667 = vmatpush.bf16.msra.mxu1 %v5660_v62  ;;  %3681 = vmatpush.bf16.msra.mxu2 %v5668_v13  ;;  %v5872_v31 = vpop.eup %5871  ;;  %v2503_v62 = vmul.f32 %v6407_v54, %v2405_v4  ;;  %v2504_v13 = vmul.f32 %v6407_v54, %v2406_v17  ;;  %v2518_v41 = vpack.c.bf16 %v2502_v7, %v2486_v5  ;;  %v5657_v54 = vld [vmem:[#allocation5 + $0x210] sm:$0xff]  ;;  %v2301_v32 = vadd.f32 1.0, %v5868_v40  ;;  %v6554_v17 = vld [vmem:[#allocation22_spill] sm:$0xff]  ;;  %v6557_v7 = vld [vmem:[#allocation13_spill] sm:$0xff] }
 0x40e   :  { %v2525_v10 = vpack.c.bf16 %v6462_v12, %v6458_v60  ;;  %v2526_v61 = vpack.c.bf16 %v6464_v51, %v6460_v25  ;;  %v2517_v18 = vpack.c.bf16 %v2501_v33, %v2485_v1  ;;  %v5874_v30 = vpop.eup %5873  ;;  %v2317_v46 = vadd.f32 1.0, %v5872_v31  ;;  %v5717_v42 = vld [vmem:[#allocation5 + $0x3f0] sm:$0xff]  ;;  %v6556_v33 = vld [vmem:[#allocation14_spill] sm:$0xff] }
 0x40f   :  { %v5876_v49 = vpop.eup %5875  ;;  %v2375_v21 = vmul.f32 %v5870_v52, %v6266_v44  ;;  %v2302_v2 = vadd.f32 1.0, %v5874_v30  ;;  %v6553_v5 = vld [vmem:[#allocation11_spill] sm:$0xff]  ;;  %v2359_v59 = vmul.f32 %v6466_v19, %v6254_v27  ;;  %5883 = vrcp.f32 %v2301_v32  ;;  %v5716_v44 = vld [vmem:[#allocation5 + $0x3e8] sm:$0xff]  ;;  %v5702_v30 = vld [vmem:[#allocation5 + $0x378] sm:$0xff] }
 0x410   :  { %v2118_v36 = vpop.f32.mrf.mxu3  ;;  %v5878_v6 = vpop.eup %5877  ;;  %v2318_v22 = vadd.f32 1.0, %v5876_v49  ;;  %v2360_v40 = vmul.f32 %v6439_v29, %v6553_v5  ;;  %5885 = vrcp.f32 %v2317_v46  ;;  %v2361_v9 = vmul.f32 %v6447_v56, %v6268_v48  ;;  %v6558_v27 = vld [vmem:[#allocation15_spill] sm:$0xff] }
 0x411   :  { %3668 = vmatpush.bf16.msra.mxu1 %v5659_v34  ;;  %3682 = vmatpush.bf16.msra.mxu2 %v5667_v26  ;;  %v2443_v11 = vpop.permute.xlu1 %2442  ;;  %v5880_v3 = vpop.eup %5879  ;;  %v5656_v34 = vld [vmem:[#allocation5 + $0x208] sm:$0xff]  ;;  %5887 = vrcp.f32 %v2302_v2  ;;  %v2408_v52 = vmul.f32 %v2376_v35, %v6554_v17  ;;  %v2377_v29 = vmul.f32 %v5878_v6, %v6556_v33  ;;  %v5693_v2 = vld [vmem:[#allocation5 + $0x330] sm:$0xff] }
 0x412   :  { %v2487_v47 = vmul.f32 %v2443_v11, %v2389_v0  ;;  %v2488_v50 = vmul.f32 %v2443_v11, %v2390_v16  ;;  %v2132_v23 = vpop.f32.mrf.mxu0  ;;  %v5664_v26 = vld [vmem:[#allocation5 + $0x248] sm:$0xff]  ;;  %v5882_v1 = vpop.eup %5881  ;;  %v6555_v0 = vld [vmem:[#allocation23_spill] sm:$0xff]  ;;  %v2362_v31 = vmul.f32 %v5880_v3, %v6557_v7  ;;  %5889 = vrcp.f32 %v2318_v22  ;;  %v6559_v11 = vld [vmem:[#allocation20_spill] sm:$0xff] }
 0x413   :  { %v2407_v16 = vmul.f32 %v2375_v21, %v6555_v0  ;;  %v2378_v19 = vmul.f32 %v5882_v1, %v6558_v27  ;;  %v2393_v32 = vmul.f32 %v2361_v9, %v6454_v15  ;;  %v2409_v6 = vmul.f32 %v2377_v29, %v2118_v36  ;;  %v5701_v3 = vld [vmem:[#allocation5 + $0x370] sm:$0xff]  ;;  %v5706_v15 = vld [vmem:[#allocation5 + $0x398] sm:$0xff]  ;;  %v5691_v29 = vld [vmem:[#allocation5 + $0x320] sm:$0xff] }
 0x414   :  { %v2519_v43 = vpack.c.bf16 %v2503_v62, %v2487_v47  ;;  %v2520_v55 = vpack.c.bf16 %v2504_v13, %v2488_v50  ;;  %3617 = vmatmul.bf16.vlgmr.msrb.gmra.mxu1 %v2517_v18  ;;  %3631 = vmatmul.bf16.vlgmr.msrb.gmra.mxu2 %v2518_v41  ;;  %v5655_v62 = vld [vmem:[#allocation5 + $0x200] sm:$0xff]  ;;  %v5694_v50 = vld [vmem:[#allocation5 + $0x338] sm:$0xff]  ;;  %v2394_v46 = vmul.f32 %v2362_v31, %v6456_v45  ;;  %v2479_v33 = vpop.permute.xlu2 %2478  ;;  %v5712_v27 = vld [vmem:[#allocation5 + $0x3c8] sm:$0xff] }
 0x415   :  { %3669 = vmatpush.bf16.msra.mxu1 %v5658_v37  ;;  %3683 = vmatpush.bf16.msra.mxu2 %v5666_v57  ;;  %v5663_v13 = vld [vmem:[#allocation5 + $0x240] sm:$0xff]  ;;  %v2392_v37 = vmul.f32 %v2360_v40, %v6559_v11  ;;  %v5714_v36 = vld [vmem:[#allocation5 + $0x3d8] sm:$0xff] }
 0x416   :  { %3645 = vmatmul.bf16.vlgmr.msrb.gmra.mxu3 %v2519_v43  ;;  %3659 = vmatmul.bf16.vlgmr.msra.gmra.mxu0 %v2520_v55  ;;  %v6560_v57 = vld [vmem:[#allocation21_spill] sm:$0xff]  ;;  %v5884_v43 = vpop.eup %5883  ;;  %v6561_v55 = vld [vmem:[#allocation24_spill] sm:$0xff]  ;;  %v2492_v45 = vmul.f32 %v6414_v14, %v2394_v46 }
 0x417   :  { %3749 = vmatpush.bf16.msrb.mxu3 %v5710_v58  ;;  %3763 = vmatpush.bf16.msra.mxu0 %v5718_v8  ;;  %v2391_v48 = vmul.f32 %v2359_v59, %v6560_v57  ;;  %v5707_v58 = vld [vmem:[#allocation5 + $0x3a0] sm:$0xff]  ;;  %v5690_v57 = vld [vmem:[#allocation5 + $0x318] sm:$0xff] }
 0x418   :  { %v2172_v56 = vpop.f32.mrf.mxu3  ;;  %v5715_v8 = vld [vmem:[#allocation5 + $0x3e0] sm:$0xff] }
 0x419   :  { %3670 = vmatpush.bf16.msra.mxu1 %v5657_v54  ;;  %3684 = vmatpush.bf16.msra.mxu2 %v5665_v53  ;;  %v2489_v49 = vmul.f32 %v6561_v55, %v2391_v48  ;;  %v2490_v54 = vmul.f32 %v6561_v55, %v2392_v37  ;;  %v5886_v53 = vpop.eup %5885  ;;  %v5699_v7 = vld [vmem:[#allocation5 + $0x360] sm:$0xff]  ;;  %v5698_v48 = vld [vmem:[#allocation5 + $0x358] sm:$0xff] }
 0x41a   :  { %v2455_v4 = vpop.permute.xlu1 %2454  ;;  %v6499_v18 = vpop.f32.mrf.mxu0  ;;  %v5695_v55 = vld [vmem:[#allocation5 + $0x340] sm:$0xff] }
 0x41b   :  { %3750 = vmatpush.bf16.msrb.mxu3 %v5709_v38  ;;  %3764 = vmatpush.bf16.msra.mxu0 %v5717_v42  ;;  %v2505_v41 = vmul.f32 %v2455_v4, %v2407_v16  ;;  %v2506_v47 = vmul.f32 %v2455_v4, %v2408_v52  ;;  %v5888_v38 = vpop.eup %5887  ;;  %v2410_v42 = vmul.f32 %v2378_v19, %v2132_v23  ;;  %v5692_v4 = vld [vmem:[#allocation5 + $0x328] sm:$0xff]  ;;  %v5713_v52 = vld [vmem:[#allocation5 + $0x3d0] sm:$0xff] }
 0x41c   :  { %v5890_v22 = vpop.eup %5889  ;;  %v2365_v23 = vmul.f32 %v5884_v43, %v6293_v20  ;;  %v2366_v9 = vmul.f32 %v5888_v38, %v6295_v28  ;;  %v5687_v43 = vld [vmem:[#allocation5 + $0x300] sm:$0xff] }
 0x41d   :  { %3671 = vmatpush.bf16.msra.mxu1 %v5656_v34  ;;  %3685 = vmatpush.bf16.msra.mxu2 %v5664_v26  ;;  %v2521_v35 = vpack.c.bf16 %v2505_v41, %v2489_v49  ;;  %v2522_v21 = vpack.c.bf16 %v2506_v47, %v2490_v54  ;;  %v2491_v34 = vmul.f32 %v6414_v14, %v2393_v32  ;;  %v5705_v14 = vld [vmem:[#allocation5 + $0x390] sm:$0xff]  ;;  %v5703_v47 = vld [vmem:[#allocation5 + $0x380] sm:$0xff] }
 0x41e   :  { %v2382_v17 = vmul.f32 %v5890_v22, %v6308_v63  ;;  %v2397_v20 = vmul.f32 %v2365_v23, %v2172_v56  ;;  %v5704_v63 = vld [vmem:[#allocation5 + $0x388] sm:$0xff] }
 0x41f   :  { %3751 = vmatpush.bf16.msrb.mxu3 %v5708_v39  ;;  %3765 = vmatpush.bf16.msra.mxu0 %v5716_v44  ;;  %v5700_v39 = vld [vmem:[#allocation5 + $0x368] sm:$0xff]  ;;  %v2381_v44 = vmul.f32 %v5886_v53, %v6306_v24  ;;  %v2398_v24 = vmul.f32 %v2366_v9, %v6499_v18  ;;  %v5711_v18 = vld [vmem:[#allocation5 + $0x3c0] sm:$0xff] }
 0x420   :  { %v2174_v0 = vpop.f32.mrf.mxu3 }
 0x421   :  { %3672 = vmatpush.bf16.msra.mxu1 %v5655_v62  ;;  %3686 = vmatpush.bf16.msra.mxu2 %v5663_v13  ;;  %v2413_v31 = vmul.f32 %v2381_v44, %v2174_v0 }
 0x422   :  { %v2188_v16 = vpop.f32.mrf.mxu0 }
 0x423   :  { %v2463_v26 = vpop.permute.xlu1 %2462  ;;  %3752 = vmatpush.bf16.msrb.mxu3 %v5707_v58  ;;  %3766 = vmatpush.bf16.msra.mxu0 %v5715_v8  ;;  %v2414_v28 = vmul.f32 %v2382_v17, %v2188_v16  ;;  %v2511_v62 = vmul.f32 %v2479_v33, %v2413_v31  ;;  %v5688_v58 = vld [vmem:[#allocation5 + $0x308] sm:$0xff] }
 0x424   :  { %v2507_v1 = vmul.f32 %v2463_v26, %v2409_v6  ;;  %v2508_v5 = vmul.f32 %v2463_v26, %v2410_v42  ;;  %3673 = vmatmul.bf16.vlgmr.msra.gmra.mxu1 %v2521_v35  ;;  %3687 = vmatmul.bf16.vlgmr.msra.gmra.mxu2 %v2522_v21  ;;  %v5696_v8 = vld [vmem:[#allocation5 + $0x348] sm:$0xff] }
 0x425   :  { %3721 = vmatpush.bf16.msrb.mxu1 %v5694_v50  ;;  %3735 = vmatpush.bf16.msrb.mxu2 %v5702_v30  ;;  %v2512_v13 = vmul.f32 %v2479_v33, %v2414_v28  ;;  %v5689_v50 = vld [vmem:[#allocation5 + $0x310] sm:$0xff] }
 0x426   :  { %v2523_v40 = vpack.c.bf16 %v2507_v1, %v2491_v34  ;;  %v2524_v59 = vpack.c.bf16 %v2508_v5, %v2492_v45  ;;  %v5697_v30 = vld [vmem:[#allocation5 + $0x350] sm:$0xff] }
 0x427   :  { %3753 = vmatpush.bf16.msrb.mxu3 %v5706_v15  ;;  %3767 = vmatpush.bf16.msra.mxu0 %v5714_v36 }
 0x428   :  { %3701 = vmatmul.bf16.vlgmr.msra.gmra.mxu3 %v2523_v40  ;;  %3715 = vmatmul.bf16.vlgmr.msrb.gmra.mxu0 %v2524_v59 }
 0x429   :  { %3722 = vmatpush.bf16.msrb.mxu1 %v5693_v2  ;;  %3736 = vmatpush.bf16.msrb.mxu2 %v5701_v3 }
 0x42b   :  { %3754 = vmatpush.bf16.msrb.mxu3 %v5705_v14  ;;  %3768 = vmatpush.bf16.msra.mxu0 %v5713_v52 }
 0x42c   :  { %v2475_v19 = vpop.permute.xlu1 %2474 }
 0x42d   :  { %3723 = vmatpush.bf16.msrb.mxu1 %v5692_v4  ;;  %3737 = vmatpush.bf16.msrb.mxu2 %v5700_v39  ;;  %v2495_v11 = vmul.f32 %v2475_v19, %v2397_v20  ;;  %v2496_v37 = vmul.f32 %v2475_v19, %v2398_v24 }
 0x42f   :  { %v2527_v56 = vpack.c.bf16 %v2511_v62, %v2495_v11  ;;  %v2528_v41 = vpack.c.bf16 %v2512_v13, %v2496_v37  ;;  %3755 = vmatpush.bf16.msrb.mxu3 %v5704_v63  ;;  %3769 = vmatpush.bf16.msra.mxu0 %v5712_v27 }
 0x431   :  { %3724 = vmatpush.bf16.msrb.mxu1 %v5691_v29  ;;  %3738 = vmatpush.bf16.msrb.mxu2 %v5699_v7 }
 0x433   :  { %3756 = vmatpush.bf16.msrb.mxu3 %v5703_v47  ;;  %3770 = vmatpush.bf16.msra.mxu0 %v5711_v18 }
 0x435   :  { %3725 = vmatpush.bf16.msrb.mxu1 %v5690_v57  ;;  %3739 = vmatpush.bf16.msrb.mxu2 %v5698_v48 }
 0x438   :  { %3757 = vmatmul.bf16.vlgmr.msrb.gmra.mxu3 %v2527_v56  ;;  %3771 = vmatmul.bf16.vlgmr.msra.gmra.mxu0 %v2528_v41 }
 0x439   :  { %3726 = vmatpush.bf16.msrb.mxu1 %v5689_v50  ;;  %3740 = vmatpush.bf16.msrb.mxu2 %v5697_v30 }
 0x43d   :  { %3727 = vmatpush.bf16.msrb.mxu1 %v5688_v58  ;;  %3741 = vmatpush.bf16.msrb.mxu2 %v5696_v8 }
 0x441   :  { %3728 = vmatpush.bf16.msrb.mxu1 %v5687_v43  ;;  %3742 = vmatpush.bf16.msrb.mxu2 %v5695_v55 }
 0x444   :  { %3729 = vmatmul.bf16.vlgmr.msrb.gmra.mxu1 %v2525_v10  ;;  %3743 = vmatmul.bf16.vlgmr.msrb.gmra.mxu2 %v2526_v61 }
 0x468   :  { %v3604_v32 = vpop.f32.mrf.mxu0 }
 0x46e   :  { %v3590_v53 = vpop.f32.mrf.mxu3 }
 0x470   :  { %v3606_v42 = vpop.f32.mrf.mxu0 }
 0x476   :  { %v3592_v38 = vpop.f32.mrf.mxu3 }
 0x481   :  { %v3562_v49 = vpop.f32.mrf.mxu1 }
 0x487   :  { %v3576_v54 = vpop.f32.mrf.mxu2 }
 0x488   :  { %v3577_v34 = vadd.f32 %v3576_v54, %v3562_v49 }
 0x489   :  { %v3564_v6 = vpop.f32.mrf.mxu1 }
 0x48a   :  { %v3591_v60 = vadd.f32 %v3590_v53, %v3577_v34 }
 0x48c   :  { %v3605_v51 = vadd.f32 %v3604_v32, %v3591_v60 }
 0x48f   :  { %v3578_v46 = vpop.f32.mrf.mxu2 }
 0x490   :  { %v3579_v25 = vadd.f32 %v3578_v46, %v3564_v6 }
 0x491   :  { %v3618_v35 = vpop.f32.mrf.mxu1 }
 0x492   :  { %v3619_v15 = vadd.f32 %v3618_v35, %v3605_v51  ;;  %v3593_v36 = vadd.f32 %v3592_v38, %v3579_v25 }
 0x493   :  { %v3660_v3 = vpop.f32.mrf.mxu0 }
 0x494   :  { %v3607_v40 = vadd.f32 %v3606_v42, %v3593_v36 }
 0x497   :  { %v3632_v21 = vpop.f32.mrf.mxu2 }
 0x498   :  { %v3633_v45 = vadd.f32 %v3632_v21, %v3619_v15 }
 0x499   :  { %v3646_v2 = vpop.f32.mrf.mxu3  ;;  %v3620_v22 = vpop.f32.mrf.mxu1 }
 0x49a   :  { %v3647_v59 = vadd.f32 %v3646_v2, %v3633_v45  ;;  %v3621_v4 = vadd.f32 %v3620_v22, %v3607_v40 }
 0x49b   :  { %v3662_v26 = vpop.f32.mrf.mxu0 }
 0x49c   :  { %v3661_v9 = vadd.f32 %v3660_v3, %v3647_v59 }
 0x49f   :  { %v3634_v12 = vpop.f32.mrf.mxu2 }
 0x4a0   :  { %v3635_v44 = vadd.f32 %v3634_v12, %v3621_v4 }
 0x4a1   :  { %v3648_v10 = vpop.f32.mrf.mxu3  ;;  %v3674_v61 = vpop.f32.mrf.mxu1 }
 0x4a2   :  { %v3675_v17 = vadd.f32 %v3674_v61, %v3661_v9  ;;  %v3649_v52 = vadd.f32 %v3648_v10, %v3635_v44 }
 0x4a4   :  { %v3663_v7 = vadd.f32 %v3662_v26, %v3649_v52 }
 0x4a5   :  { %v3716_v5 = vpop.f32.mrf.mxu0 }
 0x4a7   :  { %v3688_v23 = vpop.f32.mrf.mxu2 }
 0x4a8   :  { %v3689_v0 = vadd.f32 %v3688_v23, %v3675_v17 }
 0x4a9   :  { %v3676_v39 = vpop.f32.mrf.mxu1 }
 0x4aa   :  { %v3677_v31 = vadd.f32 %v3676_v39, %v3663_v7 }
 0x4ab   :  { %v3702_v1 = vpop.f32.mrf.mxu3 }
 0x4ac   :  { %v3703_v33 = vadd.f32 %v3702_v1, %v3689_v0 }
 0x4ad   :  { %v3718_v16 = vpop.f32.mrf.mxu0 }
 0x4ae   :  { %v3717_v24 = vadd.f32 %v3716_v5, %v3703_v33 }
 0x4af   :  { %v3690_v20 = vpop.f32.mrf.mxu2 }
 0x4b0   :  { %v3691_v28 = vadd.f32 %v3690_v20, %v3677_v31 }
 0x4b3   :  { %v3704_v14 = vpop.f32.mrf.mxu3 }
 0x4b4   :  { %v3705_v62 = vadd.f32 %v3704_v14, %v3691_v28 }
 0x4b5   :  { %v3772_v11 = vpop.f32.mrf.mxu0 }
 0x4b6   :  { %v3719_v56 = vadd.f32 %v3718_v16, %v3705_v62 }
 0x4bb   :  { %v3758_v27 = vpop.f32.mrf.mxu3 }
 0x4bd   :  { %v3774_v58 = vpop.f32.mrf.mxu0 }
 0x4c1   :  { %v3730_v29 = vpop.f32.mrf.mxu1 }
 0x4c2   :  { %v3731_v63 = vadd.f32 %v3730_v29, %v3717_v24 }
 0x4c3   :  { %v3760_v50 = vpop.f32.mrf.mxu3 }
 0x4c7   :  { %v3744_v19 = vpop.f32.mrf.mxu2 }
 0x4c8   :  { %v3745_v13 = vadd.f32 %v3744_v19, %v3731_v63 }
 0x4c9   :  { %v3732_v57 = vpop.f32.mrf.mxu1 }
 0x4ca   :  { %v3759_v37 = vadd.f32 %v3758_v27, %v3745_v13  ;;  %v3733_v41 = vadd.f32 %v3732_v57, %v3719_v56 }
 0x4cc   :  { %v3773_v48 = vadd.f32 %v3772_v11, %v3759_v37 }
 0x4ce   :  { %3777 = vst [vmem:[#allocation7] sm:$0xff] %v3773_v48 }
 0x4cf   :  { %v3746_v47 = vpop.f32.mrf.mxu2 }
 0x4d0   :  { %v3747_v18 = vadd.f32 %v3746_v47, %v3733_v41 }
 0x4d2   :  { %v3761_v30 = vadd.f32 %v3760_v50, %v3747_v18 }
 0x4d4   :  { %v3775_v8 = vadd.f32 %v3774_v58, %v3761_v30 }
 0x4d6   :  { %3778 = vst [vmem:[#allocation7 + $0x8] sm:$0xff] %v3775_v8 }
 0x4d7   :  { %3791 = dma.vmem_to_hbm [thread:$0]  %s3784_s12, 256, %s3786_s10, [#allocation4], %s5971_s24, %s5971_s24, %s5984_s13  }
 0x4d8   :  { %5967 = dma.done.wait [#allocation4], 256  }
 0x4d9   :  { %5968 = vsyncadd [#allocation4], 4294967040 }
 0x4da   :  { %3796 = vsyncpa [#allocation3], 1 }
 0x4db   :  { %3797 = vsyncpa [#allocation6], 1 }
 0x4dc   :  { %3798 = vsyncpa [#allocation4], 1 }

</bundles_post_ra>
